<compile_context>
chip_gen: v7x
topology: tpu7x:2x2x1
jax: 0.10.0
libtpu: 0.0.40
codegen_flags: <defaults>
</compile_context>

<pallas_src>
import functools

import jax
import jax.numpy as jnp
from jax import lax
from jax.experimental import pallas as pl
from jax.experimental.pallas import tpu as pltpu

BN_EPS = 1e-5


def _round_up(x, m):
    return ((x + m - 1) // m) * m


def _pick_band_rows(H, requested):
    """Largest divisor of H that is <= the requested band height."""
    target = 32 if requested is None else max(1, min(requested, H))
    best = 1
    for d in range(1, H + 1):
        if H % d == 0 and d <= target:
            best = d
    return best


def _col_mask(rows, P, W):
    # Flattened rows are m = lo*P + w with w in [0, P); only w < W are real
    # pixels (the extra columns exist so every conv tap is one contiguous
    # slice).  They are masked from BN statistics and sliced off at the end.
    col = lax.broadcasted_iota(jnp.int32, (rows, 1), 0) % P
    return col < W


def _conv1_stats_kernel(x_ref, w1_ref, st_ref, *, W, P, BH):
    """conv1 (3x3, pad 1, no bias) on one row band -> BN1 partial statistics."""
    out_rows = BH * P
    x = x_ref[...].astype(jnp.float32)      # one bf16->f32 widen of the block
    base = P                                # band interior starts 1 halo row in
    acc = jnp.dot(x[base:base + out_rows, :].astype(jnp.bfloat16), w1_ref[0],
                  preferred_element_type=jnp.float32)
    for k in range(1, 9):                   # unrolled: contiguous taps
        dh, dw = divmod(k, 3)
        off = base + dh * P + dw
        acc += jnp.dot(x[off:off + out_rows, :].astype(jnp.bfloat16), w1_ref[k],
                       preferred_element_type=jnp.float32)
    masked = jnp.where(_col_mask(out_rows, P, W), acc, 0.0)
    st_ref[0:1, :] = jnp.sum(masked, axis=0, keepdims=True)
    st_ref[1:2, :] = jnp.sum(masked * masked, axis=0, keepdims=True)


def _conv2_stats_kernel(x_ref, w1_ref, w2_ref, s1_ref, t1_ref,
                        z2_ref, st_ref, apad_ref, *, W, P, BH, nb):
    """Recompute conv1 (band + halo), BN1 + ReLU, conv2, BN2 partial stats."""
    ext = (BH + 2) * P                      # band rows + 1-row halo each side
    out_rows = BH * P
    Cp = w2_ref.shape[-1]
    APe = apad_ref.shape[0]

    # --- conv1 recompute over the extended window (avoids y1 HBM round trip) ---
    x = x_ref[...].astype(jnp.float32)
    acc1 = jnp.dot(x[0:ext, :].astype(jnp.bfloat16), w1_ref[0],
                   preferred_element_type=jnp.float32)
    for k in range(1, 9):
        dh, dw = divmod(k, 3)
        off = dh * P + dw
        acc1 += jnp.dot(x[off:off + ext, :].astype(jnp.bfloat16), w1_ref[k],
                        preferred_element_type=jnp.float32)

    # --- BN1 (global affine) + ReLU; zero out-of-image halo rows & pad cols ---
    a = jnp.maximum(acc1 * s1_ref[...] + t1_ref[...], 0.0)
    rid = lax.broadcasted_iota(jnp.int32, (ext, 1), 0)
    b = pl.program_id(1)
    lo_start = jnp.where(b == 0, P, 0)               # first band: top halo = 0
    hi_end = jnp.where(b == nb - 1, (BH + 1) * P, ext)  # last band: bottom halo
    valid = jnp.logical_and(jnp.logical_and(rid >= lo_start, rid < hi_end),
                            (rid % P) < W)
    a = jnp.where(valid, a, 0.0)

    # --- assemble conv2's zero-padded input: one contiguous interior store at
    #     column-shift offset 1, plus a handful of head/tail zero rows (cheap;
    #     re-done every step so megacore scratch never carries stale state). ---
    apad_ref[0:1, :] = jnp.zeros((1, Cp), jnp.float32)
    apad_ref[1 + ext:APe, :] = jnp.zeros((APe - 1 - ext, Cp), jnp.float32)
    apad_ref[1:1 + ext, :] = a

    # --- conv2 over the band's BH interior rows ---
    acc2 = jnp.dot(apad_ref[0:out_rows, :].astype(jnp.bfloat16), w2_ref[0],
                   preferred_element_type=jnp.float32)
    for k in range(1, 9):
        dh, dw = divmod(k, 3)
        off = dh * P + dw
        acc2 += jnp.dot(apad_ref[off:off + out_rows, :].astype(jnp.bfloat16),
                        w2_ref[k], preferred_element_type=jnp.float32)

    z2_ref[...] = acc2.astype(jnp.bfloat16)          # bf16 HBM intermediate
    masked = jnp.where(_col_mask(out_rows, P, W), acc2, 0.0)  # stats in f32
    st_ref[0:1, :] = jnp.sum(masked, axis=0, keepdims=True)
    st_ref[1:2, :] = jnp.sum(masked * masked, axis=0, keepdims=True)


def _bn2_skip_kernel(z2_ref, x_ref, wm_ref, s2_ref, t2_ref, bm_ref, o_ref,
                     *, P, BH):
    """BN2 (global affine) + 1x1 skip conv + residual add, lane-dense store."""
    out_rows = BH * P
    xc = x_ref[...].astype(jnp.float32)[2 * P + 1:2 * P + 1 + out_rows, :]
    skip = jnp.dot(xc.astype(jnp.bfloat16), wm_ref[...],
                   preferred_element_type=jnp.float32)
    o_ref[...] = (z2_ref[...].astype(jnp.float32) * s2_ref[...] + t2_ref[...]
                  + skip + bm_ref[...])


def resnet_block_forward(x_nchw, params, *, band_rows=None):
    """params = (w1, b1, g1, be1, w2, b2, g2, be2, wm, bm); conv weights HWIO."""
    w1, b1, g1, be1, w2, b2, g2, be2, wm, bm = params
    del b1, b2  # exactly cancelled by the batch-stat BN that follows each conv

    N, Cin, H, W = x_nchw.shape
    Cout = w1.shape[-1]
    P = W + 2                                   # padded row width (flattened)
    BH = _pick_band_rows(H, band_rows)          # output rows per band
    nb = H // BH
    ext = (BH + 2) * P                          # band + 1-row conv halo
    out_rows = BH * P
    XBe = _round_up((BH + 4) * P + 2, 16)       # band + 2-row halo (+tap slack)
    APe = _round_up(ext + 2, 16)                # conv2 padded-activation scratch
    Cp = _round_up(Cout, 128)                   # lane-dense channel padding
    pc = Cp - Cout

    # ---- layout prep: NCHW -> zero-padded, row-banded, flattened, bf16 ----
    x_nhwc = jnp.transpose(x_nchw, (0, 2, 3, 1)).astype(jnp.float32)
    xpad = jnp.pad(x_nhwc, ((0, 0), (2, 2), (1, 1), (0, 0)))   # (N, H+4, P, Cin)
    win = jnp.arange(nb)[:, None] * BH + jnp.arange(BH + 4)[None, :]
    xb = xpad[:, win].reshape(N, nb, (BH + 4) * P, Cin)        # halo duplicated
    xbands = jnp.pad(xb, ((0, 0), (0, 0), (0, XBe - (BH + 4) * P), (0, 0))
                     ).astype(jnp.bfloat16)

    w1_t = jnp.pad(w1, ((0, 0), (0, 0), (0, 0), (0, pc))
                   ).reshape(9, Cin, Cp).astype(jnp.bfloat16)
    w2_t = jnp.pad(w2, ((0, 0), (0, 0), (0, pc), (0, pc))
                   ).reshape(9, Cp, Cp).astype(jnp.bfloat16)
    wm_t = jnp.pad(wm, ((0, 0), (0, pc))).astype(jnp.bfloat16)

    def padc(v):
        return jnp.pad(v.astype(jnp.float32), (0, pc)).reshape(1, Cp)

    g1p, be1p, g2p, be2p, bm_p = map(padc, (g1, be1, g2, be2, bm))

    # ---- explicit VMEM budget (double-buffered bands + weights + scratch) ----
    def _vmem_limit():
        w1_b, w2_b = 9 * Cin * Cp * 2, 9 * Cp * Cp * 2
        xb_b = XBe * Cin * 2
        z2_b, st_b = out_rows * Cp * 2, 2 * Cp * 4
        o_b, vec_b = out_rows * Cp * 4, Cp * 4
        p1 = 2 * (xb_b + st_b) + w1_b
        p2 = 2 * (xb_b + z2_b + st_b) + w1_b + w2_b + 2 * vec_b + APe * Cp * 4
        p3 = 2 * (z2_b + xb_b + o_b) + Cin * Cp * 2 + 3 * vec_b
        est = max(p1, p2, p3)
        return int(min(max(2 * est + (4 << 20), 16 << 20), 48 << 20))

    cparams = pltpu.CompilerParams(
        dimension_semantics=("parallel", "parallel"),
        vmem_limit_bytes=_vmem_limit())

    def band_spec(rows, ch):
        return pl.BlockSpec((None, None, rows, ch), lambda n, b: (n, b, 0, 0))

    def full_spec(shape):
        return pl.BlockSpec(shape, lambda n, b: (0,) * len(shape))

    x_spec = band_spec(XBe, Cin)
    z2_spec = band_spec(out_rows, Cp)
    st_spec = band_spec(2, Cp)

    # ---- pass 1: conv1 -> per-(image, band) partial BN1 statistics ----
    st1 = pl.pallas_call(
        functools.partial(_conv1_stats_kernel, W=W, P=P, BH=BH),
        grid_spec=pltpu.PrefetchScalarGridSpec(
            num_scalar_prefetch=0, grid=(N, nb),
            in_specs=(x_spec, full_spec((9, Cin, Cp))),
            out_specs=st_spec),
        out_shape=jax.ShapeDtypeStruct((N, nb, 2, Cp), jnp.float32),
        compiler_params=cparams,
    )(xbands, w1_t)

    n_valid = float(N * H * W)

    def bn_affine(st, gamma, beta):
        # Single-pass E[x^2]-E[x]^2 in f32 (clamped); fine at these scales.
        tot = jnp.sum(st, axis=(0, 1))                     # (2, Cp)
        mean = tot[0] / n_valid
        var = jnp.maximum(tot[1] / n_valid - mean * mean, 0.0)
        scale = gamma[0] * lax.rsqrt(var + BN_EPS)
        shift = beta[0] - mean * scale
        return scale.reshape(1, Cp), shift.reshape(1, Cp)

    s1, t1 = bn_affine(st1, g1p, be1p)

    # ---- pass 2: conv1 recompute + BN1 + ReLU + conv2 + partial BN2 stats ----
    z2, st2 = pl.pallas_call(
        functools.partial(_conv2_stats_kernel, W=W, P=P, BH=BH, nb=nb),
        grid_spec=pltpu.PrefetchScalarGridSpec(
            num_scalar_prefetch=0, grid=(N, nb),
            in_specs=(x_spec, full_spec((9, Cin, Cp)), full_spec((9, Cp, Cp)),
                      full_spec((1, Cp)), full_spec((1, Cp))),
            out_specs=(z2_spec, st_spec),
            scratch_shapes=[pltpu.VMEM((APe, Cp), jnp.float32)]),
        out_shape=(jax.ShapeDtypeStruct((N, nb, out_rows, Cp), jnp.bfloat16),
                   jax.ShapeDtypeStruct((N, nb, 2, Cp), jnp.float32)),
        compiler_params=cparams,
    )(xbands, w1_t, w2_t, s1, t1)

    s2, t2 = bn_affine(st2, g2p, be2p)

    # ---- pass 3: BN2 affine + 1x1 skip conv + residual add ----
    out_flat = pl.pallas_call(
        functools.partial(_bn2_skip_kernel, P=P, BH=BH),
        grid_spec=pltpu.PrefetchScalarGridSpec(
            num_scalar_prefetch=0, grid=(N, nb),
            in_specs=(z2_spec, x_spec, full_spec((Cin, Cp)),
                      full_spec((1, Cp)), full_spec((1, Cp)),
                      full_spec((1, Cp))),
            out_specs=band_spec(out_rows, Cp)),
        out_shape=jax.ShapeDtypeStruct((N, nb, out_rows, Cp), jnp.float32),
        compiler_params=cparams,
    )(z2, xbands, wm_t, s2, t2, bm_p)

    # TODO(synk): a fused downstream consumer should take this padded, flat
    # NHWC layout directly; the slice + NCHW transpose below is one extra
    # memory-bound XLA pass kept only to honor the module's NCHW contract.
    out = out_flat.reshape(N, H, P, Cp)[:, :, :W, :Cout]
    return jnp.transpose(out, (0, 3, 1, 2))


def _reference_forward(x_nchw, params):
    """Pure-JAX reference (lax.conv) with identical semantics, for validation."""
    w1, b1, g1, be1, w2, b2, g2, be2, wm, bm = params
    x = jnp.transpose(x_nchw, (0, 2, 3, 1)).astype(jnp.float32)
    dn = ('NHWC', 'HWIO', 'NHWC')

    def conv(v, w, b, pad):
        y = lax.conv_general_dilated(v, w, (1, 1), [(pad, pad), (pad, pad)],
                                     dimension_numbers=dn)
        return y + b

    def bn(v, g, be):
        mean = jnp.mean(v, axis=(0, 1, 2), keepdims=True)
        var = jnp.mean((v - mean) ** 2, axis=(0, 1, 2), keepdims=True)
        return (v - mean) * lax.rsqrt(var + BN_EPS) * g + be

    y = jnp.maximum(bn(conv(x, w1, b1, 1), g1, be1), 0.0)
    y = bn(conv(y, w2, b2, 1), g2, be2)
    imap = conv(x, wm.reshape(1, 1, *wm.shape), bm, 0)
    return jnp.transpose(y + imap, (0, 3, 1, 2))


def _init_params(key, cin, cout):
    ks = jax.random.split(key, 10)
    w1 = 0.2 * jax.random.normal(ks[0], (3, 3, cin, cout), jnp.float32)
    b1 = 0.1 * jax.random.normal(ks[1], (cout,), jnp.float32)
    g1 = 1.0 + 0.1 * jax.random.normal(ks[2], (cout,), jnp.float32)
    be1 = 0.1 * jax.random.normal(ks[3], (cout,), jnp.float32)
    w2 = 0.2 * jax.random.normal(ks[4], (3, 3, cout, cout), jnp.float32)
    b2 = 0.1 * jax.random.normal(ks[5], (cout,), jnp.float32)
    g2 = 1.0 + 0.1 * jax.random.normal(ks[6], (cout,), jnp.float32)
    be2 = 0.1 * jax.random.normal(ks[7], (cout,), jnp.float32)
    wm = 0.2 * jax.random.normal(ks[8], (cin, cout), jnp.float32)
    bm = 0.1 * jax.random.normal(ks[9], (cout,), jnp.float32)
    return (w1, b1, g1, be1, w2, b2, g2, be2, wm, bm)


if __name__ == "__main__":
    key = jax.random.PRNGKey(0)
    k_x, k_p = jax.random.split(key)

    N, Cin, Cout, H, W = 2, 4, 8, 16, 16
    x = jax.random.normal(k_x, (N, Cin, H, W), jnp.float32)   # NCHW like PyTorch
    params = _init_params(k_p, Cin, Cout)

    # band_rows=8 -> 2 bands per image at this small size, exercising the
    # multi-band halo-recompute path (auto default is bands of <=32 rows).
    fwd = jax.jit(functools.partial(resnet_block_forward, band_rows=8))
    out = jax.block_until_ready(fwd(x, params))
    ref = jax.block_until_ready(_reference_forward(x, params))

    assert out.shape == (N, Cout, H, W), out.shape
    # bf16 MXU inputs / bf16 intermediates (f32 accumulation and BN statistics)
    # -> loosened tolerance.
    assert jnp.allclose(out, ref, rtol=5e-2, atol=5e-2), \
        f"max abs err = {jnp.max(jnp.abs(out - ref))}"
    print("KERNEL_OK")
</pallas_src>

<mosaic_0001>
module attributes {stable_mosaic.version = 11 : i64} {
  func.func @_conv1_stats_kernel(%arg0: i32, %arg1: i32, %arg2: memref<1x1x224x4xbf16, #tpu.memory_space<vmem>>, %arg3: memref<9x4x128xbf16, #tpu.memory_space<vmem>>, %arg4: memref<1x1x2x128xf32, #tpu.memory_space<vmem>>) attributes {dimension_semantics = [#tpu.dimension_semantics<parallel>, #tpu.dimension_semantics<parallel>], iteration_bounds = array<i64: 2, 2>, scalar_prefetch = 0 : i64, scratch_operands = 0 : i64, tpu.core_type = #tpu.core_type<tc>, window_params = [{transform_indices = @transform_0, window_bounds = array<i64: 1, 1, 224, 4>}, {pipeline_mode = #tpu.pipeline_mode<synchronous>, transform_indices = @transform_1, window_bounds = array<i64: 9, 4, 128>}, {transform_indices = @transform_2, window_bounds = array<i64: 1, 1, 2, 128>}]} {
    %c0 = arith.constant 0 : index
    %c0_0 = arith.constant 0 : index
    %c0_1 = arith.constant 0 : index
    %c0_2 = arith.constant 0 : index
    %0 = vector.load %arg2[%c0, %c0_0, %c0_1, %c0_2] : memref<1x1x224x4xbf16, #tpu.memory_space<vmem>>, vector<1x1x224x4xbf16>
    %1 = vector.shape_cast %0 : vector<1x1x224x4xbf16> to vector<224x4xbf16>
    %2 = arith.extf %1 : vector<224x4xbf16> to vector<224x4xf32>
    %3 = vector.extract_strided_slice %2 {offsets = [18, 0], sizes = [144, 4], strides = [1, 1]} : vector<224x4xf32> to vector<144x4xf32>
    %4 = arith.truncf %3 : vector<144x4xf32> to vector<144x4xbf16>
    %c0_3 = arith.constant 0 : index
    %c0_4 = arith.constant 0 : index
    %c0_5 = arith.constant 0 : index
    %5 = vector.load %arg3[%c0_3, %c0_4, %c0_5] : memref<9x4x128xbf16, #tpu.memory_space<vmem>>, vector<1x4x128xbf16>
    %6 = vector.shape_cast %5 : vector<1x4x128xbf16> to vector<4x128xbf16>
    %cst = arith.constant dense<0.000000e+00> : vector<144x128xf32>
    %7 = tpu.matmul %4, %6, %cst {dimension_numbers = #tpu.dot_dimension_numbers<[1], [0], [0], [1], [0, 0, 1, 1], [], []>} : vector<144x4xbf16>, vector<4x128xbf16>, vector<144x128xf32> -> vector<144x128xf32>
    %8 = vector.extract_strided_slice %2 {offsets = [19, 0], sizes = [144, 4], strides = [1, 1]} : vector<224x4xf32> to vector<144x4xf32>
    %9 = arith.truncf %8 : vector<144x4xf32> to vector<144x4xbf16>
    %c1 = arith.constant 1 : index
    %c0_6 = arith.constant 0 : index
    %c0_7 = arith.constant 0 : index
    %10 = vector.load %arg3[%c1, %c0_6, %c0_7] : memref<9x4x128xbf16, #tpu.memory_space<vmem>>, vector<1x4x128xbf16>
    %11 = vector.shape_cast %10 : vector<1x4x128xbf16> to vector<4x128xbf16>
    %cst_8 = arith.constant dense<0.000000e+00> : vector<144x128xf32>
    %12 = tpu.matmul %9, %11, %cst_8 {dimension_numbers = #tpu.dot_dimension_numbers<[1], [0], [0], [1], [0, 0, 1, 1], [], []>} : vector<144x4xbf16>, vector<4x128xbf16>, vector<144x128xf32> -> vector<144x128xf32>
    %13 = arith.addf %7, %12 : vector<144x128xf32>
    %14 = vector.extract_strided_slice %2 {offsets = [20, 0], sizes = [144, 4], strides = [1, 1]} : vector<224x4xf32> to vector<144x4xf32>
    %15 = arith.truncf %14 : vector<144x4xf32> to vector<144x4xbf16>
    %c2 = arith.constant 2 : index
    %c0_9 = arith.constant 0 : index
    %c0_10 = arith.constant 0 : index
    %16 = vector.load %arg3[%c2, %c0_9, %c0_10] : memref<9x4x128xbf16, #tpu.memory_space<vmem>>, vector<1x4x128xbf16>
    %17 = vector.shape_cast %16 : vector<1x4x128xbf16> to vector<4x128xbf16>
    %cst_11 = arith.constant dense<0.000000e+00> : vector<144x128xf32>
    %18 = tpu.matmul %15, %17, %cst_11 {dimension_numbers = #tpu.dot_dimension_numbers<[1], [0], [0], [1], [0, 0, 1, 1], [], []>} : vector<144x4xbf16>, vector<4x128xbf16>, vector<144x128xf32> -> vector<144x128xf32>
    %19 = arith.addf %13, %18 : vector<144x128xf32>
    %20 = vector.extract_strided_slice %2 {offsets = [36, 0], sizes = [144, 4], strides = [1, 1]} : vector<224x4xf32> to vector<144x4xf32>
    %21 = arith.truncf %20 : vector<144x4xf32> to vector<144x4xbf16>
    %c3 = arith.constant 3 : index
    %c0_12 = arith.constant 0 : index
    %c0_13 = arith.constant 0 : index
    %22 = vector.load %arg3[%c3, %c0_12, %c0_13] : memref<9x4x128xbf16, #tpu.memory_space<vmem>>, vector<1x4x128xbf16>
    %23 = vector.shape_cast %22 : vector<1x4x128xbf16> to vector<4x128xbf16>
    %cst_14 = arith.constant dense<0.000000e+00> : vector<144x128xf32>
    %24 = tpu.matmul %21, %23, %cst_14 {dimension_numbers = #tpu.dot_dimension_numbers<[1], [0], [0], [1], [0, 0, 1, 1], [], []>} : vector<144x4xbf16>, vector<4x128xbf16>, vector<144x128xf32> -> vector<144x128xf32>
    %25 = arith.addf %19, %24 : vector<144x128xf32>
    %26 = vector.extract_strided_slice %2 {offsets = [37, 0], sizes = [144, 4], strides = [1, 1]} : vector<224x4xf32> to vector<144x4xf32>
    %27 = arith.truncf %26 : vector<144x4xf32> to vector<144x4xbf16>
    %c4 = arith.constant 4 : index
    %c0_15 = arith.constant 0 : index
    %c0_16 = arith.constant 0 : index
    %28 = vector.load %arg3[%c4, %c0_15, %c0_16] : memref<9x4x128xbf16, #tpu.memory_space<vmem>>, vector<1x4x128xbf16>
    %29 = vector.shape_cast %28 : vector<1x4x128xbf16> to vector<4x128xbf16>
    %cst_17 = arith.constant dense<0.000000e+00> : vector<144x128xf32>
    %30 = tpu.matmul %27, %29, %cst_17 {dimension_numbers = #tpu.dot_dimension_numbers<[1], [0], [0], [1], [0, 0, 1, 1], [], []>} : vector<144x4xbf16>, vector<4x128xbf16>, vector<144x128xf32> -> vector<144x128xf32>
    %31 = arith.addf %25, %30 : vector<144x128xf32>
    %32 = vector.extract_strided_slice %2 {offsets = [38, 0], sizes = [144, 4], strides = [1, 1]} : vector<224x4xf32> to vector<144x4xf32>
    %33 = arith.truncf %32 : vector<144x4xf32> to vector<144x4xbf16>
    %c5 = arith.constant 5 : index
    %c0_18 = arith.constant 0 : index
    %c0_19 = arith.constant 0 : index
    %34 = vector.load %arg3[%c5, %c0_18, %c0_19] : memref<9x4x128xbf16, #tpu.memory_space<vmem>>, vector<1x4x128xbf16>
    %35 = vector.shape_cast %34 : vector<1x4x128xbf16> to vector<4x128xbf16>
    %cst_20 = arith.constant dense<0.000000e+00> : vector<144x128xf32>
    %36 = tpu.matmul %33, %35, %cst_20 {dimension_numbers = #tpu.dot_dimension_numbers<[1], [0], [0], [1], [0, 0, 1, 1], [], []>} : vector<144x4xbf16>, vector<4x128xbf16>, vector<144x128xf32> -> vector<144x128xf32>
    %37 = arith.addf %31, %36 : vector<144x128xf32>
    %38 = vector.extract_strided_slice %2 {offsets = [54, 0], sizes = [144, 4], strides = [1, 1]} : vector<224x4xf32> to vector<144x4xf32>
    %39 = arith.truncf %38 : vector<144x4xf32> to vector<144x4xbf16>
    %c6 = arith.constant 6 : index
    %c0_21 = arith.constant 0 : index
    %c0_22 = arith.constant 0 : index
    %40 = vector.load %arg3[%c6, %c0_21, %c0_22] : memref<9x4x128xbf16, #tpu.memory_space<vmem>>, vector<1x4x128xbf16>
    %41 = vector.shape_cast %40 : vector<1x4x128xbf16> to vector<4x128xbf16>
    %cst_23 = arith.constant dense<0.000000e+00> : vector<144x128xf32>
    %42 = tpu.matmul %39, %41, %cst_23 {dimension_numbers = #tpu.dot_dimension_numbers<[1], [0], [0], [1], [0, 0, 1, 1], [], []>} : vector<144x4xbf16>, vector<4x128xbf16>, vector<144x128xf32> -> vector<144x128xf32>
    %43 = arith.addf %37, %42 : vector<144x128xf32>
    %44 = vector.extract_strided_slice %2 {offsets = [55, 0], sizes = [144, 4], strides = [1, 1]} : vector<224x4xf32> to vector<144x4xf32>
    %45 = arith.truncf %44 : vector<144x4xf32> to vector<144x4xbf16>
    %c7 = arith.constant 7 : index
    %c0_24 = arith.constant 0 : index
    %c0_25 = arith.constant 0 : index
    %46 = vector.load %arg3[%c7, %c0_24, %c0_25] : memref<9x4x128xbf16, #tpu.memory_space<vmem>>, vector<1x4x128xbf16>
    %47 = vector.shape_cast %46 : vector<1x4x128xbf16> to vector<4x128xbf16>
    %cst_26 = arith.constant dense<0.000000e+00> : vector<144x128xf32>
    %48 = tpu.matmul %45, %47, %cst_26 {dimension_numbers = #tpu.dot_dimension_numbers<[1], [0], [0], [1], [0, 0, 1, 1], [], []>} : vector<144x4xbf16>, vector<4x128xbf16>, vector<144x128xf32> -> vector<144x128xf32>
    %49 = arith.addf %43, %48 : vector<144x128xf32>
    %50 = vector.extract_strided_slice %2 {offsets = [56, 0], sizes = [144, 4], strides = [1, 1]} : vector<224x4xf32> to vector<144x4xf32>
    %51 = arith.truncf %50 : vector<144x4xf32> to vector<144x4xbf16>
    %c8 = arith.constant 8 : index
    %c0_27 = arith.constant 0 : index
    %c0_28 = arith.constant 0 : index
    %52 = vector.load %arg3[%c8, %c0_27, %c0_28] : memref<9x4x128xbf16, #tpu.memory_space<vmem>>, vector<1x4x128xbf16>
    %53 = vector.shape_cast %52 : vector<1x4x128xbf16> to vector<4x128xbf16>
    %cst_29 = arith.constant dense<0.000000e+00> : vector<144x128xf32>
    %54 = tpu.matmul %51, %53, %cst_29 {dimension_numbers = #tpu.dot_dimension_numbers<[1], [0], [0], [1], [0, 0, 1, 1], [], []>} : vector<144x4xbf16>, vector<4x128xbf16>, vector<144x128xf32> -> vector<144x128xf32>
    %55 = arith.addf %49, %54 : vector<144x128xf32>
    %56 = tpu.iota {dimensions = array<i32: 0>} : vector<144x1xi32>
    %c18_i32 = arith.constant 18 : i32
    %c0_i32 = arith.constant 0 : i32
    %57 = arith.cmpi eq, %c18_i32, %c0_i32 : i32
    %c1_i32 = arith.constant 1 : i32
    %58 = arith.select %57, %c1_i32, %c18_i32 : i32
    %59 = vector.broadcast %58 : i32 to vector<144x1xi32>
    %60 = arith.remsi %56, %59 : vector<144x1xi32>
    %c0_i32_30 = arith.constant 0 : i32
    %61 = vector.broadcast %c0_i32_30 : i32 to vector<144x1xi32>
    %62 = arith.cmpi ne, %60, %61 : vector<144x1xi32>
    %c0_i32_31 = arith.constant 0 : i32
    %63 = vector.broadcast %c0_i32_31 : i32 to vector<144x1xi32>
    %64 = arith.cmpi slt, %60, %63 : vector<144x1xi32>
    %c0_i32_32 = arith.constant 0 : i32
    %65 = arith.cmpi slt, %58, %c0_i32_32 : i32
    %66 = vector.broadcast %65 : i1 to vector<144x1xi1>
    %67 = vector.broadcast %66 : vector<144x1xi1> to vector<144x1xi1>
    %68 = arith.xori %64, %67 : vector<144x1xi1>
    %69 = arith.andi %68, %62 : vector<144x1xi1>
    %70 = vector.broadcast %58 : i32 to vector<144x1xi32>
    %71 = arith.addi %60, %70 : vector<144x1xi32>
    %72 = arith.select %69, %71, %60 : vector<144x1xi1>, vector<144x1xi32>
    %c16_i32 = arith.constant 16 : i32
    %73 = vector.broadcast %c16_i32 : i32 to vector<144x1xi32>
    %74 = arith.cmpi slt, %72, %73 : vector<144x1xi32>
    %cst_33 = arith.constant 0.000000e+00 : f32
    %75 = vector.shape_cast %74 : vector<144x1xi1> to vector<144x1xi1>
    %76 = vector.broadcast %75 : vector<144x1xi1> to vector<144x128xi1>
    %77 = vector.broadcast %cst_33 : f32 to vector<144x128xf32>
    %78 = arith.select %76, %55, %77 : vector<144x128xi1>, vector<144x128xf32>
    %cst_34 = arith.constant dense<0.000000e+00> : vector<128xf32>
    %79 = vector.multi_reduction <add>, %78, %cst_34 [0] : vector<144x128xf32> to vector<128xf32>
    %80 = vector.shape_cast %79 : vector<128xf32> to vector<1x128xf32>
    %c0_35 = arith.constant 0 : index
    %c0_36 = arith.constant 0 : index
    %c0_37 = arith.constant 0 : index
    %c0_38 = arith.constant 0 : index
    %81 = vector.load %arg4[%c0_35, %c0_36, %c0_37, %c0_38] : memref<1x1x2x128xf32, #tpu.memory_space<vmem>>, vector<1x1x1x128xf32>
    %82 = vector.shape_cast %81 : vector<1x1x1x128xf32> to vector<1x128xf32>
    %83 = vector.shape_cast %80 : vector<1x128xf32> to vector<1x1x1x128xf32>
    tpu.vector_store %arg4[%c0_35, %c0_36, %c0_37, %c0_38], %83 {strides = array<i32>} : memref<1x1x2x128xf32, #tpu.memory_space<vmem>>, vector<1x1x1x128xf32>,
    %84 = arith.mulf %78, %78 : vector<144x128xf32>
    %cst_39 = arith.constant dense<0.000000e+00> : vector<128xf32>
    %85 = vector.multi_reduction <add>, %84, %cst_39 [0] : vector<144x128xf32> to vector<128xf32>
    %86 = vector.shape_cast %85 : vector<128xf32> to vector<1x128xf32>
    %c0_40 = arith.constant 0 : index
    %c0_41 = arith.constant 0 : index
    %c1_42 = arith.constant 1 : index
    %c0_43 = arith.constant 0 : index
    %87 = vector.load %arg4[%c0_40, %c0_41, %c1_42, %c0_43] : memref<1x1x2x128xf32, #tpu.memory_space<vmem>>, vector<1x1x1x128xf32>
    %88 = vector.shape_cast %87 : vector<1x1x1x128xf32> to vector<1x128xf32>
    %89 = vector.shape_cast %86 : vector<1x128xf32> to vector<1x1x1x128xf32>
    tpu.vector_store %arg4[%c0_40, %c0_41, %c1_42, %c0_43], %89 {strides = array<i32>} : memref<1x1x2x128xf32, #tpu.memory_space<vmem>>, vector<1x1x1x128xf32>,
    return
  }
  func.func @transform_0(%arg0: i32, %arg1: i32) -> (i32, i32, i32, i32) {
    %c0_i32 = arith.constant 0 : i32
    %c0_i32_0 = arith.constant 0 : i32
    %c0_i32_1 = arith.constant 0 : i32
    return %arg0, %arg1, %c0_i32, %c0_i32_0 : i32, i32, i32, i32
  }
  func.func @transform_1(%arg0: i32, %arg1: i32) -> (i32, i32, i32) {
    %c0_i32 = arith.constant 0 : i32
    %c0_i32_0 = arith.constant 0 : i32
    %c0_i32_1 = arith.constant 0 : i32
    %c0_i32_2 = arith.constant 0 : i32
    return %c0_i32, %c0_i32_0, %c0_i32_1 : i32, i32, i32
  }
  func.func @transform_2(%arg0: i32, %arg1: i32) -> (i32, i32, i32, i32) {
    %c0_i32 = arith.constant 0 : i32
    %c0_i32_0 = arith.constant 0 : i32
    %c0_i32_1 = arith.constant 0 : i32
    return %arg0, %arg1, %c0_i32, %c0_i32_0 : i32, i32, i32, i32
  }
}

module attributes {stable_mosaic.version = 11 : i64} {
  func.func @_conv2_stats_kernel(%arg0: i32, %arg1: i32, %arg2: memref<1x1x224x4xbf16, #tpu.memory_space<vmem>>, %arg3: memref<9x4x128xbf16, #tpu.memory_space<vmem>>, %arg4: memref<9x128x128xbf16, #tpu.memory_space<vmem>>, %arg5: memref<1x128xf32, #tpu.memory_space<vmem>>, %arg6: memref<1x128xf32, #tpu.memory_space<vmem>>, %arg7: memref<1x1x144x128xbf16, #tpu.memory_space<vmem>>, %arg8: memref<1x1x2x128xf32, #tpu.memory_space<vmem>>, %arg9: memref<192x128xf32, #tpu.memory_space<vmem>>) attributes {dimension_semantics = [#tpu.dimension_semantics<parallel>, #tpu.dimension_semantics<parallel>], iteration_bounds = array<i64: 2, 2>, scalar_prefetch = 0 : i64, scratch_operands = 1 : i64, tpu.core_type = #tpu.core_type<tc>, window_params = [{transform_indices = @transform_0, window_bounds = array<i64: 1, 1, 224, 4>}, {pipeline_mode = #tpu.pipeline_mode<synchronous>, transform_indices = @transform_1, window_bounds = array<i64: 9, 4, 128>}, {pipeline_mode = #tpu.pipeline_mode<synchronous>, transform_indices = @transform_2, window_bounds = array<i64: 9, 128, 128>}, {pipeline_mode = #tpu.pipeline_mode<synchronous>, transform_indices = @transform_3, window_bounds = array<i64: 1, 128>}, {pipeline_mode = #tpu.pipeline_mode<synchronous>, transform_indices = @transform_4, window_bounds = array<i64: 1, 128>}, {transform_indices = @transform_5, window_bounds = array<i64: 1, 1, 144, 128>}, {transform_indices = @transform_6, window_bounds = array<i64: 1, 1, 2, 128>}]} {
    %c0 = arith.constant 0 : index
    %c0_0 = arith.constant 0 : index
    %c0_1 = arith.constant 0 : index
    %c0_2 = arith.constant 0 : index
    %0 = vector.load %arg2[%c0, %c0_0, %c0_1, %c0_2] : memref<1x1x224x4xbf16, #tpu.memory_space<vmem>>, vector<1x1x224x4xbf16>
    %1 = vector.shape_cast %0 : vector<1x1x224x4xbf16> to vector<224x4xbf16>
    %2 = arith.extf %1 : vector<224x4xbf16> to vector<224x4xf32>
    %3 = vector.extract_strided_slice %2 {offsets = [0, 0], sizes = [180, 4], strides = [1, 1]} : vector<224x4xf32> to vector<180x4xf32>
    %4 = arith.truncf %3 : vector<180x4xf32> to vector<180x4xbf16>
    %c0_3 = arith.constant 0 : index
    %c0_4 = arith.constant 0 : index
    %c0_5 = arith.constant 0 : index
    %5 = vector.load %arg3[%c0_3, %c0_4, %c0_5] : memref<9x4x128xbf16, #tpu.memory_space<vmem>>, vector<1x4x128xbf16>
    %6 = vector.shape_cast %5 : vector<1x4x128xbf16> to vector<4x128xbf16>
    %cst = arith.constant dense<0.000000e+00> : vector<180x128xf32>
    %7 = tpu.matmul %4, %6, %cst {dimension_numbers = #tpu.dot_dimension_numbers<[1], [0], [0], [1], [0, 0, 1, 1], [], []>} : vector<180x4xbf16>, vector<4x128xbf16>, vector<180x128xf32> -> vector<180x128xf32>
    %8 = vector.extract_strided_slice %2 {offsets = [1, 0], sizes = [180, 4], strides = [1, 1]} : vector<224x4xf32> to vector<180x4xf32>
    %9 = arith.truncf %8 : vector<180x4xf32> to vector<180x4xbf16>
    %c1 = arith.constant 1 : index
    %c0_6 = arith.constant 0 : index
    %c0_7 = arith.constant 0 : index
    %10 = vector.load %arg3[%c1, %c0_6, %c0_7] : memref<9x4x128xbf16, #tpu.memory_space<vmem>>, vector<1x4x128xbf16>
    %11 = vector.shape_cast %10 : vector<1x4x128xbf16> to vector<4x128xbf16>
    %cst_8 = arith.constant dense<0.000000e+00> : vector<180x128xf32>
    %12 = tpu.matmul %9, %11, %cst_8 {dimension_numbers = #tpu.dot_dimension_numbers<[1], [0], [0], [1], [0, 0, 1, 1], [], []>} : vector<180x4xbf16>, vector<4x128xbf16>, vector<180x128xf32> -> vector<180x128xf32>
    %13 = arith.addf %7, %12 : vector<180x128xf32>
    %14 = vector.extract_strided_slice %2 {offsets = [2, 0], sizes = [180, 4], strides = [1, 1]} : vector<224x4xf32> to vector<180x4xf32>
    %15 = arith.truncf %14 : vector<180x4xf32> to vector<180x4xbf16>
    %c2 = arith.constant 2 : index
    %c0_9 = arith.constant 0 : index
    %c0_10 = arith.constant 0 : index
    %16 = vector.load %arg3[%c2, %c0_9, %c0_10] : memref<9x4x128xbf16, #tpu.memory_space<vmem>>, vector<1x4x128xbf16>
    %17 = vector.shape_cast %16 : vector<1x4x128xbf16> to vector<4x128xbf16>
    %cst_11 = arith.constant dense<0.000000e+00> : vector<180x128xf32>
    %18 = tpu.matmul %15, %17, %cst_11 {dimension_numbers = #tpu.dot_dimension_numbers<[1], [0], [0], [1], [0, 0, 1, 1], [], []>} : vector<180x4xbf16>, vector<4x128xbf16>, vector<180x128xf32> -> vector<180x128xf32>
    %19 = arith.addf %13, %18 : vector<180x128xf32>
    %20 = vector.extract_strided_slice %2 {offsets = [18, 0], sizes = [180, 4], strides = [1, 1]} : vector<224x4xf32> to vector<180x4xf32>
    %21 = arith.truncf %20 : vector<180x4xf32> to vector<180x4xbf16>
    %c3 = arith.constant 3 : index
    %c0_12 = arith.constant 0 : index
    %c0_13 = arith.constant 0 : index
    %22 = vector.load %arg3[%c3, %c0_12, %c0_13] : memref<9x4x128xbf16, #tpu.memory_space<vmem>>, vector<1x4x128xbf16>
    %23 = vector.shape_cast %22 : vector<1x4x128xbf16> to vector<4x128xbf16>
    %cst_14 = arith.constant dense<0.000000e+00> : vector<180x128xf32>
    %24 = tpu.matmul %21, %23, %cst_14 {dimension_numbers = #tpu.dot_dimension_numbers<[1], [0], [0], [1], [0, 0, 1, 1], [], []>} : vector<180x4xbf16>, vector<4x128xbf16>, vector<180x128xf32> -> vector<180x128xf32>
    %25 = arith.addf %19, %24 : vector<180x128xf32>
    %26 = vector.extract_strided_slice %2 {offsets = [19, 0], sizes = [180, 4], strides = [1, 1]} : vector<224x4xf32> to vector<180x4xf32>
    %27 = arith.truncf %26 : vector<180x4xf32> to vector<180x4xbf16>
    %c4 = arith.constant 4 : index
    %c0_15 = arith.constant 0 : index
    %c0_16 = arith.constant 0 : index
    %28 = vector.load %arg3[%c4, %c0_15, %c0_16] : memref<9x4x128xbf16, #tpu.memory_space<vmem>>, vector<1x4x128xbf16>
    %29 = vector.shape_cast %28 : vector<1x4x128xbf16> to vector<4x128xbf16>
    %cst_17 = arith.constant dense<0.000000e+00> : vector<180x128xf32>
    %30 = tpu.matmul %27, %29, %cst_17 {dimension_numbers = #tpu.dot_dimension_numbers<[1], [0], [0], [1], [0, 0, 1, 1], [], []>} : vector<180x4xbf16>, vector<4x128xbf16>, vector<180x128xf32> -> vector<180x128xf32>
    %31 = arith.addf %25, %30 : vector<180x128xf32>
    %32 = vector.extract_strided_slice %2 {offsets = [20, 0], sizes = [180, 4], strides = [1, 1]} : vector<224x4xf32> to vector<180x4xf32>
    %33 = arith.truncf %32 : vector<180x4xf32> to vector<180x4xbf16>
    %c5 = arith.constant 5 : index
    %c0_18 = arith.constant 0 : index
    %c0_19 = arith.constant 0 : index
    %34 = vector.load %arg3[%c5, %c0_18, %c0_19] : memref<9x4x128xbf16, #tpu.memory_space<vmem>>, vector<1x4x128xbf16>
    %35 = vector.shape_cast %34 : vector<1x4x128xbf16> to vector<4x128xbf16>
    %cst_20 = arith.constant dense<0.000000e+00> : vector<180x128xf32>
    %36 = tpu.matmul %33, %35, %cst_20 {dimension_numbers = #tpu.dot_dimension_numbers<[1], [0], [0], [1], [0, 0, 1, 1], [], []>} : vector<180x4xbf16>, vector<4x128xbf16>, vector<180x128xf32> -> vector<180x128xf32>
    %37 = arith.addf %31, %36 : vector<180x128xf32>
    %38 = vector.extract_strided_slice %2 {offsets = [36, 0], sizes = [180, 4], strides = [1, 1]} : vector<224x4xf32> to vector<180x4xf32>
    %39 = arith.truncf %38 : vector<180x4xf32> to vector<180x4xbf16>
    %c6 = arith.constant 6 : index
    %c0_21 = arith.constant 0 : index
    %c0_22 = arith.constant 0 : index
    %40 = vector.load %arg3[%c6, %c0_21, %c0_22] : memref<9x4x128xbf16, #tpu.memory_space<vmem>>, vector<1x4x128xbf16>
    %41 = vector.shape_cast %40 : vector<1x4x128xbf16> to vector<4x128xbf16>
    %cst_23 = arith.constant dense<0.000000e+00> : vector<180x128xf32>
    %42 = tpu.matmul %39, %41, %cst_23 {dimension_numbers = #tpu.dot_dimension_numbers<[1], [0], [0], [1], [0, 0, 1, 1], [], []>} : vector<180x4xbf16>, vector<4x128xbf16>, vector<180x128xf32> -> vector<180x128xf32>
    %43 = arith.addf %37, %42 : vector<180x128xf32>
    %44 = vector.extract_strided_slice %2 {offsets = [37, 0], sizes = [180, 4], strides = [1, 1]} : vector<224x4xf32> to vector<180x4xf32>
    %45 = arith.truncf %44 : vector<180x4xf32> to vector<180x4xbf16>
    %c7 = arith.constant 7 : index
    %c0_24 = arith.constant 0 : index
    %c0_25 = arith.constant 0 : index
    %46 = vector.load %arg3[%c7, %c0_24, %c0_25] : memref<9x4x128xbf16, #tpu.memory_space<vmem>>, vector<1x4x128xbf16>
    %47 = vector.shape_cast %46 : vector<1x4x128xbf16> to vector<4x128xbf16>
    %cst_26 = arith.constant dense<0.000000e+00> : vector<180x128xf32>
    %48 = tpu.matmul %45, %47, %cst_26 {dimension_numbers = #tpu.dot_dimension_numbers<[1], [0], [0], [1], [0, 0, 1, 1], [], []>} : vector<180x4xbf16>, vector<4x128xbf16>, vector<180x128xf32> -> vector<180x128xf32>
    %49 = arith.addf %43, %48 : vector<180x128xf32>
    %50 = vector.extract_strided_slice %2 {offsets = [38, 0], sizes = [180, 4], strides = [1, 1]} : vector<224x4xf32> to vector<180x4xf32>
    %51 = arith.truncf %50 : vector<180x4xf32> to vector<180x4xbf16>
    %c8 = arith.constant 8 : index
    %c0_27 = arith.constant 0 : index
    %c0_28 = arith.constant 0 : index
    %52 = vector.load %arg3[%c8, %c0_27, %c0_28] : memref<9x4x128xbf16, #tpu.memory_space<vmem>>, vector<1x4x128xbf16>
    %53 = vector.shape_cast %52 : vector<1x4x128xbf16> to vector<4x128xbf16>
    %cst_29 = arith.constant dense<0.000000e+00> : vector<180x128xf32>
    %54 = tpu.matmul %51, %53, %cst_29 {dimension_numbers = #tpu.dot_dimension_numbers<[1], [0], [0], [1], [0, 0, 1, 1], [], []>} : vector<180x4xbf16>, vector<4x128xbf16>, vector<180x128xf32> -> vector<180x128xf32>
    %55 = arith.addf %49, %54 : vector<180x128xf32>
    %c0_30 = arith.constant 0 : index
    %c0_31 = arith.constant 0 : index
    %56 = vector.load %arg5[%c0_30, %c0_31] : memref<1x128xf32, #tpu.memory_space<vmem>>, vector<1x128xf32>
    %57 = vector.broadcast %56 : vector<1x128xf32> to vector<180x128xf32>
    %58 = arith.mulf %55, %57 : vector<180x128xf32>
    %c0_32 = arith.constant 0 : index
    %c0_33 = arith.constant 0 : index
    %59 = vector.load %arg6[%c0_32, %c0_33] : memref<1x128xf32, #tpu.memory_space<vmem>>, vector<1x128xf32>
    %60 = vector.broadcast %59 : vector<1x128xf32> to vector<180x128xf32>
    %61 = arith.addf %58, %60 : vector<180x128xf32>
    %cst_34 = arith.constant 0.000000e+00 : f32
    %62 = vector.broadcast %cst_34 : f32 to vector<180x128xf32>
    %63 = arith.maximumf %61, %62 : vector<180x128xf32>
    %64 = tpu.iota {dimensions = array<i32: 0>} : vector<180x1xi32>
    %c0_i32 = arith.constant 0 : i32
    %65 = arith.cmpi eq, %arg1, %c0_i32 : i32
    %c18_i32 = arith.constant 18 : i32
    %c0_i32_35 = arith.constant 0 : i32
    %66 = arith.select %65, %c18_i32, %c0_i32_35 : i32
    %c1_i32 = arith.constant 1 : i32
    %67 = arith.cmpi eq, %arg1, %c1_i32 : i32
    %c162_i32 = arith.constant 162 : i32
    %c180_i32 = arith.constant 180 : i32
    %68 = arith.select %67, %c162_i32, %c180_i32 : i32
    %69 = vector.broadcast %66 : i32 to vector<180x1xi32>
    %70 = arith.cmpi sge, %64, %69 : vector<180x1xi32>
    %71 = vector.broadcast %68 : i32 to vector<180x1xi32>
    %72 = arith.cmpi slt, %64, %71 : vector<180x1xi32>
    %73 = arith.andi %70, %72 : vector<180x1xi1>
    %c18_i32_36 = arith.constant 18 : i32
    %c0_i32_37 = arith.constant 0 : i32
    %74 = arith.cmpi eq, %c18_i32_36, %c0_i32_37 : i32
    %c1_i32_38 = arith.constant 1 : i32
    %75 = arith.select %74, %c1_i32_38, %c18_i32_36 : i32
    %76 = vector.broadcast %75 : i32 to vector<180x1xi32>
    %77 = arith.remsi %64, %76 : vector<180x1xi32>
    %c0_i32_39 = arith.constant 0 : i32
    %78 = vector.broadcast %c0_i32_39 : i32 to vector<180x1xi32>
    %79 = arith.cmpi ne, %77, %78 : vector<180x1xi32>
    %c0_i32_40 = arith.constant 0 : i32
    %80 = vector.broadcast %c0_i32_40 : i32 to vector<180x1xi32>
    %81 = arith.cmpi slt, %77, %80 : vector<180x1xi32>
    %c0_i32_41 = arith.constant 0 : i32
    %82 = arith.cmpi slt, %75, %c0_i32_41 : i32
    %83 = vector.broadcast %82 : i1 to vector<180x1xi1>
    %84 = vector.broadcast %83 : vector<180x1xi1> to vector<180x1xi1>
    %85 = arith.xori %81, %84 : vector<180x1xi1>
    %86 = arith.andi %85, %79 : vector<180x1xi1>
    %87 = vector.broadcast %75 : i32 to vector<180x1xi32>
    %88 = arith.addi %77, %87 : vector<180x1xi32>
    %89 = arith.select %86, %88, %77 : vector<180x1xi1>, vector<180x1xi32>
    %c16_i32 = arith.constant 16 : i32
    %90 = vector.broadcast %c16_i32 : i32 to vector<180x1xi32>
    %91 = arith.cmpi slt, %89, %90 : vector<180x1xi32>
    %92 = arith.andi %73, %91 : vector<180x1xi1>
    %cst_42 = arith.constant 0.000000e+00 : f32
    %93 = vector.shape_cast %92 : vector<180x1xi1> to vector<180x1xi1>
    %94 = vector.broadcast %93 : vector<180x1xi1> to vector<180x128xi1>
    %95 = vector.broadcast %cst_42 : f32 to vector<180x128xf32>
    %96 = arith.select %94, %63, %95 : vector<180x128xi1>, vector<180x128xf32>
    %cst_43 = arith.constant 0.000000e+00 : f32
    %97 = vector.broadcast %cst_43 : f32 to vector<1x128xf32>
    %c0_44 = arith.constant 0 : index
    %c0_45 = arith.constant 0 : index
    %98 = vector.load %arg9[%c0_44, %c0_45] : memref<192x128xf32, #tpu.memory_space<vmem>>, vector<1x128xf32>
    tpu.vector_store %arg9[%c0_44, %c0_45], %97 {strides = array<i32>} : memref<192x128xf32, #tpu.memory_space<vmem>>, vector<1x128xf32>,
    %cst_46 = arith.constant 0.000000e+00 : f32
    %99 = vector.broadcast %cst_46 : f32 to vector<11x128xf32>
    %c181 = arith.constant 181 : index
    %c0_47 = arith.constant 0 : index
    %100 = vector.load %arg9[%c181, %c0_47] : memref<192x128xf32, #tpu.memory_space<vmem>>, vector<11x128xf32>
    tpu.vector_store %arg9[%c181, %c0_47], %99 {strides = array<i32>} : memref<192x128xf32, #tpu.memory_space<vmem>>, vector<11x128xf32>,
    %c1_48 = arith.constant 1 : index
    %c0_49 = arith.constant 0 : index
    %101 = vector.load %arg9[%c1_48, %c0_49] : memref<192x128xf32, #tpu.memory_space<vmem>>, vector<180x128xf32>
    tpu.vector_store %arg9[%c1_48, %c0_49], %96 {strides = array<i32>} : memref<192x128xf32, #tpu.memory_space<vmem>>, vector<180x128xf32>,
    %c0_50 = arith.constant 0 : index
    %c0_51 = arith.constant 0 : index
    %102 = vector.load %arg9[%c0_50, %c0_51] : memref<192x128xf32, #tpu.memory_space<vmem>>, vector<144x128xf32>
    %103 = arith.truncf %102 : vector<144x128xf32> to vector<144x128xbf16>
    %c0_52 = arith.constant 0 : index
    %c0_53 = arith.constant 0 : index
    %c0_54 = arith.constant 0 : index
    %104 = vector.load %arg4[%c0_52, %c0_53, %c0_54] : memref<9x128x128xbf16, #tpu.memory_space<vmem>>, vector<1x128x128xbf16>
    %105 = vector.shape_cast %104 : vector<1x128x128xbf16> to vector<128x128xbf16>
    %cst_55 = arith.constant dense<0.000000e+00> : vector<144x128xf32>
    %106 = tpu.matmul %103, %105, %cst_55 {dimension_numbers = #tpu.dot_dimension_numbers<[1], [0], [0], [1], [0, 0, 1, 1], [], []>} : vector<144x128xbf16>, vector<128x128xbf16>, vector<144x128xf32> -> vector<144x128xf32>
    %c1_56 = arith.constant 1 : index
    %c0_57 = arith.constant 0 : index
    %107 = vector.load %arg9[%c1_56, %c0_57] : memref<192x128xf32, #tpu.memory_space<vmem>>, vector<144x128xf32>
    %108 = arith.truncf %107 : vector<144x128xf32> to vector<144x128xbf16>
    %c1_58 = arith.constant 1 : index
    %c0_59 = arith.constant 0 : index
    %c0_60 = arith.constant 0 : index
    %109 = vector.load %arg4[%c1_58, %c0_59, %c0_60] : memref<9x128x128xbf16, #tpu.memory_space<vmem>>, vector<1x128x128xbf16>
    %110 = vector.shape_cast %109 : vector<1x128x128xbf16> to vector<128x128xbf16>
    %cst_61 = arith.constant dense<0.000000e+00> : vector<144x128xf32>
    %111 = tpu.matmul %108, %110, %cst_61 {dimension_numbers = #tpu.dot_dimension_numbers<[1], [0], [0], [1], [0, 0, 1, 1], [], []>} : vector<144x128xbf16>, vector<128x128xbf16>, vector<144x128xf32> -> vector<144x128xf32>
    %112 = arith.addf %106, %111 : vector<144x128xf32>
    %c2_62 = arith.constant 2 : index
    %c0_63 = arith.constant 0 : index
    %113 = vector.load %arg9[%c2_62, %c0_63] : memref<192x128xf32, #tpu.memory_space<vmem>>, vector<144x128xf32>
    %114 = arith.truncf %113 : vector<144x128xf32> to vector<144x128xbf16>
    %c2_64 = arith.constant 2 : index
    %c0_65 = arith.constant 0 : index
    %c0_66 = arith.constant 0 : index
    %115 = vector.load %arg4[%c2_64, %c0_65, %c0_66] : memref<9x128x128xbf16, #tpu.memory_space<vmem>>, vector<1x128x128xbf16>
    %116 = vector.shape_cast %115 : vector<1x128x128xbf16> to vector<128x128xbf16>
    %cst_67 = arith.constant dense<0.000000e+00> : vector<144x128xf32>
    %117 = tpu.matmul %114, %116, %cst_67 {dimension_numbers = #tpu.dot_dimension_numbers<[1], [0], [0], [1], [0, 0, 1, 1], [], []>} : vector<144x128xbf16>, vector<128x128xbf16>, vector<144x128xf32> -> vector<144x128xf32>
    %118 = arith.addf %112, %117 : vector<144x128xf32>
    %c18 = arith.constant 18 : index
    %c0_68 = arith.constant 0 : index
    %119 = vector.load %arg9[%c18, %c0_68] : memref<192x128xf32, #tpu.memory_space<vmem>>, vector<144x128xf32>
    %120 = arith.truncf %119 : vector<144x128xf32> to vector<144x128xbf16>
    %c3_69 = arith.constant 3 : index
    %c0_70 = arith.constant 0 : index
    %c0_71 = arith.constant 0 : index
    %121 = vector.load %arg4[%c3_69, %c0_70, %c0_71] : memref<9x128x128xbf16, #tpu.memory_space<vmem>>, vector<1x128x128xbf16>
    %122 = vector.shape_cast %121 : vector<1x128x128xbf16> to vector<128x128xbf16>
    %cst_72 = arith.constant dense<0.000000e+00> : vector<144x128xf32>
    %123 = tpu.matmul %120, %122, %cst_72 {dimension_numbers = #tpu.dot_dimension_numbers<[1], [0], [0], [1], [0, 0, 1, 1], [], []>} : vector<144x128xbf16>, vector<128x128xbf16>, vector<144x128xf32> -> vector<144x128xf32>
    %124 = arith.addf %118, %123 : vector<144x128xf32>
    %c19 = arith.constant 19 : index
    %c0_73 = arith.constant 0 : index
    %125 = vector.load %arg9[%c19, %c0_73] : memref<192x128xf32, #tpu.memory_space<vmem>>, vector<144x128xf32>
    %126 = arith.truncf %125 : vector<144x128xf32> to vector<144x128xbf16>
    %c4_74 = arith.constant 4 : index
    %c0_75 = arith.constant 0 : index
    %c0_76 = arith.constant 0 : index
    %127 = vector.load %arg4[%c4_74, %c0_75, %c0_76] : memref<9x128x128xbf16, #tpu.memory_space<vmem>>, vector<1x128x128xbf16>
    %128 = vector.shape_cast %127 : vector<1x128x128xbf16> to vector<128x128xbf16>
    %cst_77 = arith.constant dense<0.000000e+00> : vector<144x128xf32>
    %129 = tpu.matmul %126, %128, %cst_77 {dimension_numbers = #tpu.dot_dimension_numbers<[1], [0], [0], [1], [0, 0, 1, 1], [], []>} : vector<144x128xbf16>, vector<128x128xbf16>, vector<144x128xf32> -> vector<144x128xf32>
    %130 = arith.addf %124, %129 : vector<144x128xf32>
    %c20 = arith.constant 20 : index
    %c0_78 = arith.constant 0 : index
    %131 = vector.load %arg9[%c20, %c0_78] : memref<192x128xf32, #tpu.memory_space<vmem>>, vector<144x128xf32>
    %132 = arith.truncf %131 : vector<144x128xf32> to vector<144x128xbf16>
    %c5_79 = arith.constant 5 : index
    %c0_80 = arith.constant 0 : index
    %c0_81 = arith.constant 0 : index
    %133 = vector.load %arg4[%c5_79, %c0_80, %c0_81] : memref<9x128x128xbf16, #tpu.memory_space<vmem>>, vector<1x128x128xbf16>
    %134 = vector.shape_cast %133 : vector<1x128x128xbf16> to vector<128x128xbf16>
    %cst_82 = arith.constant dense<0.000000e+00> : vector<144x128xf32>
    %135 = tpu.matmul %132, %134, %cst_82 {dimension_numbers = #tpu.dot_dimension_numbers<[1], [0], [0], [1], [0, 0, 1, 1], [], []>} : vector<144x128xbf16>, vector<128x128xbf16>, vector<144x128xf32> -> vector<144x128xf32>
    %136 = arith.addf %130, %135 : vector<144x128xf32>
    %c36 = arith.constant 36 : index
    %c0_83 = arith.constant 0 : index
    %137 = vector.load %arg9[%c36, %c0_83] : memref<192x128xf32, #tpu.memory_space<vmem>>, vector<144x128xf32>
    %138 = arith.truncf %137 : vector<144x128xf32> to vector<144x128xbf16>
    %c6_84 = arith.constant 6 : index
    %c0_85 = arith.constant 0 : index
    %c0_86 = arith.constant 0 : index
    %139 = vector.load %arg4[%c6_84, %c0_85, %c0_86] : memref<9x128x128xbf16, #tpu.memory_space<vmem>>, vector<1x128x128xbf16>
    %140 = vector.shape_cast %139 : vector<1x128x128xbf16> to vector<128x128xbf16>
    %cst_87 = arith.constant dense<0.000000e+00> : vector<144x128xf32>
    %141 = tpu.matmul %138, %140, %cst_87 {dimension_numbers = #tpu.dot_dimension_numbers<[1], [0], [0], [1], [0, 0, 1, 1], [], []>} : vector<144x128xbf16>, vector<128x128xbf16>, vector<144x128xf32> -> vector<144x128xf32>
    %142 = arith.addf %136, %141 : vector<144x128xf32>
    %c37 = arith.constant 37 : index
    %c0_88 = arith.constant 0 : index
    %143 = vector.load %arg9[%c37, %c0_88] : memref<192x128xf32, #tpu.memory_space<vmem>>, vector<144x128xf32>
    %144 = arith.truncf %143 : vector<144x128xf32> to vector<144x128xbf16>
    %c7_89 = arith.constant 7 : index
    %c0_90 = arith.constant 0 : index
    %c0_91 = arith.constant 0 : index
    %145 = vector.load %arg4[%c7_89, %c0_90, %c0_91] : memref<9x128x128xbf16, #tpu.memory_space<vmem>>, vector<1x128x128xbf16>
    %146 = vector.shape_cast %145 : vector<1x128x128xbf16> to vector<128x128xbf16>
    %cst_92 = arith.constant dense<0.000000e+00> : vector<144x128xf32>
    %147 = tpu.matmul %144, %146, %cst_92 {dimension_numbers = #tpu.dot_dimension_numbers<[1], [0], [0], [1], [0, 0, 1, 1], [], []>} : vector<144x128xbf16>, vector<128x128xbf16>, vector<144x128xf32> -> vector<144x128xf32>
    %148 = arith.addf %142, %147 : vector<144x128xf32>
    %c38 = arith.constant 38 : index
    %c0_93 = arith.constant 0 : index
    %149 = vector.load %arg9[%c38, %c0_93] : memref<192x128xf32, #tpu.memory_space<vmem>>, vector<144x128xf32>
    %150 = arith.truncf %149 : vector<144x128xf32> to vector<144x128xbf16>
    %c8_94 = arith.constant 8 : index
    %c0_95 = arith.constant 0 : index
    %c0_96 = arith.constant 0 : index
    %151 = vector.load %arg4[%c8_94, %c0_95, %c0_96] : memref<9x128x128xbf16, #tpu.memory_space<vmem>>, vector<1x128x128xbf16>
    %152 = vector.shape_cast %151 : vector<1x128x128xbf16> to vector<128x128xbf16>
    %cst_97 = arith.constant dense<0.000000e+00> : vector<144x128xf32>
    %153 = tpu.matmul %150, %152, %cst_97 {dimension_numbers = #tpu.dot_dimension_numbers<[1], [0], [0], [1], [0, 0, 1, 1], [], []>} : vector<144x128xbf16>, vector<128x128xbf16>, vector<144x128xf32> -> vector<144x128xf32>
    %154 = arith.addf %148, %153 : vector<144x128xf32>
    %155 = arith.truncf %154 : vector<144x128xf32> to vector<144x128xbf16>
    %c0_98 = arith.constant 0 : index
    %c0_99 = arith.constant 0 : index
    %c0_100 = arith.constant 0 : index
    %c0_101 = arith.constant 0 : index
    %156 = vector.load %arg7[%c0_98, %c0_99, %c0_100, %c0_101] : memref<1x1x144x128xbf16, #tpu.memory_space<vmem>>, vector<1x1x144x128xbf16>
    %157 = vector.shape_cast %156 : vector<1x1x144x128xbf16> to vector<144x128xbf16>
    %158 = vector.shape_cast %155 : vector<144x128xbf16> to vector<1x1x144x128xbf16>
    tpu.vector_store %arg7[%c0_98, %c0_99, %c0_100, %c0_101], %158 {strides = array<i32>} : memref<1x1x144x128xbf16, #tpu.memory_space<vmem>>, vector<1x1x144x128xbf16>,
    %159 = tpu.iota {dimensions = array<i32: 0>} : vector<144x1xi32>
    %c18_i32_102 = arith.constant 18 : i32
    %c0_i32_103 = arith.constant 0 : i32
    %160 = arith.cmpi eq, %c18_i32_102, %c0_i32_103 : i32
    %c1_i32_104 = arith.constant 1 : i32
    %161 = arith.select %160, %c1_i32_104, %c18_i32_102 : i32
    %162 = vector.broadcast %161 : i32 to vector<144x1xi32>
    %163 = arith.remsi %159, %162 : vector<144x1xi32>
    %c0_i32_105 = arith.constant 0 : i32
    %164 = vector.broadcast %c0_i32_105 : i32 to vector<144x1xi32>
    %165 = arith.cmpi ne, %163, %164 : vector<144x1xi32>
    %c0_i32_106 = arith.constant 0 : i32
    %166 = vector.broadcast %c0_i32_106 : i32 to vector<144x1xi32>
    %167 = arith.cmpi slt, %163, %166 : vector<144x1xi32>
    %c0_i32_107 = arith.constant 0 : i32
    %168 = arith.cmpi slt, %161, %c0_i32_107 : i32
    %169 = vector.broadcast %168 : i1 to vector<144x1xi1>
    %170 = vector.broadcast %169 : vector<144x1xi1> to vector<144x1xi1>
    %171 = arith.xori %167, %170 : vector<144x1xi1>
    %172 = arith.andi %171, %165 : vector<144x1xi1>
    %173 = vector.broadcast %161 : i32 to vector<144x1xi32>
    %174 = arith.addi %163, %173 : vector<144x1xi32>
    %175 = arith.select %172, %174, %163 : vector<144x1xi1>, vector<144x1xi32>
    %c16_i32_108 = arith.constant 16 : i32
    %176 = vector.broadcast %c16_i32_108 : i32 to vector<144x1xi32>
    %177 = arith.cmpi slt, %175, %176 : vector<144x1xi32>
    %cst_109 = arith.constant 0.000000e+00 : f32
    %178 = vector.shape_cast %177 : vector<144x1xi1> to vector<144x1xi1>
    %179 = vector.broadcast %178 : vector<144x1xi1> to vector<144x128xi1>
    %180 = vector.broadcast %cst_109 : f32 to vector<144x128xf32>
    %181 = arith.select %179, %154, %180 : vector<144x128xi1>, vector<144x128xf32>
    %cst_110 = arith.constant dense<0.000000e+00> : vector<128xf32>
    %182 = vector.multi_reduction <add>, %181, %cst_110 [0] : vector<144x128xf32> to vector<128xf32>
    %183 = vector.shape_cast %182 : vector<128xf32> to vector<1x128xf32>
    %c0_111 = arith.constant 0 : index
    %c0_112 = arith.constant 0 : index
    %c0_113 = arith.constant 0 : index
    %c0_114 = arith.constant 0 : index
    %184 = vector.load %arg8[%c0_111, %c0_112, %c0_113, %c0_114] : memref<1x1x2x128xf32, #tpu.memory_space<vmem>>, vector<1x1x1x128xf32>
    %185 = vector.shape_cast %184 : vector<1x1x1x128xf32> to vector<1x128xf32>
    %186 = vector.shape_cast %183 : vector<1x128xf32> to vector<1x1x1x128xf32>
    tpu.vector_store %arg8[%c0_111, %c0_112, %c0_113, %c0_114], %186 {strides = array<i32>} : memref<1x1x2x128xf32, #tpu.memory_space<vmem>>, vector<1x1x1x128xf32>,
    %187 = arith.mulf %181, %181 : vector<144x128xf32>
    %cst_115 = arith.constant dense<0.000000e+00> : vector<128xf32>
    %188 = vector.multi_reduction <add>, %187, %cst_115 [0] : vector<144x128xf32> to vector<128xf32>
    %189 = vector.shape_cast %188 : vector<128xf32> to vector<1x128xf32>
    %c0_116 = arith.constant 0 : index
    %c0_117 = arith.constant 0 : index
    %c1_118 = arith.constant 1 : index
    %c0_119 = arith.constant 0 : index
    %190 = vector.load %arg8[%c0_116, %c0_117, %c1_118, %c0_119] : memref<1x1x2x128xf32, #tpu.memory_space<vmem>>, vector<1x1x1x128xf32>
    %191 = vector.shape_cast %190 : vector<1x1x1x128xf32> to vector<1x128xf32>
    %192 = vector.shape_cast %189 : vector<1x128xf32> to vector<1x1x1x128xf32>
    tpu.vector_store %arg8[%c0_116, %c0_117, %c1_118, %c0_119], %192 {strides = array<i32>} : memref<1x1x2x128xf32, #tpu.memory_space<vmem>>, vector<1x1x1x128xf32>,
    return
  }
  func.func @transform_0(%arg0: i32, %arg1: i32) -> (i32, i32, i32, i32) {
    %c0_i32 = arith.constant 0 : i32
    %c0_i32_0 = arith.constant 0 : i32
    %c0_i32_1 = arith.constant 0 : i32
    return %arg0, %arg1, %c0_i32, %c0_i32_0 : i32, i32, i32, i32
  }
  func.func @transform_1(%arg0: i32, %arg1: i32) -> (i32, i32, i32) {
    %c0_i32 = arith.constant 0 : i32
    %c0_i32_0 = arith.constant 0 : i32
    %c0_i32_1 = arith.constant 0 : i32
    %c0_i32_2 = arith.constant 0 : i32
    return %c0_i32, %c0_i32_0, %c0_i32_1 : i32, i32, i32
  }
  func.func @transform_2(%arg0: i32, %arg1: i32) -> (i32, i32, i32) {
    %c0_i32 = arith.constant 0 : i32
    %c0_i32_0 = arith.constant 0 : i32
    %c0_i32_1 = arith.constant 0 : i32
    %c0_i32_2 = arith.constant 0 : i32
    return %c0_i32, %c0_i32_0, %c0_i32_1 : i32, i32, i32
  }
  func.func @transform_3(%arg0: i32, %arg1: i32) -> (i32, i32) {
    %c0_i32 = arith.constant 0 : i32
    %c0_i32_0 = arith.constant 0 : i32
    %c0_i32_1 = arith.constant 0 : i32
    return %c0_i32, %c0_i32_0 : i32, i32
  }
  func.func @transform_4(%arg0: i32, %arg1: i32) -> (i32, i32) {
    %c0_i32 = arith.constant 0 : i32
    %c0_i32_0 = arith.constant 0 : i32
    %c0_i32_1 = arith.constant 0 : i32
    return %c0_i32, %c0_i32_0 : i32, i32
  }
  func.func @transform_5(%arg0: i32, %arg1: i32) -> (i32, i32, i32, i32) {
    %c0_i32 = arith.constant 0 : i32
    %c0_i32_0 = arith.constant 0 : i32
    %c0_i32_1 = arith.constant 0 : i32
    return %arg0, %arg1, %c0_i32, %c0_i32_0 : i32, i32, i32, i32
  }
  func.func @transform_6(%arg0: i32, %arg1: i32) -> (i32, i32, i32, i32) {
    %c0_i32 = arith.constant 0 : i32
    %c0_i32_0 = arith.constant 0 : i32
    %c0_i32_1 = arith.constant 0 : i32
    return %arg0, %arg1, %c0_i32, %c0_i32_0 : i32, i32, i32, i32
  }
}

module attributes {stable_mosaic.version = 11 : i64} {
  func.func @_bn2_skip_kernel(%arg0: i32, %arg1: i32, %arg2: memref<1x1x144x128xbf16, #tpu.memory_space<vmem>>, %arg3: memref<1x1x224x4xbf16, #tpu.memory_space<vmem>>, %arg4: memref<4x128xbf16, #tpu.memory_space<vmem>>, %arg5: memref<1x128xf32, #tpu.memory_space<vmem>>, %arg6: memref<1x128xf32, #tpu.memory_space<vmem>>, %arg7: memref<1x128xf32, #tpu.memory_space<vmem>>, %arg8: memref<1x1x144x128xf32, #tpu.memory_space<vmem>>) attributes {dimension_semantics = [#tpu.dimension_semantics<parallel>, #tpu.dimension_semantics<parallel>], iteration_bounds = array<i64: 2, 2>, scalar_prefetch = 0 : i64, scratch_operands = 0 : i64, tpu.core_type = #tpu.core_type<tc>, window_params = [{transform_indices = @transform_0, window_bounds = array<i64: 1, 1, 144, 128>}, {transform_indices = @transform_1, window_bounds = array<i64: 1, 1, 224, 4>}, {pipeline_mode = #tpu.pipeline_mode<synchronous>, transform_indices = @transform_2, window_bounds = array<i64: 4, 128>}, {pipeline_mode = #tpu.pipeline_mode<synchronous>, transform_indices = @transform_3, window_bounds = array<i64: 1, 128>}, {pipeline_mode = #tpu.pipeline_mode<synchronous>, transform_indices = @transform_4, window_bounds = array<i64: 1, 128>}, {pipeline_mode = #tpu.pipeline_mode<synchronous>, transform_indices = @transform_5, window_bounds = array<i64: 1, 128>}, {transform_indices = @transform_6, window_bounds = array<i64: 1, 1, 144, 128>}]} {
    %c0 = arith.constant 0 : index
    %c0_0 = arith.constant 0 : index
    %c0_1 = arith.constant 0 : index
    %c0_2 = arith.constant 0 : index
    %0 = vector.load %arg3[%c0, %c0_0, %c0_1, %c0_2] : memref<1x1x224x4xbf16, #tpu.memory_space<vmem>>, vector<1x1x224x4xbf16>
    %1 = vector.shape_cast %0 : vector<1x1x224x4xbf16> to vector<224x4xbf16>
    %2 = arith.extf %1 : vector<224x4xbf16> to vector<224x4xf32>
    %3 = vector.extract_strided_slice %2 {offsets = [37, 0], sizes = [144, 4], strides = [1, 1]} : vector<224x4xf32> to vector<144x4xf32>
    %4 = arith.truncf %3 : vector<144x4xf32> to vector<144x4xbf16>
    %c0_3 = arith.constant 0 : index
    %c0_4 = arith.constant 0 : index
    %5 = vector.load %arg4[%c0_3, %c0_4] : memref<4x128xbf16, #tpu.memory_space<vmem>>, vector<4x128xbf16>
    %cst = arith.constant dense<0.000000e+00> : vector<144x128xf32>
    %6 = tpu.matmul %4, %5, %cst {dimension_numbers = #tpu.dot_dimension_numbers<[1], [0], [0], [1], [0, 0, 1, 1], [], []>} : vector<144x4xbf16>, vector<4x128xbf16>, vector<144x128xf32> -> vector<144x128xf32>
    %c0_5 = arith.constant 0 : index
    %c0_6 = arith.constant 0 : index
    %c0_7 = arith.constant 0 : index
    %c0_8 = arith.constant 0 : index
    %7 = vector.load %arg2[%c0_5, %c0_6, %c0_7, %c0_8] : memref<1x1x144x128xbf16, #tpu.memory_space<vmem>>, vector<1x1x144x128xbf16>
    %8 = vector.shape_cast %7 : vector<1x1x144x128xbf16> to vector<144x128xbf16>
    %9 = arith.extf %8 : vector<144x128xbf16> to vector<144x128xf32>
    %c0_9 = arith.constant 0 : index
    %c0_10 = arith.constant 0 : index
    %10 = vector.load %arg5[%c0_9, %c0_10] : memref<1x128xf32, #tpu.memory_space<vmem>>, vector<1x128xf32>
    %11 = vector.broadcast %10 : vector<1x128xf32> to vector<144x128xf32>
    %12 = arith.mulf %9, %11 : vector<144x128xf32>
    %c0_11 = arith.constant 0 : index
    %c0_12 = arith.constant 0 : index
    %13 = vector.load %arg6[%c0_11, %c0_12] : memref<1x128xf32, #tpu.memory_space<vmem>>, vector<1x128xf32>
    %14 = vector.broadcast %13 : vector<1x128xf32> to vector<144x128xf32>
    %15 = arith.addf %12, %14 : vector<144x128xf32>
    %16 = arith.addf %15, %6 : vector<144x128xf32>
    %c0_13 = arith.constant 0 : index
    %c0_14 = arith.constant 0 : index
    %17 = vector.load %arg7[%c0_13, %c0_14] : memref<1x128xf32, #tpu.memory_space<vmem>>, vector<1x128xf32>
    %18 = vector.broadcast %17 : vector<1x128xf32> to vector<144x128xf32>
    %19 = arith.addf %16, %18 : vector<144x128xf32>
    %c0_15 = arith.constant 0 : index
    %c0_16 = arith.constant 0 : index
    %c0_17 = arith.constant 0 : index
    %c0_18 = arith.constant 0 : index
    %20 = vector.load %arg8[%c0_15, %c0_16, %c0_17, %c0_18] : memref<1x1x144x128xf32, #tpu.memory_space<vmem>>, vector<1x1x144x128xf32>
    %21 = vector.shape_cast %20 : vector<1x1x144x128xf32> to vector<144x128xf32>
    %22 = vector.shape_cast %19 : vector<144x128xf32> to vector<1x1x144x128xf32>
    tpu.vector_store %arg8[%c0_15, %c0_16, %c0_17, %c0_18], %22 {strides = array<i32>} : memref<1x1x144x128xf32, #tpu.memory_space<vmem>>, vector<1x1x144x128xf32>,
    return
  }
  func.func @transform_0(%arg0: i32, %arg1: i32) -> (i32, i32, i32, i32) {
    %c0_i32 = arith.constant 0 : i32
    %c0_i32_0 = arith.constant 0 : i32
    %c0_i32_1 = arith.constant 0 : i32
    return %arg0, %arg1, %c0_i32, %c0_i32_0 : i32, i32, i32, i32
  }
  func.func @transform_1(%arg0: i32, %arg1: i32) -> (i32, i32, i32, i32) {
    %c0_i32 = arith.constant 0 : i32
    %c0_i32_0 = arith.constant 0 : i32
    %c0_i32_1 = arith.constant 0 : i32
    return %arg0, %arg1, %c0_i32, %c0_i32_0 : i32, i32, i32, i32
  }
  func.func @transform_2(%arg0: i32, %arg1: i32) -> (i32, i32) {
    %c0_i32 = arith.constant 0 : i32
    %c0_i32_0 = arith.constant 0 : i32
    %c0_i32_1 = arith.constant 0 : i32
    return %c0_i32, %c0_i32_0 : i32, i32
  }
  func.func @transform_3(%arg0: i32, %arg1: i32) -> (i32, i32) {
    %c0_i32 = arith.constant 0 : i32
    %c0_i32_0 = arith.constant 0 : i32
    %c0_i32_1 = arith.constant 0 : i32
    return %c0_i32, %c0_i32_0 : i32, i32
  }
  func.func @transform_4(%arg0: i32, %arg1: i32) -> (i32, i32) {
    %c0_i32 = arith.constant 0 : i32
    %c0_i32_0 = arith.constant 0 : i32
    %c0_i32_1 = arith.constant 0 : i32
    return %c0_i32, %c0_i32_0 : i32, i32
  }
  func.func @transform_5(%arg0: i32, %arg1: i32) -> (i32, i32) {
    %c0_i32 = arith.constant 0 : i32
    %c0_i32_0 = arith.constant 0 : i32
    %c0_i32_1 = arith.constant 0 : i32
    return %c0_i32, %c0_i32_0 : i32, i32
  }
  func.func @transform_6(%arg0: i32, %arg1: i32) -> (i32, i32, i32, i32) {
    %c0_i32 = arith.constant 0 : i32
    %c0_i32_0 = arith.constant 0 : i32
    %c0_i32_1 = arith.constant 0 : i32
    return %arg0, %arg1, %c0_i32, %c0_i32_0 : i32, i32, i32, i32
  }
}

</mosaic_0001>

<bundles_post_ra>
// kernel: resnet_block_forward.5
= control target key start
LH: loop header
LB: loop body
LE: loop exit
PB: predicated region body
PF: predicated region fallthrough
CT: control target
= control target key end

     0   :  { %s1121_s21 = smov 0   ;;  %s1123_s22 = smov 0   ;;  %s1332_s0 = inlined_call_operand.vmem [shape: bf16[2,2,144,128], index: 0, kind: input, shape index: {}]   ;;  %s1333_s1 = inlined_call_operand.vmem [shape: bf16[2,2,224,4], index: 1, kind: input, shape index: {}]   ;;  %s1334_s2 = inlined_call_operand.vmem [shape: bf16[4,128], index: 2, kind: input, shape index: {}]   ;;  %s1335_s3 = inlined_call_operand.vmem [shape: f32[1,128], index: 3, kind: input, shape index: {}]   ;;  %s1336_s4 = inlined_call_operand.vmem [shape: f32[1,128], index: 4, kind: input, shape index: {}]   ;;  %s1337_s5 = inlined_call_operand.vmem [shape: f32[1,128], index: 5, kind: input, shape index: {}]   ;;  %s1338_s6 = inlined_call_operand.vmem [shape: f32[2,2,144,128], index: 6, kind: output, shape index: {}]  }
   0x1   :  { %s1125_s23 = smov 0   ;;  %s1127_s24 = smov 0  }
   0x2   :  { %s1129_s25 = smov 0  }
   0x3 LB: > { %s25_s26 = sadd.s32 1, %s1074_s23  ;;  %s28_s27 = sadd.s32 1, %s1078_s24  ;;  %s1082_s25 = sphi %s1129_s25, %s16_s25   ;;  %s1078_s24 = sphi %s1127_s24, %s1342_s24   ;;  %s1074_s23 = sphi %s1125_s23, %s1341_s23   ;;  %s1070_s22 = sphi %s1123_s22, %s1340_s22   ;;  %s1066_s21 = sphi %s1121_s21, %s1339_s21  }
   0x4   : > { %p26_p0 = scmp.ge.s32.totalorder %s25_s26, 2  ;;  %p866_p1 = scmp.ge.s32.totalorder %s1082_s25, 1 }
   0x5   : > { %p248_p2 = scmp.lt.s32.totalorder %s1082_s25, 5 }
   0x6   : > { %s1344_s26 = smov (%p26_p0, %s25_s26), 0  ;;  %s1346_s27 = smov (!%p26_p0, %s28_s27), %s1078_s24 }
   0x7   : > { %p249_p3 = pnand %p866_p1, %p248_p2  ;;  %p30_p4 = scmp.ge.s32.totalorder %s1346_s27, 2 }
   0x8   : > { %v371_v0 = vld [vmem:[%s1334_s2] sm:$0x3] (!%p249_p3)  ;;  %vm490_vm0 = vcmask (!%p249_p3), 1041408   ;;  %p295_p5 = scmp.lt.s32.totalorder (!%p249_p3), %s1070_s22, 1  ;;  %v1084_v1 = vmov (!%p249_p3), 0.0   ;;  %vm1085_vm1 = vmmov (!%p249_p3), 0  }
   0x9   : > { %s1348_s27 = smov (%p30_p4, %s1346_s27), 0  ;;  %252 = sbr.rel (%p249_p3) target bundleno = 282 (0x11a), region = 44 }
   0xa   : > { %948 = vmatprep.subr.bf16.mxu0 (!%p249_p3), %v1084_v1  ;;  %v492_v2 = vsel (!%p249_p3), %vm490_vm0, %v371_v0, 0  ;;  %950 = vmatprep.mubr.msk.bf16.mxu0 (!%p249_p3), %vm1085_vm1, %v1084_v1  ;;  %p297_p6 = scmp.lt.s32.totalorder (!%p249_p3), %s1066_s21, 1  ;;  %vm372_vm2 = vsmask.f32 (!%p249_p3), 5376  ;;  %vm462_vm3 = vcmask (!%p249_p3), 31744  }
   0xb   : > { %949 = vmatpush3.bf16.msra.mxu0 (!%p249_p3), %v492_v2  ;;  %986 = vmatprep.subr.bf16.mxu1 (!%p249_p3), %v1084_v1 }
   0xc   : > { %987 = vmatpush3.bf16.msra.mxu1 (!%p249_p3), %v492_v2  ;;  %970 = vmatprep.mubr.msk.bf16.mxu1 (!%p249_p3), %vm1085_vm1, %v1084_v1 }
  0x10   : > { %s1350_s22 = smov (!%p295_p5, %s1070_s22), 1  ;;  %s1352_s21 = smov (!%p297_p6, %s1066_s21), 1 }
  0x11   : > { %s991_s30 = smul.u32 56, %s1350_s22 }
  0x12   : > { %s990_s7 = smul.u32 28, %s1352_s21 }
  0x13   : > { %s988_s8 = smul.u32 18, %s1352_s21 }
  0x14   : > { %s310_s9 = sadd.s32 %s991_s30, %s990_s7  ;;  %s989_s10 = smul.u32 36, %s1350_s22 }
  0x15   : > { %s868_s11 = sshll.u32 %s310_s9, 2 }
  0x16   : > { %s1163_s14 = scalar_lea.vmem %s1333_s1, %s868_s11  ;;  %s1165_s15 = sadd.s32 %s989_s10, %s988_s8 }
  0x17   : > { %v1034_v3 = vld [vmem:[%s1163_s14 + $0x10] sm:$0xff]   ;;  %v1035_v4 = vld [vmem:[%s1163_s14 + $0x18] sm:$0xff]   ;;  %v1037_v10 = vld [vmem:[%s1163_s14 + $0x40] sm:$0xff]   ;;  %s867_s16 = sshll.u32 %s1165_s15, 2  ;;  %s869_s29 = sshll.u32 %s1165_s15, 3 }
  0x18   : > { %v374_v5 = vshrl.u32 %v1034_v3, 16  ;;  %v377_v6 = vshll.u32 %v1034_v3, 16  ;;  %v382_v7 = vshrl.u32 %v1035_v4, 16  ;;  %v385_v8 = vshll.u32 %v1035_v4, 16  ;;  %v1036_v9 = vld [vmem:[%s1163_s14 + $0x38] sm:$0xff]   ;;  %v1038_v19 = vld [vmem:[%s1163_s14 + $0x20] sm:$0xff]   ;;  %s1213_s19 = scalar_lea.vmem %s1332_s0, %s867_s16  ;;  %s1246_s10 = scalar_lea.vmem %s1338_s6, %s869_s29 }
  0x19   : > { %v418_v15 = vshrl.u32 %v1036_v9, 16  ;;  %v421_v16 = vshll.u32 %v1036_v9, 16  ;;  %v427_v17 = vshrl.u32 %v1037_v10, 16  ;;  %v430_v18 = vshll.u32 %v1037_v10, 16  ;;  %v1039_v20 = vld [vmem:[%s1163_s14 + $0x48] sm:$0xff]   ;;  %v1041_v35 = vld [vmem:[%s1163_s14 + $0x50] sm:$0xff]  }
  0x1a   : > { %v376_v11 = vrot.slane %v374_v5, 2  ;;  %v379_v12 = vrot.slane %v377_v6, 3  ;;  %v384_v13 = vrot.slane %v382_v7, 2  ;;  %v387_v14 = vrot.slane %v385_v8, 3  ;;  %v1040_v31 = vld [vmem:[%s1163_s14 + $0x28] sm:$0xff]   ;;  %v1042_v50 = vld [vmem:[%s1163_s14 + $0x30] sm:$0xff]  }
  0x1b   : > { %v420_v23 = vrot.slane %v418_v15, 2  ;;  %v423_v24 = vrot.slane %v421_v16, 3  ;;  %v429_v25 = vrot.slane %v427_v17, 2  ;;  %v432_v26 = vrot.slane %v430_v18, 3  ;;  %v1043_v54 = vld [vmem:[%s1163_s14 + $0x58] ss:$0 sps:$4 sm:$0xff]  }
  0x1c   : > { %v380_v21 = vor.u32 %v379_v12, %v376_v11  ;;  %v388_v22 = vor.u32 %v387_v14, %v384_v13  ;;  %v391_v28 = vshrl.u32 %v1038_v19, 16  ;;  %v394_v29 = vshll.u32 %v1038_v19, 16  ;;  %v895_v9 = vld [vmem:[%s1213_s19] sm:$0xff]   ;;  %v930_v17 = vld [vmem:[%s1213_s19 + $0x8] sm:$0xff]  }
  0x1d   : > { %v436_v30 = vshrl.u32 %v1039_v20, 16  ;;  %v424_v32 = vor.u32 %v423_v24, %v420_v23  ;;  %v433_v33 = vor.u32 %v432_v26, %v429_v25  ;;  %v439_v34 = vshll.u32 %v1039_v20, 16  ;;  %v1220_v11 = vld [vmem:[%s1335_s3] ss:$0 sm:$0xff] }
  0x1e   : > { %v389_v27 = vsel %vm372_vm2, %v380_v21, %v388_v22  ;;  %v393_v36 = vrot.slane %v391_v28, 2  ;;  %v396_v37 = vrot.slane %v394_v29, 3  ;;  %v400_v39 = vshrl.u32 %v1040_v31, 16  ;;  %v1226_v15 = vld [vmem:[%s1336_s4] ss:$0 sm:$0xff] }
  0x1f   : > { %951 = vmatmul.mubr.msk.bf16.vlgmr.msra.gmra.mrb[0].mxu0 %vm462_vm3, %v389_v27  ;;  %v438_v38 = vrot.slane %v436_v30, 2  ;;  %v434_v40 = vsel %vm372_vm2, %v424_v32, %v433_v33  ;;  %v441_v41 = vrot.slane %v439_v34, 3  ;;  %v403_v42 = vshll.u32 %v1040_v31, 16  ;;  %v1239_v27 = vld [vmem:[%s1337_s5] ss:$0 sm:$0xff] }
  0x20   : > { %954 = vmatprep.mubr.msk.bf16.mxu0 %vm1085_vm1, %v1084_v1  ;;  %971 = vmatmul.mubr.msk.bf16.vlgmr.msra.gmra.mrb[0].mxu1 %vm462_vm3, %v434_v40  ;;  %v397_v43 = vor.u32 %v396_v37, %v393_v36  ;;  %v445_v45 = vshrl.u32 %v1041_v35, 16  ;;  %v448_v46 = vshll.u32 %v1041_v35, 16  ;;  %v402_v48 = vrot.slane %v400_v39, 2  ;;  %v931_v36 = vld [vmem:[%s1213_s19 + $0x10] sm:$0xff]  }
  0x21   : > { %974 = vmatprep.mubr.msk.bf16.mxu1 %vm1085_vm1, %v1084_v1  ;;  %v442_v44 = vor.u32 %v441_v41, %v438_v38  ;;  %v405_v49 = vrot.slane %v403_v42, 3  ;;  %v409_v56 = vshrl.u32 %v1042_v50, 16  ;;  %v412_v57 = vshll.u32 %v1042_v50, 16 }
  0x22   : > { %v398_v47 = vsel %vm372_vm2, %v388_v22, %v397_v43  ;;  %v447_v52 = vrot.slane %v445_v45, 2  ;;  %v450_v53 = vrot.slane %v448_v46, 3  ;;  %v454_v59 = vshrl.u32 %v1043_v54, 16  ;;  %v935_v22 = vld [vmem:[%s1213_s19 + $0x30] sm:$0xff]  }
  0x23   : > { %v443_v51 = vsel %vm372_vm2, %v433_v33, %v442_v44  ;;  %v406_v55 = vor.u32 %v405_v49, %v402_v48  ;;  %v457_v60 = vshll.u32 %v1043_v54, 16  ;;  %v411_v62 = vrot.slane %v409_v56, 2  ;;  %v936_v49 = vld [vmem:[%s1213_s19 + $0x38] sm:$0xff]  }
  0x24   : > { %v451_v58 = vor.u32 %v450_v53, %v447_v52  ;;  %v414_v63 = vrot.slane %v412_v57, 3  ;;  %v456_v2 = vrot.slane %v454_v59, 2  ;;  %v896_v10 = vunpack.c.l.bf16 %v895_v9 }
  0x25   : > { %v407_v61 = vsel %vm372_vm2, %v397_v43, %v406_v55  ;;  %v459_v3 = vrot.slane %v457_v60, 3  ;;  %v897_v12 = vunpack.c.h.bf16 %v895_v9  ;;  %v900_v21 = vunpack.c.l.bf16 %v930_v17 }
  0x26   : > { %v452_v0 = vsel %vm372_vm2, %v442_v44, %v451_v58  ;;  %v415_v4 = vor.u32 %v414_v63, %v411_v62  ;;  %v642_v14 = vmul.f32 %v896_v10, %v1220_v11  ;;  %v901_v25 = vunpack.c.h.bf16 %v930_v17  ;;  %v937_v17 = vld [vmem:[%s1213_s19 + $0x40] sm:$0xff]  }
  0x27   : > { %955 = vmatmul.mubr.msk.bf16.gmra.mrb[4].mxu0 %vm462_vm3, %v398_v47  ;;  %v460_v5 = vor.u32 %v459_v3, %v456_v2  ;;  %v643_v18 = vmul.f32 %v897_v12, %v1220_v11  ;;  %v920_v29 = vunpack.c.l.bf16 %v935_v22  ;;  %v921_v35 = vunpack.c.h.bf16 %v935_v22  ;;  %v932_v3 = vld [vmem:[%s1213_s19 + $0x18] sm:$0xff]  }
  0x28   : > { %958 = vmatprep.mubr.msk.bf16.mxu0 %vm1085_vm1, %v1084_v1  ;;  %975 = vmatmul.mubr.msk.bf16.gmra.mrb[4].mxu1 %vm462_vm3, %v443_v51  ;;  %v416_v6 = vsel %vm372_vm2, %v406_v55, %v415_v4  ;;  %v425_v8 = vsel %vm372_vm2, %v415_v4, %v424_v32  ;;  %v667_v20 = vadd.f32 %v1226_v15, %v642_v14  ;;  %v904_v48 = vunpack.c.l.bf16 %v931_v36 }
  0x29   : > { %978 = vmatprep.mubr.msk.bf16.mxu1 %vm1085_vm1, %v1084_v1  ;;  %v461_v7 = vsel %vm372_vm2, %v451_v58, %v460_v5  ;;  %v668_v24 = vadd.f32 %v1226_v15, %v643_v18  ;;  %v644_v32 = vmul.f32 %v900_v21, %v1220_v11  ;;  %v645_v41 = vmul.f32 %v901_v25, %v1220_v11 }
  0x2a   : > { %v654_v44 = vmul.f32 %v920_v29, %v1220_v11  ;;  %v655_v53 = vmul.f32 %v921_v35, %v1220_v11  ;;  %v905_v55 = vunpack.c.h.bf16 %v931_v36  ;;  %v924_v59 = vunpack.c.l.bf16 %v936_v49  ;;  %v933_v35 = vld [vmem:[%s1213_s19 + $0x20] sm:$0xff]  }
  0x2b   : > { %v669_v47 = vadd.f32 %v1226_v15, %v644_v32  ;;  %v670_v54 = vadd.f32 %v1226_v15, %v645_v41  ;;  %v646_v62 = vmul.f32 %v904_v48, %v1220_v11  ;;  %v925_v2 = vunpack.c.h.bf16 %v936_v49 }
  0x2c   : > { %v679_v58 = vadd.f32 %v1226_v15, %v654_v44 }
  0x2d   : > { %v671_v14 = vadd.f32 %v1226_v15, %v646_v62  ;;  %v657_v21 = vmul.f32 %v925_v2, %v1220_v11 }
  0x2f   : > { %959 = vmatmul.mubr.msk.bf16.gmra.mrb[8].mxu0 %vm462_vm3, %v407_v61 }
  0x30   : > { %962 = vmatprep.mubr.msk.bf16.mxu0 %vm1085_vm1, %v1084_v1  ;;  %979 = vmatmul.mubr.msk.bf16.gmra.mrb[8].mxu1 %vm462_vm3, %v452_v0  ;;  %v680_v0 = vadd.f32 %v1226_v15, %v655_v53  ;;  %v913_v53 = vunpack.c.h.bf16 %v933_v35 }
  0x31   : > { %982 = vmatprep.mubr.msk.bf16.mxu1 %vm1085_vm1, %v1084_v1 }
  0x37   : > { %963 = vmatmul.mubr.msk.bf16.gmra.mrb[12].mxu0 %vm462_vm3, %v416_v6 }
  0x38   : > { %966 = vmatprep.mubr.msk.bf16.mxu0 %vm1085_vm1, %v1084_v1  ;;  %983 = vmatmul.mubr.msk.bf16.gmra.mrb[12].mxu1 %vm462_vm3, %v461_v7  ;;  %v934_v1 = vld [vmem:[%s1213_s19 + $0x28] sm:$0xff]  }
  0x39   : > { %v916_v13 = vunpack.c.l.bf16 %v934_v1  ;;  %v917_v16 = vunpack.c.h.bf16 %v934_v1  ;;  %v656_v1 = vmul.f32 %v924_v59, %v1220_v11 }
  0x3b   : > { %v652_v19 = vmul.f32 %v916_v13, %v1220_v11  ;;  %v653_v23 = vmul.f32 %v917_v16, %v1220_v11  ;;  %v908_v16 = vunpack.c.l.bf16 %v932_v3 }
  0x3d   : > { %v677_v28 = vadd.f32 %v1226_v15, %v652_v19  ;;  %v678_v34 = vadd.f32 %v1226_v15, %v653_v23  ;;  %v909_v23 = vunpack.c.h.bf16 %v932_v3  ;;  %v651_v3 = vmul.f32 %v913_v53, %v1220_v11 }
  0x3f   : > { %967 = vmatmul.mubr.msk.bf16.gmra.mrb[16].mxu0 %vm462_vm3, %v425_v8  ;;  %v647_v8 = vmul.f32 %v905_v55, %v1220_v11 }
  0x41   : > { %v672_v22 = vadd.f32 %v1226_v15, %v647_v8 }
  0xf2   : > { %v528_v26 = vpop.f32.mrb[0].mxu0 }
  0xf3   : > { %v685_v30 = vadd.f32 %v667_v20, %v528_v26  ;;  %v952_v31 = vpop.f32.mrb[1].mxu0  ;;  %v568_v40 = vpop.f32.mrb[0].mxu1  ;;  %v681_v26 = vadd.f32 %v1226_v15, %v656_v1 }
  0xf4   : > { %v531_v33 = vpop.f32.mrb[2].mxu0  ;;  %v695_v42 = vadd.f32 %v677_v28, %v568_v40  ;;  %v972_v43 = vpop.f32.mrb[1].mxu1  ;;  %v928_v28 = vunpack.c.l.bf16 %v937_v17  ;;  %v648_v31 = vmul.f32 %v908_v16, %v1220_v11  ;;  %v649_v40 = vmul.f32 %v909_v23, %v1220_v11 }
  0xf5   : > { %v710_v37 = vadd.f32 %v1239_v27, %v685_v30  ;;  %v686_v38 = vadd.f32 %v668_v24, %v531_v33  ;;  %v953_v39 = vpop.f32.mrb[3].mxu0  ;;  %v571_v46 = vpop.f32.mrb[2].mxu1  ;;  %v682_v33 = vadd.f32 %v1226_v15, %v657_v21 }
  0xf6   : > { %v720_v50 = vadd.f32 %v1239_v27, %v695_v42  ;;  %v696_v51 = vadd.f32 %v678_v34, %v571_v46  ;;  %v973_v52 = vpop.f32.mrb[3].mxu1  ;;  %v929_v34 = vunpack.c.h.bf16 %v937_v17  ;;  %v658_v43 = vmul.f32 %v928_v28, %v1220_v11 }
  0xf7   : > { %728 = vst [vmem:[%s1246_s10] sm:$0xff] %v710_v37  ;;  %v711_v45 = vadd.f32 %v1239_v27, %v686_v38  ;;  %v673_v46 = vadd.f32 %v1226_v15, %v648_v31  ;;  %v674_v52 = vadd.f32 %v1226_v15, %v649_v40 }
  0xf8   : > { %738 = vst [vmem:[%s1246_s10 + $0x50] sm:$0xff] %v720_v50  ;;  %v721_v56 = vadd.f32 %v1239_v27, %v696_v51  ;;  %v659_v51 = vmul.f32 %v929_v34, %v1220_v11 }
  0xf9   : > { %729 = vst [vmem:[%s1246_s10 + $0x8] sm:$0xff] %v711_v45 }
  0xfa   : > { %v536_v57 = vpop.f32.mrb[4].mxu0  ;;  %739 = vst [vmem:[%s1246_s10 + $0x58] sm:$0xff] %v721_v56  ;;  %v683_v56 = vadd.f32 %v1226_v15, %v658_v43 }
  0xfb   : > { %v687_v60 = vadd.f32 %v669_v47, %v536_v57  ;;  %v956_v61 = vpop.f32.mrb[5].mxu0  ;;  %v576_v7 = vpop.f32.mrb[4].mxu1  ;;  %v912_v47 = vunpack.c.l.bf16 %v933_v35 }
  0xfc   : > { %v539_v63 = vpop.f32.mrb[6].mxu0  ;;  %v697_v9 = vadd.f32 %v679_v58, %v576_v7  ;;  %v976_v10 = vpop.f32.mrb[5].mxu1  ;;  %v684_v61 = vadd.f32 %v1226_v15, %v659_v51 }
  0xfd   : > { %v712_v4 = vadd.f32 %v1239_v27, %v687_v60  ;;  %v688_v5 = vadd.f32 %v670_v54, %v539_v63  ;;  %v957_v6 = vpop.f32.mrb[7].mxu0  ;;  %v579_v13 = vpop.f32.mrb[6].mxu1  ;;  %v650_v59 = vmul.f32 %v912_v47, %v1220_v11 }
  0xfe   : > { %v722_v18 = vadd.f32 %v1239_v27, %v697_v9  ;;  %v698_v19 = vadd.f32 %v680_v0, %v579_v13  ;;  %v977_v20 = vpop.f32.mrb[7].mxu1 }
  0xff   : > { %730 = vst [vmem:[%s1246_s10 + $0x10] sm:$0xff] %v712_v4  ;;  %v713_v12 = vadd.f32 %v1239_v27, %v688_v5  ;;  %v675_v8 = vadd.f32 %v1226_v15, %v650_v59 }
 0x100   : > { %740 = vst [vmem:[%s1246_s10 + $0x60] sm:$0xff] %v722_v18  ;;  %v723_v24 = vadd.f32 %v1239_v27, %v698_v19 }
 0x101   : > { %731 = vst [vmem:[%s1246_s10 + $0x18] sm:$0xff] %v713_v12  ;;  %v676_v12 = vadd.f32 %v1226_v15, %v651_v3 }
 0x102   : > { %v544_v25 = vpop.f32.mrb[8].mxu0  ;;  %741 = vst [vmem:[%s1246_s10 + $0x68] sm:$0xff] %v723_v24 }
 0x103   : > { %v689_v29 = vadd.f32 %v671_v14, %v544_v25  ;;  %v960_v30 = vpop.f32.mrb[9].mxu0  ;;  %v584_v39 = vpop.f32.mrb[8].mxu1 }
 0x104   : > { %v547_v32 = vpop.f32.mrb[10].mxu0  ;;  %v699_v41 = vadd.f32 %v681_v26, %v584_v39  ;;  %v980_v42 = vpop.f32.mrb[9].mxu1 }
 0x105   : > { %v714_v36 = vadd.f32 %v1239_v27, %v689_v29  ;;  %v690_v37 = vadd.f32 %v672_v22, %v547_v32  ;;  %v961_v38 = vpop.f32.mrb[11].mxu0  ;;  %v587_v45 = vpop.f32.mrb[10].mxu1 }
 0x106   : > { %v724_v48 = vadd.f32 %v1239_v27, %v699_v41  ;;  %v700_v49 = vadd.f32 %v682_v33, %v587_v45  ;;  %v981_v50 = vpop.f32.mrb[11].mxu1 }
 0x107   : > { %732 = vst [vmem:[%s1246_s10 + $0x20] sm:$0xff] %v714_v36  ;;  %v715_v44 = vadd.f32 %v1239_v27, %v690_v37 }
 0x108   : > { %742 = vst [vmem:[%s1246_s10 + $0x70] sm:$0xff] %v724_v48  ;;  %v725_v54 = vadd.f32 %v1239_v27, %v700_v49 }
 0x109   : > { %733 = vst [vmem:[%s1246_s10 + $0x28] sm:$0xff] %v715_v44 }
 0x10a   : > { %v552_v55 = vpop.f32.mrb[12].mxu0  ;;  %743 = vst [vmem:[%s1246_s10 + $0x78] sm:$0xff] %v725_v54 }
 0x10b   : > { %v691_v57 = vadd.f32 %v673_v46, %v552_v55  ;;  %v964_v58 = vpop.f32.mrb[13].mxu0  ;;  %v592_v2 = vpop.f32.mrb[12].mxu1 }
 0x10c   : > { %v555_v60 = vpop.f32.mrb[14].mxu0  ;;  %v701_v4 = vadd.f32 %v683_v56, %v592_v2  ;;  %v984_v5 = vpop.f32.mrb[13].mxu1 }
 0x10d   : > { %v716_v62 = vadd.f32 %v1239_v27, %v691_v57  ;;  %v692_v63 = vadd.f32 %v674_v52, %v555_v60  ;;  %v965_v0 = vpop.f32.mrb[15].mxu0  ;;  %v595_v7 = vpop.f32.mrb[14].mxu1 }
 0x10e   : > { %v726_v9 = vadd.f32 %v1239_v27, %v701_v4  ;;  %v702_v10 = vadd.f32 %v684_v61, %v595_v7  ;;  %v985_v1 = vpop.f32.mrb[15].mxu1 }
 0x10f   : > { %734 = vst [vmem:[%s1246_s10 + $0x30] sm:$0xff] %v716_v62  ;;  %v717_v6 = vadd.f32 %v1239_v27, %v692_v63 }
 0x110   : > { %744 = vst [vmem:[%s1246_s10 + $0x80] sm:$0xff] %v726_v9  ;;  %v727_v11 = vadd.f32 %v1239_v27, %v702_v10 }
 0x111   : > { %735 = vst [vmem:[%s1246_s10 + $0x38] sm:$0xff] %v717_v6 }
 0x112   : > { %v560_v13 = vpop.f32.mrb[16].mxu0  ;;  %745 = vst [vmem:[%s1246_s10 + $0x88] sm:$0xff] %v727_v11 }
 0x113   : > { %v693_v14 = vadd.f32 %v675_v8, %v560_v13  ;;  %v968_v16 = vpop.f32.mrb[17].mxu0 }
 0x114   : > { %v563_v17 = vpop.f32.mrb[18].mxu0 }
 0x115   : > { %v718_v18 = vadd.f32 %v1239_v27, %v693_v14  ;;  %v694_v19 = vadd.f32 %v676_v12, %v563_v17  ;;  %v969_v20 = vpop.f32.mrb[19].mxu0 }
 0x117   : > { %736 = vst [vmem:[%s1246_s10 + $0x40] sm:$0xff] %v718_v18  ;;  %v719_v21 = vadd.f32 %v1239_v27, %v694_v19 }
 0x119   : > { %737 = vst [vmem:[%s1246_s10 + $0x48] sm:$0xff] %v719_v21 }
 0x11a PF: > { %s16_s25 = sadd.s32 1, %s1082_s25   ;;  %s1339_s21 = smov %s1074_s23 }
 0x11b   : > { %p13_p7 = scmp.ge.s32.totalorder %s16_s25, 6   ;;  %s1340_s22 = smov %s1078_s24 }
 0x11c   : > { %s1341_s23 = smov %s1344_s26  ;;  %s1342_s24 = smov %s1348_s27 }
 0x11d   :  { %15 = sbr.rel (!%p13_p7) target bundleno = 3 (0x3), region = 77 }

// kernel: resnet_block_forward.3
= control target key start
LH: loop header
LB: loop body
LE: loop exit
PB: predicated region body
PF: predicated region fallthrough
CT: control target
= control target key end

     0   :  { %s3358_s9 = smov 0   ;;  %s3360_s10 = smov 0   ;;  %s4526_s0 = inlined_call_operand.vmem [shape: bf16[2,2,224,4], index: 0, kind: input, shape index: {}]   ;;  %s4527_s1 = inlined_call_operand.vmem [shape: bf16[9,4,128], index: 1, kind: input, shape index: {}]   ;;  %s4528_s2 = inlined_call_operand.vmem [shape: f32[2,2,2,128], index: 2, kind: output, shape index: {}]  }
   0x1   :  { %s3362_s11 = smov 0   ;;  %s3364_s12 = smov 0  }
   0x2   :  { %s3366_s13 = smov 0  }
   0x3 LB: > { %s21_s14 = sadd.s32 1, %s3331_s11  ;;  %s24_s15 = sadd.s32 1, %s3335_s12  ;;  %s3339_s13 = sphi %s3366_s13, %s12_s13   ;;  %s3335_s12 = sphi %s3364_s12, %s4612_s12   ;;  %s3331_s11 = sphi %s3362_s11, %s4611_s11   ;;  %s3327_s10 = sphi %s3360_s10, %s4610_s10   ;;  %s3323_s9 = sphi %s3358_s9, %s4609_s9  }
   0x4   : > { %p22_p0 = scmp.ge.s32.totalorder %s21_s14, 2  ;;  %p2376_p1 = scmp.ge.s32.totalorder %s3339_s13, 1 }
   0x5   : > { %p132_p2 = scmp.lt.s32.totalorder %s3339_s13, 5 }
   0x6   : > { %s4614_s14 = smov (%p22_p0, %s21_s14), 0  ;;  %s4616_s15 = smov (!%p22_p0, %s24_s15), %s3335_s12 }
   0x7   : > { %p133_p3 = pnand %p2376_p1, %p132_p2  ;;  %p26_p4 = scmp.ge.s32.totalorder %s4616_s15, 2 }
   0x9   : > { %s4618_s15 = smov (%p26_p4, %s4616_s15), 0  ;;  %136 = sbr.rel (%p133_p3) target bundleno = 591 (0x24f), region = 28 }
  0x10   : > { %vm356_vm0 = vcmask 1041408   ;;  %v2431_v0 = vld [vmem:[%s4527_s1 + $0x8] sm:$0x3]  ;;  %v2390_v1 = vld [vmem:[%s4527_s1 + $0x2] sm:$0x3]  ;;  %v4529_v2 = vmov 0.0  }
  0x11   : > { %2736 = vmatprep.subr.bf16.mxu0 %v4529_v2  ;;  %2584 = vmatprep.subr.bf16.mxu1 %v4529_v2  ;;  %v3401_v3 = vsel %vm356_vm0, %v2431_v0, 0  ;;  %v358_v4 = vsel %vm356_vm0, %v2390_v1, 0  ;;  %p161_p5 = scmp.lt.s32.totalorder %s3327_s10, 1  ;;  %p163_p6 = scmp.lt.s32.totalorder %s3323_s9, 1  ;;  %vm3342_vm1 = vmmov 0   ;;  %vm328_vm2 = vcmask 31744  }
  0x12   : > { %2737 = vmatpush3.bf16.msra.mxu0 %v3401_v3  ;;  %2585 = vmatpush3.bf16.msra.mxu1 %v358_v4  ;;  %v235_v5 = vld [vmem:[%s4527_s1] sm:$0x3]  ;;  %vm238_vm3 = vsmask.f32 6400  ;;  %v2441_v36 = vld [vmem:[%s4527_s1 + $0xa] sm:$0x3] }
  0x13   : > { %2586 = vmatprep.mubr.msk.bf16.mxu1 %vm3342_vm1, %v4529_v2  ;;  %2738 = vmatprep.mubr.msk.bf16.mxu0 %vm3342_vm1, %v4529_v2  ;;  %s4620_s10 = smov (!%p161_p5, %s3327_s10), 1  ;;  %s4622_s9 = smov (!%p163_p6, %s3323_s9), 1  ;;  %v523_v17 = vsel %vm356_vm0, %v235_v5, 0  ;;  %vm949_vm4 = vsmask.f32 5376  ;;  %v1202_v44 = vsel %vm356_vm0, %v2441_v36, 0 }
  0x14   : > { %2774 = vmatprep.subr.bf16.mxu0 %v4529_v2  ;;  %2622 = vmatprep.subr.bf16.mxu1 %v4529_v2  ;;  %s3199_s20 = smul.u32 56, %s4620_s10  ;;  %vm475_vm5 = vcmask 1046528   ;;  %vm632_vm6 = vcmask 1045504   ;;  %vm1154_vm7 = vcmask 1044480   ;;  %vm1471_vm8 = vsmask.f32 4352 }
  0x15   : > { %s3198_s21 = smul.u32 28, %s4622_s9 }
  0x17   : > { %s167_s22 = sadd.s32 %s3199_s20, %s3198_s21  ;;  %s2378_s20 = sshll.u32 %s4620_s10, 1 }
  0x18   : > { %s2377_s23 = sshll.u32 %s167_s22, 2  ;;  %s175_s21 = sadd.s32 %s2378_s20, %s4622_s9 }
  0x19   : > { %s3424_s26 = scalar_lea.vmem %s4526_s0, %s2377_s23  ;;  %s2379_s22 = sshll.u32 %s175_s21, 1 }
  0x1a   : > { %v3430_v6 = vld [vmem:[%s3424_s26 + $0x8] sm:$0xff]   ;;  %v3433_v7 = vld [vmem:[%s3424_s26 + $0x10] sm:$0xff]   ;;  %v183_v8 = vld [vmem:[%s3424_s26 + $0x18] sm:$0xf]  ;;  %s177_s25 = scalar_lea.vmem %s4528_s2, %s2379_s22 }
  0x1b   : > { %v3437_v9 = vld [vmem:[%s3424_s26 + $0x1c] sm:$0xf]  ;;  %v3440_v10 = vld [vmem:[%s3424_s26 + $0x20] sm:$0xf]  ;;  %v240_v11 = vshrl.u32 %v3430_v6, 16  ;;  %v243_v12 = vshll.u32 %v3430_v6, 16 }
  0x1c   : > { %v248_v13 = vshrl.u32 %v3433_v7, 16  ;;  %v251_v14 = vshll.u32 %v3433_v7, 16  ;;  %v3447_v15 = vld [vmem:[%s3424_s26 + $0x24] sm:$0xf]  ;;  %v3450_v16 = vcombine.low %v183_v8, %v3437_v9  ;;  %v3470_v31 = vld [vmem:[%s3424_s26 + $0x28] sm:$0xf] }
  0x1d   : > { %v3455_v18 = vcombine.low %v3440_v10, %v3447_v15  ;;  %v242_v19 = vrot.slane %v240_v11, 1  ;;  %v245_v20 = vrot.slane %v243_v12, 2  ;;  %v3473_v32 = vld [vmem:[%s3424_s26 + $0x2c] sm:$0xf]  ;;  %v3505_v50 = vld [vmem:[%s3424_s26 + $0x30] sm:$0xf] }
  0x1e   : > { %v250_v21 = vrot.slane %v248_v13, 1  ;;  %v253_v22 = vrot.slane %v251_v14, 2  ;;  %v3458_v23 = vshrl.u32 %v3450_v16, 16  ;;  %v3461_v24 = vshll.u32 %v3450_v16, 16  ;;  %v3508_v51 = vld [vmem:[%s3424_s26 + $0x34] sm:$0xf] }
  0x1f   : > { %v950_v25 = vrot.slane %v248_v13, 2  ;;  %v951_v26 = vrot.slane %v251_v14, 3  ;;  %v246_v27 = vor.u32 %v245_v20, %v242_v19  ;;  %v3464_v29 = vshrl.u32 %v3455_v18, 16  ;;  %4543 = vst [vmem:[#allocation2_spill] sm:$0xff] %v3508_v51  ;;  %v3537_v4 = vld [vmem:[%s3424_s26 + $0x38] sm:$0xf] }
  0x20   : > { %v254_v28 = vor.u32 %v253_v22, %v250_v21  ;;  %v3467_v30 = vshll.u32 %v3455_v18, 16  ;;  %v953_v34 = vrot.slane %v3458_v23, 2  ;;  %v954_v35 = vrot.slane %v3461_v24, 3  ;;  %4544 = vst [vmem:[#allocation3_spill] sm:$0xff] %v3537_v4  ;;  %v3540_v5 = vld [vmem:[%s3424_s26 + $0x3c] sm:$0xf] }
  0x21   : > { %v952_v33 = vor.u32 %v951_v26, %v950_v25  ;;  %v259_v37 = vrot.slane %v3458_v23, 1  ;;  %v262_v39 = vrot.slane %v3461_v24, 2  ;;  %v957_v41 = vrot.slane %v3464_v29, 2  ;;  %4545 = vst [vmem:[#allocation4_spill] sm:$0xff] %v3540_v5  ;;  %v3555_v19 = vld [vmem:[%s3424_s26 + $0x44] sm:$0xf] }
  0x22   : > { %v255_v38 = vsel %vm238_vm3, %v246_v27, %v254_v28  ;;  %v955_v40 = vor.u32 %v954_v35, %v953_v34  ;;  %v958_v42 = vrot.slane %v3467_v30, 3  ;;  %v3488_v43 = vcombine.low %v3470_v31, %v3473_v32  ;;  %4547 = vst [vmem:[#allocation6_spill] sm:$0xff] %v3555_v19  ;;  %v3561_v22 = vld [vmem:[%s3424_s26 + $0x48] sm:$0xf]  ;;  %v3564_v25 = vld [vmem:[%s3424_s26 + $0x4c] sm:$0xf] }
  0x23   : > { %2587 = vmatmul.mubr.msk.bf16.vlgmr.msra.gmra.mrb[0].mxu1 %vm328_vm2, %v255_v38  ;;  %v263_v45 = vor.u32 %v262_v39, %v259_v37  ;;  %v268_v53 = vrot.slane %v3464_v29, 1  ;;  %v271_v54 = vrot.slane %v3467_v30, 2  ;;  %v3516_v55 = vcombine.low %v3505_v50, %v3508_v51  ;;  %4548 = vst [vmem:[#allocation7_spill] sm:$0xff] %v3561_v22  ;;  %4549 = vst [vmem:[#allocation8_spill] sm:$0xff] %v3564_v25 }
  0x24   : > { %2590 = vmatprep.mubr.msk.bf16.mxu1 %vm3342_vm1, %v4529_v2  ;;  %2623 = vmatpush3.bf16.msra.mxu1 %v523_v17  ;;  %v956_v46 = vsel %vm949_vm4, %v952_v33, %v955_v40  ;;  %v959_v47 = vor.u32 %v958_v42, %v957_v41  ;;  %v3499_v48 = vshrl.u32 %v3488_v43, 16  ;;  %v3502_v49 = vshll.u32 %v3488_v43, 16  ;;  %v3552_v17 = vld [vmem:[%s3424_s26 + $0x40] sm:$0xf] }
  0x25   : > { %2660 = vmatprep.subr.bf16.mxu1 %v4529_v2  ;;  %2739 = vmatmul.mubr.msk.bf16.vlgmr.msra.gmra.mrb[0].mxu0 %vm328_vm2, %v956_v46  ;;  %v264_v52 = vsel %vm238_vm3, %v254_v28, %v263_v45  ;;  %v272_v59 = vor.u32 %v271_v54, %v268_v53  ;;  %v3526_v60 = vshrl.u32 %v3516_v55, 16  ;;  %v3529_v61 = vshll.u32 %v3516_v55, 16  ;;  %4546 = vst [vmem:[#allocation5_spill] sm:$0xff] %v3552_v17  ;;  %v3569_v28 = vld [vmem:[%s3424_s26 + $0x50] sm:$0xf] }
  0x26   : > { %2775 = vmatpush3.bf16.msra.mxu0 %v1202_v44  ;;  %2742 = vmatprep.mubr.msk.bf16.mxu0 %vm3342_vm1, %v4529_v2  ;;  %v960_v56 = vsel %vm949_vm4, %v955_v40, %v959_v47  ;;  %v961_v57 = vrot.slane %v3499_v48, 2  ;;  %v962_v58 = vrot.slane %v3502_v49, 3  ;;  %v277_v0 = vrot.slane %v3499_v48, 1  ;;  %4550 = vst [vmem:[#allocation9_spill] sm:$0xff] %v3569_v28 }
  0x27   : > { %2812 = vmatprep.subr.bf16.mxu0 %v4529_v2  ;;  %v273_v63 = vsel %vm238_vm3, %v263_v45, %v272_v59  ;;  %v280_v1 = vrot.slane %v3502_v49, 2  ;;  %v476_v8 = vrot.slane %v3430_v6, 1  ;;  %v965_v11 = vrot.slane %v3526_v60, 2 }
  0x28   : > { %v963_v62 = vor.u32 %v962_v58, %v961_v57  ;;  %v966_v12 = vrot.slane %v3529_v61, 3  ;;  %v3549_v14 = vcombine.low %v3537_v4, %v3540_v5  ;;  %v477_v20 = vrot.slane %v3433_v7, 1 }
  0x29   : > { %v281_v21 = vor.u32 %v280_v1, %v277_v0  ;;  %v286_v26 = vrot.slane %v3526_v60, 1  ;;  %v289_v27 = vrot.slane %v3529_v61, 2  ;;  %v479_v34 = vrot.slane %v3450_v16, 1 }
  0x2a   : > { %v964_v13 = vsel %vm949_vm4, %v959_v47, %v963_v62  ;;  %v3572_v33 = vsel %vm475_vm5, %v476_v8, %v477_v20  ;;  %v967_v35 = vor.u32 %v966_v12, %v965_v11  ;;  %v3578_v36 = vcombine.low %v3552_v17, %v3555_v19 }
  0x2b   : > { %2591 = vmatmul.mubr.msk.bf16.gmra.mrb[4].mxu1 %vm328_vm2, %v264_v52  ;;  %v481_v37 = vrot.slane %v3455_v18, 1  ;;  %v3584_v38 = vshrl.u32 %v3549_v14, 16  ;;  %v3587_v39 = vshll.u32 %v3549_v14, 16  ;;  %v3590_v40 = vsel %vm475_vm5, %v477_v20, %v479_v34 }
  0x2c   : > { %2594 = vmatprep.mubr.msk.bf16.mxu1 %vm3342_vm1, %v4529_v2  ;;  %v483_v41 = vrot.slane %v3488_v43, 1  ;;  %v282_v42 = vsel %vm238_vm3, %v272_v59, %v281_v21  ;;  %v3596_v44 = vcombine.low %v3561_v22, %v3564_v25  ;;  %v3600_v45 = vcombine.low %v3569_v28, %v3569_v28 }
  0x2d   : > { %2743 = vmatmul.mubr.msk.bf16.gmra.mrb[4].mxu0 %vm328_vm2, %v960_v56  ;;  %v3603_v46 = vsel %vm475_vm5, %v479_v34, %v481_v37  ;;  %v290_v47 = vor.u32 %v289_v27, %v286_v26  ;;  %v485_v53 = vrot.slane %v3516_v55, 1  ;;  %v487_v54 = vrot.slane %v3549_v14, 1 }
  0x2e   : > { %2746 = vmatprep.mubr.msk.bf16.mxu0 %vm3342_vm1, %v4529_v2  ;;  %v3606_v52 = vsel %vm475_vm5, %v481_v37, %v483_v41  ;;  %v968_v56 = vsel %vm949_vm4, %v963_v62, %v967_v35  ;;  %v489_v57 = vrot.slane %v3578_v36, 1  ;;  %v491_v58 = vrot.slane %v3596_v44, 1 }
  0x2f   : > { %v493_v59 = vrot.slane %v3600_v45, 1  ;;  %v970_v0 = vrot.slane %v3587_v39, 3  ;;  %v3618_v1 = vsel %vm475_vm5, %v483_v41, %v485_v53  ;;  %v3621_v8 = vsel %vm475_vm5, %v485_v53, %v487_v54 }
  0x30   : > { %v3626_v62 = vsel %vm475_vm5, %v487_v54, %v489_v57  ;;  %v3629_v11 = vsel %vm475_vm5, %v489_v57, %v491_v58  ;;  %v634_v20 = vrot.slane %v3433_v7, 2  ;;  %v636_v26 = vrot.slane %v3450_v16, 2 }
  0x31   : > { %v3632_v12 = vsel %vm475_vm5, %v491_v58, %v493_v59  ;;  %v291_v41 = vsel %vm238_vm3, %v281_v21, %v290_v47  ;;  %v298_v53 = vrot.slane %v3587_v39, 2  ;;  %v3661_v21 = vshrl.u32 %v3578_v36, 16  ;;  %v3667_v59 = vld [vmem:[%s3424_s26 + $0x54] sm:$0xf] }
  0x32   : > { %v3646_v37 = vsel %vm632_vm6, %v634_v20, %v636_v26  ;;  %v3664_v58 = vshll.u32 %v3578_v36, 16  ;;  %4552 = vst [vmem:[#allocation11_spill] sm:$0xff] %v3667_v59  ;;  %v3708_v19 = vshrl.u32 %v3596_v44, 16  ;;  %v1475_v51 = vrot.slane %v3464_v29, 3 }
  0x33   : > { %2595 = vmatmul.mubr.msk.bf16.gmra.mrb[8].mxu1 %vm328_vm2, %v273_v63  ;;  %v969_v63 = vrot.slane %v3584_v38, 2  ;;  %v1476_v4 = vrot.slane %v3467_v30, 4  ;;  %v646_v29 = vrot.slane %v3578_v36, 2 }
  0x34   : > { %2598 = vmatprep.mubr.msk.bf16.mxu1 %vm3342_vm1, %v4529_v2 }
  0x35   : > { %2747 = vmatmul.mubr.msk.bf16.gmra.mrb[8].mxu0 %vm328_vm2, %v964_v13  ;;  %v633_v13 = vrot.slane %v3430_v6, 2  ;;  %v3640_v27 = vor.u32 %v970_v0, %v969_v63  ;;  %v638_v6 = vrot.slane %v3455_v18, 2  ;;  %v1156_v63 = vrot.slane %v3450_v16, 3 }
  0x36   : > { %2750 = vmatprep.mubr.msk.bf16.mxu0 %vm3342_vm1, %v4529_v2  ;;  %v3676_v0 = vcombine.low %v3569_v28, %v3667_v59  ;;  %v4554_v28 = vmov 0.0  }
  0x37   : > { %4551 = vst [vmem:[#allocation10_spill] sm:$0xff] %v3640_v27  ;;  %v3643_v34 = vsel %vm632_vm6, %v633_v13, %v634_v20  ;;  %v3653_v54 = vsel %vm632_vm6, %v636_v26, %v638_v6  ;;  %v640_v13 = vrot.slane %v3488_v43, 2  ;;  %v304_v26 = vrot.slane %v3661_v21, 1 }
  0x39   : > { %v3692_v16 = vsel %vm632_vm6, %v638_v6, %v640_v13 }
  0x3b   : > { %2599 = vmatmul.mubr.msk.bf16.gmra.mrb[12].mxu1 %vm328_vm2, %v282_v42  ;;  %v295_v42 = vrot.slane %v3584_v38, 1 }
  0x3c   : > { %2602 = vmatprep.mubr.msk.bf16.mxu1 %vm3342_vm1, %v4529_v2 }
  0x3d   : > { %2751 = vmatmul.mubr.msk.bf16.gmra.mrb[12].mxu0 %vm328_vm2, %v968_v56  ;;  %v972_v56 = vsel %vm949_vm4, %v967_v35, %v3640_v27  ;;  %v299_v57 = vor.u32 %v298_v53, %v295_v42  ;;  %v1155_v35 = vrot.slane %v3433_v7, 3  ;;  %v3683_v42 = vld [vmem:[%s3424_s26 + $0x58] sm:$0xf]  ;;  %v3686_v53 = vld [vmem:[%s3424_s26 + $0x5c] sm:$0xf]  ;;  %v1473_v27 = vrot.slane %v3461_v24, 4 }
  0x3e   : > { %2754 = vmatprep.mubr.msk.bf16.mxu0 %vm3342_vm1, %v4529_v2  ;;  %4553 = vst [vmem:[#allocation12_spill] sm:$0xff] %v3686_v53  ;;  %v2453_v7 = vld [vmem:[%s4527_s1 + $0xc] sm:$0x3]  ;;  %v1162_v24 = vrot.slane %v3516_v55, 3 }
  0x3f   : > { %v300_v20 = vsel %vm238_vm3, %v290_v47, %v299_v57  ;;  %v1157_v47 = vsel %vm1154_vm7, %v1155_v35, %v1156_v63  ;;  %v1344_v25 = vsel %vm356_vm0, %v2453_v7, 0  ;;  %v313_v7 = vrot.slane %v3708_v19, 1 }
  0x43   : > { %2603 = vmatmul.mubr.msk.bf16.gmra.mrb[16].mxu1 %vm328_vm2, %v291_v41  ;;  %v307_v41 = vrot.slane %v3664_v58, 2 }
  0x44   : > { %2606 = vmatprep.mubr.msk.bf16.mxu1 %vm3342_vm1, %v4529_v2 }
  0x45   : > { %2755 = vmatmul.mubr.msk.bf16.gmra.mrb[16].mxu0 %vm328_vm2, %v972_v56  ;;  %v3696_v56 = vcombine.low %v3683_v42, %v3686_v53  ;;  %v308_v6 = vor.u32 %v307_v41, %v304_v26  ;;  %v3711_v53 = vshll.u32 %v3596_v44, 16  ;;  %v642_v26 = vrot.slane %v3516_v55, 2 }
  0x46   : > { %2776 = vmatprep.mubr.msk.bf16.mxu0 %vm3342_vm1, %v4529_v2  ;;  %v3701_v2 = vrot.slane %v3676_v0, 3 }
  0x47   : > { %v4537_v59 = vrot.slane %v3696_v56, 3  ;;  %v309_v41 = vsel %vm238_vm3, %v299_v57, %v308_v6  ;;  %v316_v22 = vrot.slane %v3711_v53, 2  ;;  %v320_v57 = vshrl.u32 %v3600_v45, 16 }
  0x49   : > { %v3717_v35 = vsel %vm1154_vm7, %v3701_v2, %v4537_v59  ;;  %v3729_v59 = vsel %vm632_vm6, %v640_v13, %v642_v26  ;;  %v1160_v13 = vrot.slane %v3488_v43, 3  ;;  %v322_v5 = vrot.slane %v320_v57, 1 }
  0x4a   : > { %v1477_v57 = vor.u32 %v1476_v4, %v1475_v51  ;;  %v1479_v51 = vrot.slane %v3499_v48, 3  ;;  %v1480_v4 = vrot.slane %v3502_v49, 4  ;;  %v2409_v48 = vld [vmem:[%s4527_s1 + $0x4] sm:$0x3]  ;;  %v1164_v49 = vrot.slane %v3549_v14, 3 }
  0x4b   : > { %2607 = vmatmul.mubr.msk.bf16.gmra.mrb[20].mxu1 %vm328_vm2, %v300_v20  ;;  %v1158_v20 = vrot.slane %v3455_v18, 3  ;;  %v317_v18 = vor.u32 %v316_v22, %v313_v7  ;;  %v1472_v7 = vrot.slane %v3458_v23, 3 }
  0x4c   : > { %2610 = vmatprep.mubr.msk.bf16.mxu1 %vm3342_vm1, %v4554_v28 }
  0x4d   : > { %2777 = vmatmul.mubr.msk.bf16.vlgmr.msra.gmra.mrb[0].mxu0 %vm328_vm2, %v1157_v47  ;;  %v323_v47 = vshll.u32 %v3600_v45, 16  ;;  %v3755_v43 = vsel %vm1154_vm7, %v1158_v20, %v1160_v13 }
  0x4e   : > { %2813 = vmatpush3.bf16.msra.mxu0 %v1344_v25  ;;  %2780 = vmatprep.mubr.msk.bf16.mxu0 %vm3342_vm1, %v4554_v28  ;;  %v3733_v25 = vsel %vm1154_vm7, %v1156_v63, %v1158_v20  ;;  %v318_v63 = vsel %vm238_vm3, %v308_v6, %v317_v18  ;;  %v1474_v6 = vor.u32 %v1473_v27, %v1472_v7  ;;  %v680_v20 = vsel %vm356_vm0, %v2409_v48, 0 }
  0x4f   : > { %2850 = vmatprep.subr.bf16.mxu0 %v4554_v28  ;;  %v325_v17 = vrot.slane %v323_v47, 2  ;;  %v3778_v27 = vor.u32 %v1480_v4, %v1479_v51  ;;  %v1168_v47 = vrot.slane %v3596_v44, 3  ;;  %v1495_v4 = vrot.slane %v3708_v19, 3 }
  0x50   : > { %v3762_v23 = vsel %vm1471_vm8, %v1474_v6, %v1477_v57  ;;  %v1484_v6 = vrot.slane %v3529_v61, 4 }
  0x51   : > { %v3784_v55 = vsel %vm1471_vm8, %v1477_v57, %v3778_v27 }
  0x53   : > { %2611 = vmatmul.mubr.msk.bf16.gmra.mrb[24].mxu1 %vm328_vm2, %v309_v41  ;;  %v644_v41 = vrot.slane %v3549_v14, 2  ;;  %v1166_v14 = vrot.slane %v3578_v36, 3 }
  0x54   : > { %2614 = vmatprep.mubr.msk.bf16.mxu1 %vm3342_vm1, %v4554_v28 }
  0x55   : > { %2781 = vmatmul.mubr.msk.bf16.gmra.mrb[4].mxu0 %vm328_vm2, %v3733_v25  ;;  %v3747_v22 = vsel %vm632_vm6, %v642_v26, %v644_v41  ;;  %v326_v26 = vor.u32 %v325_v17, %v322_v5  ;;  %v3772_v5 = vsel %vm632_vm6, %v644_v41, %v646_v29  ;;  %v1163_v17 = vsel %vm1154_vm7, %v1160_v13, %v1162_v24 }
  0x56   : > { %2784 = vmatprep.mubr.msk.bf16.mxu0 %vm3342_vm1, %v4554_v28  ;;  %v1169_v13 = vsel %vm1154_vm7, %v1166_v14, %v1168_v47  ;;  %v3827_v41 = vcombine.low %v3683_v42, %v3683_v42 }
  0x57   : > { %v327_v30 = vsel %vm238_vm3, %v317_v18, %v326_v26  ;;  %v1165_v18 = vsel %vm1154_vm7, %v1162_v24, %v1164_v49  ;;  %v3950_v26 = vrot.slane %v3596_v44, 2  ;;  %v1487_v44 = vrot.slane %v3584_v38, 3 }
  0x58   : > { %v650_v24 = vrot.slane %v3600_v45, 2 }
  0x5b   : > { %2615 = vmatmul.mubr.msk.bf16.gmra.mrb[28].mxu1 %vm328_vm2, %v318_v63  ;;  %v2463_v63 = vld [vmem:[%s4527_s1 + $0xe] sm:$0x3] }
  0x5c   : > { %2618 = vmatprep.mubr.msk.bf16.mxu1 %vm3342_vm1, %v4554_v28 }
  0x5d   : > { %2785 = vmatmul.mubr.msk.bf16.gmra.mrb[8].mxu0 %vm328_vm2, %v3755_v43 }
  0x5e   : > { %2788 = vmatprep.mubr.msk.bf16.mxu0 %vm3342_vm1, %v4554_v28 }
  0x63   : > { %2619 = vmatmul.mubr.msk.bf16.gmra.mrb[32].mxu1 %vm328_vm2, %v327_v30  ;;  %v1492_v30 = vrot.slane %v3664_v58, 4 }
  0x64   : > { %2624 = vmatprep.mubr.msk.bf16.mxu1 %vm3342_vm1, %v4554_v28 }
  0x65   : > { %2789 = vmatmul.mubr.msk.bf16.gmra.mrb[12].mxu0 %vm328_vm2, %v1163_v17 }
  0x66   : > { %2792 = vmatprep.mubr.msk.bf16.mxu0 %vm3342_vm1, %v4554_v28 }
  0x6b   : > { %2625 = vmatmul.mubr.msk.bf16.vlgmr.msra.gmra.mrb[0].mxu1 %vm328_vm2, %v3572_v33  ;;  %v1167_v33 = vsel %vm1154_vm7, %v1164_v49, %v1166_v14 }
  0x6c   : > { %2628 = vmatprep.mubr.msk.bf16.mxu1 %vm3342_vm1, %v4554_v28  ;;  %2661 = vmatpush3.bf16.msra.mxu1 %v680_v20 }
  0x6d   : > { %2698 = vmatprep.subr.bf16.mxu1 %v4554_v28  ;;  %2793 = vmatmul.mubr.msk.bf16.gmra.mrb[16].mxu0 %vm328_vm2, %v1165_v18 }
  0x6e   : > { %2796 = vmatprep.mubr.msk.bf16.mxu0 %vm3342_vm1, %v4554_v28 }
  0x73   : > { %2629 = vmatmul.mubr.msk.bf16.gmra.mrb[4].mxu1 %vm328_vm2, %v3590_v40  ;;  %v1171_v40 = vsel %vm1154_vm7, %v1168_v47, %v3701_v2 }
  0x74   : > { %2632 = vmatprep.mubr.msk.bf16.mxu1 %vm3342_vm1, %v4554_v28 }
  0x75   : > { %2797 = vmatmul.mubr.msk.bf16.gmra.mrb[20].mxu0 %vm328_vm2, %v1167_v33 }
  0x76   : > { %2800 = vmatprep.mubr.msk.bf16.mxu0 %vm3342_vm1, %v4554_v28 }
  0x7b   : > { %2633 = vmatmul.mubr.msk.bf16.gmra.mrb[8].mxu1 %vm328_vm2, %v3603_v46  ;;  %v1172_v46 = vrot.slane %v3827_v41, 3 }
  0x7c   : > { %2636 = vmatprep.mubr.msk.bf16.mxu1 %vm3342_vm1, %v4554_v28 }
  0x7d   : > { %2801 = vmatmul.mubr.msk.bf16.gmra.mrb[24].mxu0 %vm328_vm2, %v1169_v13 }
  0x7e   : > { %2804 = vmatprep.mubr.msk.bf16.mxu0 %vm3342_vm1, %v4554_v28 }
  0x83   : > { %2637 = vmatmul.mubr.msk.bf16.gmra.mrb[12].mxu1 %vm328_vm2, %v3606_v52  ;;  %v1173_v52 = vsel %vm1154_vm7, %v3701_v2, %v1172_v46  ;;  %v2421_v2 = vld [vmem:[%s4527_s1 + $0x6] sm:$0x3] }
  0x84   : > { %2640 = vmatprep.mubr.msk.bf16.mxu1 %vm3342_vm1, %v4554_v28 }
  0x85   : > { %2805 = vmatmul.mubr.msk.bf16.gmra.mrb[28].mxu0 %vm328_vm2, %v1171_v40 }
  0x86   : > { %2808 = vmatprep.mubr.msk.bf16.mxu0 %vm3342_vm1, %v4554_v28 }
  0x8b   : > { %2641 = vmatmul.mubr.msk.bf16.gmra.mrb[16].mxu1 %vm328_vm2, %v3618_v1  ;;  %v1549_v1 = vsel %vm356_vm0, %v2463_v63, 0 }
  0x8c   : > { %2644 = vmatprep.mubr.msk.bf16.mxu1 %vm3342_vm1, %v4554_v28 }
  0x8d   : > { %2809 = vmatmul.mubr.msk.bf16.gmra.mrb[32].mxu0 %vm328_vm2, %v1173_v52 }
  0x8e   : > { %2814 = vmatprep.mubr.msk.bf16.mxu0 %vm3342_vm1, %v4554_v28 }
  0x93   : > { %2645 = vmatmul.mubr.msk.bf16.gmra.mrb[20].mxu1 %vm328_vm2, %v3621_v8  ;;  %v822_v8 = vsel %vm356_vm0, %v2421_v2, 0  ;;  %v973_v2 = vrot.slane %v3661_v21, 2 }
  0x94   : > { %2648 = vmatprep.mubr.msk.bf16.mxu1 %vm3342_vm1, %v4554_v28 }
  0x95   : > { %2815 = vmatmul.mubr.msk.bf16.vlgmr.msra.gmra.mrb[0].mxu0 %vm328_vm2, %v3733_v25 }
  0x96   : > { %2851 = vmatpush3.bf16.msra.mxu0 %v1549_v1  ;;  %2818 = vmatprep.mubr.msk.bf16.mxu0 %vm3342_vm1, %v4554_v28 }
  0x97   : > { %2888 = vmatprep.subr.bf16.mxu0 %v4554_v28 }
  0x9b   : > { %2649 = vmatmul.mubr.msk.bf16.gmra.mrb[24].mxu1 %vm328_vm2, %v3626_v62  ;;  %v3906_v62 = vld [vmem:[%s3424_s26 + $0x60] sm:$0xf] }
  0x9c   : > { %2652 = vmatprep.mubr.msk.bf16.mxu1 %vm3342_vm1, %v4554_v28 }
  0x9d   : > { %2819 = vmatmul.mubr.msk.bf16.gmra.mrb[4].mxu0 %vm328_vm2, %v3755_v43  ;;  %v1483_v43 = vrot.slane %v3526_v60, 3  ;;  %v3960_v60 = vsel %vm632_vm6, %v646_v29, %v3950_v26  ;;  %v651_v29 = vsel %vm632_vm6, %v3950_v26, %v650_v24  ;;  %v994_v24 = vshll.u32 %v3827_v41, 16 }
  0x9e   : > { %2822 = vmatprep.mubr.msk.bf16.mxu0 %vm3342_vm1, %v4554_v28 }
  0x9f   : > { %v1485_v57 = vor.u32 %v1484_v6, %v1483_v43 }
  0xa1   : > { %v1486_v61 = vsel %vm1471_vm8, %v3778_v27, %v1485_v57 }
  0xa3   : > { %2653 = vmatmul.mubr.msk.bf16.gmra.mrb[28].mxu1 %vm328_vm2, %v3629_v11  ;;  %v3912_v11 = vcombine.low %v3906_v62, %v3906_v62 }
  0xa4   : > { %2656 = vmatprep.mubr.msk.bf16.mxu1 %vm3342_vm1, %v4554_v28 }
  0xa5   : > { %2823 = vmatmul.mubr.msk.bf16.gmra.mrb[8].mxu0 %vm328_vm2, %v1163_v17  ;;  %v1496_v17 = vrot.slane %v3711_v53, 4 }
  0xa6   : > { %2826 = vmatprep.mubr.msk.bf16.mxu0 %vm3342_vm1, %v4554_v28 }
  0xa7   : > { %v1497_v27 = vor.u32 %v1496_v17, %v1495_v4  ;;  %v4566_v17 = vld [vmem:[#allocation12_spill] sm:$0xff] }
  0xab   : > { %2657 = vmatmul.mubr.msk.bf16.gmra.mrb[32].mxu1 %vm328_vm2, %v3632_v12  ;;  %v1335_v12 = vrot.slane %v3912_v11, 3 }
  0xac   : > { %2662 = vmatprep.mubr.msk.bf16.mxu1 %vm3342_vm1, %v4554_v28 }
  0xad   : > { %2827 = vmatmul.mubr.msk.bf16.gmra.mrb[12].mxu0 %vm328_vm2, %v1165_v18  ;;  %v1504_v18 = vshrl.u32 %v3696_v56, 16 }
  0xae   : > { %2830 = vmatprep.mubr.msk.bf16.mxu0 %vm3342_vm1, %v4554_v28 }
  0xb3   : > { %2663 = vmatmul.mubr.msk.bf16.vlgmr.msra.gmra.mrb[0].mxu1 %vm328_vm2, %v3643_v34  ;;  %v4555_v34 = vrot.slane %v3696_v56, 3 }
  0xb4   : > { %2666 = vmatprep.mubr.msk.bf16.mxu1 %vm3342_vm1, %v4554_v28  ;;  %2699 = vmatpush3.bf16.msra.mxu1 %v822_v8  ;;  %v974_v8 = vrot.slane %v3664_v58, 3  ;;  %v978_v58 = vrot.slane %v3711_v53, 3 }
  0xb5   : > { %2926 = vmatprep.subr.bf16.mxu1 %v4554_v28  ;;  %2831 = vmatmul.mubr.msk.bf16.gmra.mrb[16].mxu0 %vm328_vm2, %v1167_v33  ;;  %v1336_v25 = vsel %vm1154_vm7, %v4555_v34, %v1335_v12  ;;  %v1506_v33 = vrot.slane %v1504_v18, 3  ;;  %v4558_v34 = vld [vmem:[#allocation10_spill] sm:$0xff] }
  0xb6   : > { %2834 = vmatprep.mubr.msk.bf16.mxu0 %vm3342_vm1, %v4554_v28  ;;  %v975_v12 = vor.u32 %v974_v8, %v973_v2 }
  0xbb   : > { %2667 = vmatmul.mubr.msk.bf16.gmra.mrb[4].mxu1 %vm328_vm2, %v3646_v37 }
  0xbc   : > { %2670 = vmatprep.mubr.msk.bf16.mxu1 %vm3342_vm1, %v4554_v28 }
  0xbd   : > { %2835 = vmatmul.mubr.msk.bf16.gmra.mrb[20].mxu0 %vm328_vm2, %v1169_v13 }
  0xbe   : > { %2838 = vmatprep.mubr.msk.bf16.mxu0 %vm3342_vm1, %v4554_v28 }
  0xc3   : > { %2671 = vmatmul.mubr.msk.bf16.gmra.mrb[8].mxu1 %vm328_vm2, %v3653_v54 }
  0xc4   : > { %2674 = vmatprep.mubr.msk.bf16.mxu1 %vm3342_vm1, %v4554_v28 }
  0xc5   : > { %2839 = vmatmul.mubr.msk.bf16.gmra.mrb[24].mxu0 %vm328_vm2, %v1171_v40  ;;  %v1513_v40 = vshrl.u32 %v3912_v11, 16 }
  0xc6   : > { %2842 = vmatprep.mubr.msk.bf16.mxu0 %vm3342_vm1, %v4554_v28 }
  0xc7   : > { %v1515_v46 = vrot.slane %v1513_v40, 3 }
  0xcb   : > { %2675 = vmatmul.mubr.msk.bf16.gmra.mrb[12].mxu1 %vm328_vm2, %v3692_v16 }
  0xcc   : > { %2678 = vmatprep.mubr.msk.bf16.mxu1 %vm3342_vm1, %v4554_v28 }
  0xcd   : > { %2843 = vmatmul.mubr.msk.bf16.gmra.mrb[28].mxu0 %vm328_vm2, %v3717_v35  ;;  %v2482_v35 = vld [vmem:[%s4527_s1 + $0x10] sm:$0x3] }
  0xce   : > { %2846 = vmatprep.mubr.msk.bf16.mxu0 %vm3342_vm1, %v4554_v28  ;;  %v1713_v7 = vsel %vm356_vm0, %v2482_v35, 0  ;;  %v4559_v35 = vld [vmem:[#allocation5_spill] sm:$0xff] }
  0xd3   : > { %2679 = vmatmul.mubr.msk.bf16.gmra.mrb[16].mxu1 %vm328_vm2, %v3729_v59 }
  0xd4   : > { %2682 = vmatprep.mubr.msk.bf16.mxu1 %vm3342_vm1, %v4554_v28 }
  0xd5   : > { %2847 = vmatmul.mubr.msk.bf16.gmra.mrb[32].mxu0 %vm328_vm2, %v1336_v25  ;;  %v976_v25 = vsel %vm949_vm4, %v4558_v34, %v975_v12 }
  0xd6   : > { %2852 = vmatprep.mubr.msk.bf16.mxu0 %vm3342_vm1, %v4554_v28 }
  0xdb   : > { %2683 = vmatmul.mubr.msk.bf16.gmra.mrb[20].mxu1 %vm328_vm2, %v3747_v22 }
  0xdc   : > { %2686 = vmatprep.mubr.msk.bf16.mxu1 %vm3342_vm1, %v4554_v28 }
  0xdd   : > { %2853 = vmatmul.mubr.msk.bf16.vlgmr.msra.gmra.mrb[0].mxu0 %vm328_vm2, %v3762_v23  ;;  %v1488_v23 = vrot.slane %v3587_v39, 4  ;;  %v1491_v39 = vrot.slane %v3661_v21, 3  ;;  %v977_v21 = vrot.slane %v3708_v19, 2 }
  0xde   : > { %2889 = vmatpush3.bf16.msra.mxu0 %v1713_v7  ;;  %2856 = vmatprep.mubr.msk.bf16.mxu0 %vm3342_vm1, %v4554_v28  ;;  %v4560_v7 = vld [vmem:[#allocation4_spill] sm:$0xff] }
  0xdf   : > { %v1489_v36 = vor.u32 %v1488_v23, %v1487_v44  ;;  %v1493_v45 = vor.u32 %v1492_v30, %v1491_v39  ;;  %v2477_v43 = vcombine.low %v4560_v7, %v4559_v35  ;;  %v979_v6 = vor.u32 %v978_v58, %v977_v21  ;;  %v4564_v39 = vld [vmem:[#allocation8_spill] sm:$0xff] }
  0xe0   : > { %v991_v23 = vshrl.u32 %v3827_v41, 16 }
  0xe1   : > { %v1490_v38 = vsel %vm1471_vm8, %v1485_v57, %v1489_v36  ;;  %v1494_v51 = vsel %vm1471_vm8, %v1489_v36, %v1493_v45  ;;  %v1498_v48 = vsel %vm1471_vm8, %v1493_v45, %v1497_v27  ;;  %v4561_v57 = vld [vmem:[#allocation7_spill] sm:$0xff] }
  0xe2   : > { %v993_v36 = vrot.slane %v991_v23, 2 }
  0xe3   : > { %2687 = vmatmul.mubr.msk.bf16.gmra.mrb[24].mxu1 %vm328_vm2, %v3772_v5 }
  0xe4   : > { %2690 = vmatprep.mubr.msk.bf16.mxu1 %vm3342_vm1, %v4554_v28 }
  0xe5   : > { %2857 = vmatmul.mubr.msk.bf16.gmra.mrb[4].mxu0 %vm328_vm2, %v3784_v55  ;;  %v982_v55 = vshrl.u32 %v3676_v0, 16 }
  0xe6   : > { %2860 = vmatprep.mubr.msk.bf16.mxu0 %vm3342_vm1, %v4554_v28 }
  0xe7   : > { %v1499_v49 = vrot.slane %v982_v55, 3  ;;  %v984_v19 = vrot.slane %v982_v55, 2 }
  0xeb   : > { %2691 = vmatmul.mubr.msk.bf16.gmra.mrb[28].mxu1 %vm328_vm2, %v3960_v60 }
  0xec   : > { %2694 = vmatprep.mubr.msk.bf16.mxu1 %vm3342_vm1, %v4554_v28 }
  0xed   : > { %2861 = vmatmul.mubr.msk.bf16.gmra.mrb[8].mxu0 %vm328_vm2, %v1486_v61 }
  0xee   : > { %2864 = vmatprep.mubr.msk.bf16.mxu0 %vm3342_vm1, %v4554_v28 }
  0xf3   : > { %2695 = vmatmul.mubr.msk.bf16.gmra.mrb[32].mxu1 %vm328_vm2, %v651_v29  ;;  %v996_v29 = vrot.slane %v994_v24, 3 }
  0xf4   : > { %2700 = vmatprep.mubr.msk.bf16.mxu1 %vm3342_vm1, %v4554_v28 }
  0xf5   : > { %2865 = vmatmul.mubr.msk.bf16.gmra.mrb[12].mxu0 %vm328_vm2, %v1490_v38  ;;  %v4563_v38 = vld [vmem:[#allocation9_spill] sm:$0xff]  ;;  %v997_v45 = vor.u32 %v996_v29, %v993_v36 }
  0xf6   : > { %2868 = vmatprep.mubr.msk.bf16.mxu0 %vm3342_vm1, %v4554_v28  ;;  %v2479_v30 = vcombine.low %v4564_v39, %v4563_v38 }
  0xfb   : > { %2701 = vmatmul.mubr.msk.bf16.vlgmr.msra.gmra.mrb[0].mxu1 %vm328_vm2, %v3646_v37  ;;  %v985_v37 = vshll.u32 %v3676_v0, 16 }
  0xfc   : > { %2704 = vmatprep.mubr.msk.bf16.mxu1 %vm3342_vm1, %v4554_v28  ;;  %2927 = vmatpush3.bf16.msra.mxu1 %v3401_v3 }
  0xfd   : > { %2869 = vmatmul.mubr.msk.bf16.gmra.mrb[16].mxu0 %vm328_vm2, %v1494_v51  ;;  %v1500_v3 = vrot.slane %v985_v37, 4  ;;  %v987_v53 = vrot.slane %v985_v37, 3  ;;  %v4565_v51 = vld [vmem:[#allocation11_spill] sm:$0xff]  ;;  %v1838_v37 = vlaneseq }
  0xfe   : > { %2872 = vmatprep.mubr.msk.bf16.mxu0 %vm3342_vm1, %v4554_v28  ;;  %v2480_v4 = vcombine.low %v4565_v51, %v3683_v42 }
  0xff   : > { %v1501_v20 = vor.u32 %v1500_v3, %v1499_v49  ;;  %v988_v44 = vor.u32 %v987_v53, %v984_v19  ;;  %v4129_v42 = vshrl.u32 %v1838_v37, 7 }
 0x101   : > { %v1502_v14 = vsel %vm1471_vm8, %v1497_v27, %v1501_v20  ;;  %v2481_v27 = vcombine.low %v4566_v17, %v3906_v62  ;;  %v1840_v18 = vadd.s32 8, %v4129_v42  ;;  %v4184_v23 = vadd.s32 56, %v4129_v42 }
 0x103   : > { %2705 = vmatmul.mubr.msk.bf16.gmra.mrb[4].mxu1 %vm328_vm2, %v3653_v54  ;;  %v1507_v54 = vshll.u32 %v3696_v56, 16  ;;  %v1516_v56 = vshll.u32 %v3912_v11, 16  ;;  %v4556_v11 = vld [vmem:[#allocation3_spill] sm:$0xff] }
 0x104   : > { %2708 = vmatprep.mubr.msk.bf16.mxu1 %vm3342_vm1, %v4554_v28 }
 0x105   : > { %2873 = vmatmul.mubr.msk.bf16.gmra.mrb[20].mxu0 %vm328_vm2, %v1498_v48  ;;  %v1509_v47 = vrot.slane %v1507_v54, 4  ;;  %v1518_v52 = vrot.slane %v1516_v56, 4 }
 0x106   : > { %2876 = vmatprep.mubr.msk.bf16.mxu0 %vm3342_vm1, %v4554_v28 }
 0x107   : > { %v1510_v13 = vor.u32 %v1509_v47, %v1506_v33  ;;  %v1519_v63 = vor.u32 %v1518_v52, %v1515_v46  ;;  %v4137_v62 = vmul.u32.u64.low 3817748708, %v4129_v42  ;;  %v4138_v33 = vmul.u32.u64.high 3817748708, %v4129_v42, %v4137_v62 }
 0x109   : > { %v1520_v1 = vsel %vm1471_vm8, %v1510_v13, %v1519_v63  ;;  %v1863_v63 = vshrl.u32 %v4138_v33, 4  ;;  %v4213_v33 = vadd.s32 72, %v4129_v42 }
 0x10b   : > { %2709 = vmatmul.mubr.msk.bf16.gmra.mrb[8].mxu1 %vm328_vm2, %v3692_v16  ;;  %v1511_v16 = vsel %vm1471_vm8, %v1501_v20, %v1510_v13  ;;  %v4140_v47 = vmul.u32.u64.low 3817748708, %v1840_v18  ;;  %v4141_v13 = vmul.u32.u64.high 3817748708, %v1840_v18, %v4140_v47 }
 0x10c   : > { %2712 = vmatprep.mubr.msk.bf16.mxu1 %vm3342_vm1, %v4554_v28 }
 0x10d   : > { %2877 = vmatmul.mubr.msk.bf16.gmra.mrb[24].mxu0 %vm328_vm2, %v1502_v14 }
 0x10e   : > { %2880 = vmatprep.mubr.msk.bf16.mxu0 %vm3342_vm1, %v4554_v28 }
 0x113   : > { %2713 = vmatmul.mubr.msk.bf16.gmra.mrb[12].mxu1 %vm328_vm2, %v3729_v59  ;;  %v2473_v59 = vcombine.low %v3437_v9, %v3440_v10  ;;  %v811_v9 = vrot.slane %v3676_v0, 2  ;;  %v989_v0 = vsel %vm949_vm4, %v979_v6, %v988_v44 }
 0x114   : > { %2716 = vmatprep.mubr.msk.bf16.mxu1 %vm3342_vm1, %v4554_v28 }
 0x115   : > { %2881 = vmatmul.mubr.msk.bf16.gmra.mrb[28].mxu0 %vm328_vm2, %v1511_v16  ;;  %v812_v10 = vsel %vm632_vm6, %v3950_v26, %v811_v9  ;;  %v980_v26 = vsel %vm949_vm4, %v975_v12, %v979_v6  ;;  %v1841_v16 = vadd.s32 16, %v4129_v42  ;;  %v4172_v6 = vadd.s32 48, %v4129_v42 }
 0x116   : > { %2884 = vmatprep.mubr.msk.bf16.mxu0 %vm3342_vm1, %v4554_v28 }
 0x11b   : > { %2717 = vmatmul.mubr.msk.bf16.gmra.mrb[16].mxu1 %vm328_vm2, %v3747_v22  ;;  %v2474_v22 = vcombine.low %v3447_v15, %v3470_v31  ;;  %v813_v15 = vrot.slane %v3827_v41, 2  ;;  %v998_v41 = vsel %vm949_vm4, %v988_v44, %v997_v45 }
 0x11c   : > { %2720 = vmatprep.mubr.msk.bf16.mxu1 %vm3342_vm1, %v4554_v28 }
 0x11d   : > { %2885 = vmatmul.mubr.msk.bf16.gmra.mrb[32].mxu0 %vm328_vm2, %v1520_v1  ;;  %v814_v31 = vsel %vm632_vm6, %v811_v9, %v813_v15  ;;  %v1874_v1 = vshrl.u32 %v4141_v13, 4 }
 0x11e   : > { %2890 = vmatprep.mubr.msk.bf16.mxu0 %vm3342_vm1, %v4554_v28 }
 0x123   : > { %2721 = vmatmul.mubr.msk.bf16.gmra.mrb[20].mxu1 %vm328_vm2, %v3772_v5  ;;  %v2475_v5 = vcombine.low %v3473_v32, %v3505_v50  ;;  %v4557_v32 = vld [vmem:[#allocation2_spill] sm:$0xff] }
 0x124   : > { %2724 = vmatprep.mubr.msk.bf16.mxu1 %vm3342_vm1, %v4554_v28  ;;  %v2476_v50 = vcombine.low %v4557_v32, %v4556_v11  ;;  %v1844_v11 = vadd.s32 40, %v4129_v42 }
 0x125   : > { %2891 = vmatmul.mubr.msk.bf16.vlgmr.msra.gmra.mrb[0].mxu0 %vm328_vm2, %v2473_v59  ;;  %v1842_v59 = vadd.s32 24, %v4129_v42 }
 0x126   : > { %2894 = vmatprep.mubr.msk.bf16.mxu0 %vm3342_vm1, %v4554_v28  ;;  %v4167_v35 = vmul.u32.u64.low 3817748708, %v1844_v11  ;;  %v4168_v7 = vmul.u32.u64.high 3817748708, %v1844_v11, %v4167_v35 }
 0x127   : > { %v4157_v2 = vmul.u32.u64.low 3817748708, %v1842_v59  ;;  %v4158_v8 = vmul.u32.u64.high 3817748708, %v1842_v59, %v4157_v2 }
 0x128   : > { %v1918_v45 = vshrl.u32 %v4168_v7, 4 }
 0x129   : > { %v1896_v19 = vshrl.u32 %v4158_v8, 4 }
 0x12b   : > { %2725 = vmatmul.mubr.msk.bf16.gmra.mrb[24].mxu1 %vm328_vm2, %v3960_v60  ;;  %v4562_v60 = vld [vmem:[#allocation6_spill] sm:$0xff] }
 0x12c   : > { %2728 = vmatprep.mubr.msk.bf16.mxu1 %vm3342_vm1, %v4554_v28  ;;  %v2478_v61 = vcombine.low %v4562_v60, %v4561_v57 }
 0x12d   : > { %2895 = vmatmul.mubr.msk.bf16.gmra.mrb[4].mxu0 %vm328_vm2, %v2474_v22  ;;  %v4151_v22 = vmul.u32.u64.low 3817748708, %v1841_v16  ;;  %v4152_v9 = vmul.u32.u64.high 3817748708, %v1841_v16, %v4151_v22 }
 0x12e   : > { %2898 = vmatprep.mubr.msk.bf16.mxu0 %vm3342_vm1, %v4554_v28 }
 0x133   : > { %2729 = vmatmul.mubr.msk.bf16.gmra.mrb[28].mxu1 %vm328_vm2, %v812_v10  ;;  %v1864_v10 = vmul.u32 18, %v1863_v63 }
 0x134   : > { %2732 = vmatprep.mubr.msk.bf16.mxu1 %vm3342_vm1, %v4554_v28 }
 0x135   : > { %2899 = vmatmul.mubr.msk.bf16.gmra.mrb[8].mxu0 %vm328_vm2, %v2475_v5  ;;  %v1843_v5 = vadd.s32 32, %v4129_v42  ;;  %v1865_v21 = vsub.s32 %v4129_v42, %v1864_v10 }
 0x136   : > { %2902 = vmatprep.mubr.msk.bf16.mxu0 %vm3342_vm1, %v4554_v28 }
 0x137   : > { %vm2055_vm9 = vcmp.ne.s32.totalorder %v1865_v21, 0  ;;  %vm2073_vm10 = vcmp.lt.s32.totalorder %v1865_v21, 0  ;;  %v2109_v36 = vadd.s32 18, %v1865_v21 }
 0x138   : > { %vm4186_vm13 = vmand %vm2073_vm10, %vm2055_vm9 }
 0x13b   : > { %2733 = vmatmul.mubr.msk.bf16.gmra.mrb[32].mxu1 %vm328_vm2, %v814_v31  ;;  %v1875_v31 = vmul.u32 18, %v1874_v1 }
 0x13c   : > { %2758 = vmatprep.mubr.msk.bf16.mxu1 %vm3342_vm1, %v4554_v28 }
 0x13d   : > { %2903 = vmatmul.mubr.msk.bf16.gmra.mrb[12].mxu0 %vm328_vm2, %v2476_v50  ;;  %v1876_v58 = vsub.s32 %v1840_v18, %v1875_v31  ;;  %v1919_v18 = vmul.u32 18, %v1918_v45  ;;  %v4229_v31 = vmul.u32.u64.low 3817748708, %v4213_v33  ;;  %v4230_v2 = vmul.u32.u64.high 3817748708, %v4213_v33, %v4229_v31 }
 0x13e   : > { %2906 = vmatprep.mubr.msk.bf16.mxu0 %vm3342_vm1, %v4554_v28  ;;  %v4400_v31 = vadd.s32 128, %v4129_v42 }
 0x13f   : > { %vm2056_vm11 = vcmp.ne.s32.totalorder %v1876_v58, 0  ;;  %vm2074_vm12 = vcmp.lt.s32.totalorder %v1876_v58, 0  ;;  %v2110_v29 = vadd.s32 18, %v1876_v58 }
 0x140   : > { %vm4191_vm14 = vmand %vm2074_vm12, %vm2056_vm11 }
 0x141   : > { %v2128_v37 = vsel %vm4191_vm14, %v2110_v29, %v1876_v58 }
 0x143   : > { %2759 = vmatmul.mubr.msk.bf16.vlgmr.msra.gmra.mrb[20].mxu1 %vm328_vm2, %v976_v25  ;;  %v4163_v34 = vmul.u32.u64.low 3817748708, %v1843_v5  ;;  %v4164_v25 = vmul.u32.u64.high 3817748708, %v1843_v5, %v4163_v34 }
 0x144   : > { %2762 = vmatprep.mubr.msk.bf16.mxu1 %vm3342_vm1, %v4554_v28 }
 0x145   : > { %2907 = vmatmul.mubr.msk.bf16.gmra.mrb[16].mxu0 %vm328_vm2, %v2477_v43  ;;  %v1885_v43 = vshrl.u32 %v4152_v9, 4  ;;  %v1907_v38 = vshrl.u32 %v4164_v25, 4 }
 0x146   : > { %2910 = vmatprep.mubr.msk.bf16.mxu0 %vm3342_vm1, %v4554_v28 }
 0x147   : > { %v1886_v57 = vmul.u32 18, %v1885_v43 }
 0x149   : > { %v1887_v51 = vsub.s32 %v1841_v16, %v1886_v57 }
 0x14b   : > { %2763 = vmatmul.mubr.msk.bf16.gmra.mrb[24].mxu1 %vm328_vm2, %v980_v26  ;;  %vm2057_vm15 = vcmp.ne.s32.totalorder %v1887_v51, 0  ;;  %vm2075_vm0 = vcmp.lt.s32.totalorder %v1887_v51, 0 }
 0x14c   : > { %2766 = vmatprep.mubr.msk.bf16.mxu1 %vm3342_vm1, %v4554_v28  ;;  %vm4222_vm3 = vmand %vm2075_vm0, %vm2057_vm15 }
 0x14d   : > { %2911 = vmatmul.mubr.msk.bf16.gmra.mrb[20].mxu0 %vm328_vm2, %v2478_v61  ;;  %v4178_v60 = vmul.u32.u64.low 3817748708, %v4172_v6  ;;  %v4179_v61 = vmul.u32.u64.high 3817748708, %v4172_v6, %v4178_v60 }
 0x14e   : > { %2914 = vmatprep.mubr.msk.bf16.mxu0 %vm3342_vm1, %v4554_v28 }
 0x14f   : > { %v1929_v62 = vshrl.u32 %v4179_v61, 4 }
 0x151   : > { %v1930_v10 = vmul.u32 18, %v1929_v62 }
 0x153   : > { %2767 = vmatmul.mubr.msk.bf16.gmra.mrb[28].mxu1 %vm328_vm2, %v989_v0  ;;  %v4252_v43 = vsub.s32 %v4172_v6, %v1930_v10 }
 0x154   : > { %2770 = vmatprep.mubr.msk.bf16.mxu1 %vm3342_vm1, %v4554_v28 }
 0x155   : > { %2915 = vmatmul.mubr.msk.bf16.gmra.mrb[24].mxu0 %vm328_vm2, %v2479_v30  ;;  %v1897_v30 = vmul.u32 18, %v1896_v19  ;;  %vm2061_vm15 = vcmp.ne.s32.totalorder %v4252_v43, 0  ;;  %vm2079_vm0 = vcmp.lt.s32.totalorder %v4252_v43, 0 }
 0x156   : > { %2918 = vmatprep.mubr.msk.bf16.mxu0 %vm3342_vm1, %v4554_v28 }
 0x15b   : > { %2771 = vmatmul.mubr.msk.bf16.gmra.mrb[32].mxu1 %vm328_vm2, %v998_v41  ;;  %v4197_v41 = vadd.s32 64, %v4129_v42 }
 0x15d   : > { %2919 = vmatmul.mubr.msk.bf16.gmra.mrb[28].mxu0 %vm328_vm2, %v2480_v4  ;;  %v4200_v4 = vmul.u32.u64.low 3817748708, %v4184_v23  ;;  %v4201_v17 = vmul.u32.u64.high 3817748708, %v4184_v23, %v4200_v4 }
 0x15e   : > { %2922 = vmatprep.mubr.msk.bf16.mxu0 %vm3342_vm1, %v4554_v28 }
 0x165   : > { %2923 = vmatmul.mubr.msk.bf16.gmra.mrb[32].mxu0 %vm328_vm2, %v2481_v27  ;;  %v2127_v27 = vsel %vm4186_vm13, %v2109_v36, %v1865_v21  ;;  %vm4215_vm2 = vcmp.lt.s32.totalorder %v2128_v37, 16  ;;  %v1962_v37 = vshrl.u32 %v4230_v2, 4 }
 0x166   : > { %vm2145_vm1 = vcmp.lt.s32.totalorder %v2127_v27, 16 }
 0x1ce   : > { %v4125_v55 = vpop.f32.mrb[0].mxu1 }
 0x1cf   : > { %v2702_v48 = vpop.f32.mrb[1].mxu1 }
 0x1d0   : > { %v4127_v49 = vpop.f32.mrb[2].mxu1  ;;  %v1908_v48 = vmul.u32 18, %v1907_v38 }
 0x1d1   : > { %v2703_v3 = vpop.f32.mrb[3].mxu1 }
 0x1d2   : > { %v1898_v3 = vsub.s32 %v1842_v59, %v1897_v30  ;;  %v4219_v16 = vsub.s32 %v1843_v5, %v1908_v48  ;;  %v4226_v59 = vsub.s32 %v1844_v11, %v1919_v18  ;;  %v4275_v30 = vadd.s32 88, %v4129_v42 }
 0x1d4   : > { %vm2058_vm4 = vcmp.ne.s32.totalorder %v1898_v3, 0  ;;  %vm2076_vm5 = vcmp.lt.s32.totalorder %v1898_v3, 0  ;;  %v2112_v9 = vadd.s32 18, %v1898_v3  ;;  %vm2059_vm7 = vcmp.ne.s32.totalorder %v4219_v16, 0 }
 0x1d5   : > { %vm4239_vm6 = vmand %vm2076_vm5, %vm2058_vm4  ;;  %vm2077_vm8 = vcmp.lt.s32.totalorder %v4219_v16, 0  ;;  %v2113_v25 = vadd.s32 18, %v4219_v16  ;;  %vm2060_vm9 = vcmp.ne.s32.totalorder %v4226_v59, 0  ;;  %vm2078_vm10 = vcmp.lt.s32.totalorder %v4226_v59, 0 }
 0x1d6   : > { %v4131_v20 = vpop.f32.mrb[4].mxu1  ;;  %v2130_v19 = vsel %vm4239_vm6, %v2112_v9, %v1898_v3  ;;  %vm4256_vm11 = vmand %vm2077_vm8, %vm2059_vm7  ;;  %v2114_v36 = vadd.s32 18, %v4226_v59 }
 0x1d7   : > { %v2706_v54 = vpop.f32.mrb[5].mxu1  ;;  %vm4270_vm13 = vmand %vm2078_vm10, %vm2060_vm9  ;;  %vm2148_vm14 = vcmp.lt.s32.totalorder %v2130_v19, 16 }
 0x1d8   : > { %v4134_v28 = vpop.f32.mrb[6].mxu1  ;;  %v2132_v18 = vsel %vm4270_vm13, %v2114_v36, %v4226_v59 }
 0x1d9   : > { %v2707_v14 = vpop.f32.mrb[7].mxu1  ;;  %vm4312_vm5 = vcmp.lt.s32.totalorder %v2132_v18, 16 }
 0x1da   : > { %v4208_v54 = vmul.u32.u64.low 3817748708, %v4197_v41  ;;  %v4209_v14 = vmul.u32.u64.high 3817748708, %v4197_v41, %v4208_v54 }
 0x1db   : > { %v2115_v54 = vadd.s32 18, %v4252_v43 }
 0x1dc   : > { %v1951_v21 = vshrl.u32 %v4209_v14, 4 }
 0x1de   : > { %v4143_v40 = vpop.f32.mrb[8].mxu1  ;;  %v1952_v39 = vmul.u32 18, %v1951_v21 }
 0x1df   : > { %v2710_v56 = vpop.f32.mrb[9].mxu1 }
 0x1e0   : > { %v4146_v46 = vpop.f32.mrb[10].mxu1  ;;  %v2111_v56 = vadd.s32 18, %v1887_v51  ;;  %v4290_v62 = vsub.s32 %v4197_v41, %v1952_v39  ;;  %v1963_v41 = vmul.u32 18, %v1962_v37 }
 0x1e1   : > { %v2711_v52 = vpop.f32.mrb[11].mxu1 }
 0x1e2   : > { %v2129_v11 = vsel %vm4222_vm3, %v2111_v56, %v1887_v51  ;;  %v2131_v51 = vsel %vm4256_vm11, %v2113_v25, %v4219_v16  ;;  %vm2063_vm7 = vcmp.ne.s32.totalorder %v4290_v62, 0  ;;  %vm2081_vm8 = vcmp.lt.s32.totalorder %v4290_v62, 0 }
 0x1e3   : > { %vm2147_vm12 = vcmp.lt.s32.totalorder %v2129_v11, 16  ;;  %vm2149_vm4 = vcmp.lt.s32.totalorder %v2131_v51, 16  ;;  %vm4351_vm9 = vmand %vm2081_vm8, %vm2063_vm7 }
 0x1e6   : > { %v4155_v15 = vpop.f32.mrb[12].mxu1 }
 0x1e7   : > { %v2714_v32 = vpop.f32.mrb[13].mxu1 }
 0x1e8   : > { %v4161_v50 = vpop.f32.mrb[14].mxu1  ;;  %v1940_v32 = vshrl.u32 %v4201_v17, 4 }
 0x1e9   : > { %v2715_v12 = vpop.f32.mrb[15].mxu1 }
 0x1ea   : > { %v4235_v12 = vadd.s32 80, %v4129_v42  ;;  %v1941_v57 = vmul.u32 18, %v1940_v32 }
 0x1ec   : > { %v4261_v60 = vmul.u32.u64.low 3817748708, %v4235_v12  ;;  %v4262_v61 = vmul.u32.u64.high 3817748708, %v4235_v12, %v4261_v60  ;;  %v1942_v27 = vsub.s32 %v4184_v23, %v1941_v57  ;;  %v2117_v57 = vadd.s32 18, %v4290_v62 }
 0x1ee   : > { %v4174_v26 = vpop.f32.mrb[16].mxu1  ;;  %vm2080_vm3 = vcmp.lt.s32.totalorder %v1942_v27, 0 }
 0x1ef   : > { %v2718_v53 = vpop.f32.mrb[17].mxu1 }
 0x1f0   : > { %v4181_v44 = vpop.f32.mrb[18].mxu1 }
 0x1f1   : > { %v2719_v24 = vpop.f32.mrb[19].mxu1 }
 0x1f8   : > { %v1749_v47 = vpop.f32.mrb[0].mxu0 }
 0x1f9   : > { %v2928_v52 = vadd.f32 %v1749_v47, %v4125_v55  ;;  %v2892_v63 = vpop.f32.mrb[1].mxu0 }
 0x1fa   : > { %v1752_v22 = vpop.f32.mrb[2].mxu0  ;;  %v1973_v63 = vshrl.u32 %v4262_v61, 4 }
 0x1fb   : > { %v2199_v5 = vsel %vm2145_vm1, %v2928_v52, 0.0  ;;  %v2929_v8 = vadd.f32 %v1752_v22, %v4127_v49  ;;  %v2893_v55 = vpop.f32.mrb[3].mxu0  ;;  %vm4300_vm1 = vmand %vm2079_vm0, %vm2061_vm15  ;;  %v4305_v52 = vadd.s32 96, %v4129_v42  ;;  %v4309_v22 = vadd.s32 104, %v4129_v42 }
 0x1fc   : > { %v2241_v58 = vmul.f32 %v2199_v5, %v2199_v5  ;;  %v2133_v2 = vsel %vm4300_vm1, %v2115_v54, %v4252_v43  ;;  %v1974_v21 = vmul.u32 18, %v1973_v63 }
 0x1fd   : > { %v2200_v49 = vsel %vm4215_vm2, %v2929_v8, 0.0  ;;  %vm2062_vm2 = vcmp.ne.s32.totalorder %v1942_v27, 0  ;;  %vm2151_vm10 = vcmp.lt.s32.totalorder %v2133_v2, 16 }
 0x1fe   : > { %v2217_v35 = vadd.f32 %v2200_v49, %v2199_v5  ;;  %v2242_v7 = vmul.f32 %v2200_v49, %v2200_v49  ;;  %v2116_v5 = vadd.s32 18, %v1942_v27  ;;  %vm4320_vm6 = vmand %vm2080_vm3, %vm2062_vm2  ;;  %v4332_v49 = vsub.s32 %v4213_v33, %v1963_v41 }
 0x1ff   : > { %v4356_v36 = vsub.s32 %v4235_v12, %v1974_v21 }
 0x200   : > { %v2259_v24 = vadd.f32 %v2242_v7, %v2241_v58  ;;  %v1757_v0 = vpop.f32.mrb[4].mxu0  ;;  %v4335_v7 = vmul.u32.u64.low 3817748708, %v4309_v22  ;;  %v4336_v43 = vmul.u32.u64.high 3817748708, %v4309_v22, %v4335_v7  ;;  %v2134_v53 = vsel %vm4320_vm6, %v2116_v5, %v1942_v27 }
 0x201   : > { %v2930_v6 = vadd.f32 %v1757_v0, %v4131_v20  ;;  %v2896_v29 = vpop.f32.mrb[5].mxu0  ;;  %vm4358_vm11 = vcmp.lt.s32.totalorder %v2134_v53, 16  ;;  %vm2082_vm13 = vcmp.lt.s32.totalorder %v4332_v49, 0  ;;  %v2118_v18 = vadd.s32 18, %v4332_v49 }
 0x202   : > { %v1760_v45 = vpop.f32.mrb[6].mxu0  ;;  %vm2083_vm0 = vcmp.lt.s32.totalorder %v4356_v36, 0  ;;  %v2119_v55 = vadd.s32 18, %v4356_v36 }
 0x203   : > { %v2201_v20 = vsel %vm2147_vm12, %v2930_v6, 0.0  ;;  %v2931_v4 = vadd.f32 %v1760_v45, %v4134_v28  ;;  %v2897_v17 = vpop.f32.mrb[7].mxu0  ;;  %v4293_v47 = vmul.u32.u64.low 3817748708, %v4275_v30  ;;  %v4294_v28 = vmul.u32.u64.high 3817748708, %v4275_v30, %v4293_v47 }
 0x204   : > { %v2218_v48 = vadd.f32 %v2217_v35, %v2201_v20  ;;  %v2243_v3 = vmul.f32 %v2201_v20, %v2201_v20  ;;  %vm2064_vm12 = vcmp.ne.s32.totalorder %v4332_v49, 0  ;;  %v4366_v20 = vadd.s32 120, %v4129_v42 }
 0x205   : > { %v2202_v14 = vsel %vm2148_vm14, %v2931_v4, 0.0  ;;  %v2135_v4 = vsel %vm4351_vm9, %v2117_v57, %v4290_v62  ;;  %vm2065_vm14 = vcmp.ne.s32.totalorder %v4356_v36, 0  ;;  %vm4381_vm15 = vmand %vm2082_vm13, %vm2064_vm12  ;;  %v2006_v47 = vshrl.u32 %v4336_v43, 4 }
 0x206   : > { %v2260_v13 = vadd.f32 %v2259_v24, %v2243_v3  ;;  %v2219_v23 = vadd.f32 %v2218_v48, %v2202_v14  ;;  %v2244_v56 = vmul.f32 %v2202_v14, %v2202_v14  ;;  %v4345_v24 = vadd.s32 112, %v4129_v42  ;;  %vm4412_vm2 = vmand %vm2083_vm0, %vm2065_vm14 }
 0x207   : > { %vm4402_vm1 = vcmp.lt.s32.totalorder %v2135_v4, 16 }
 0x208   : > { %v2261_v1 = vadd.f32 %v2260_v13, %v2244_v56  ;;  %v1765_v59 = vpop.f32.mrb[8].mxu0  ;;  %v4373_v27 = vmul.u32.u64.low 3817748708, %v4345_v24  ;;  %v4374_v37 = vmul.u32.u64.high 3817748708, %v4345_v24, %v4373_v27 }
 0x209   : > { %v2932_v9 = vadd.f32 %v1765_v59, %v4143_v40  ;;  %v2900_v10 = vpop.f32.mrb[9].mxu0  ;;  %v4327_v40 = vmul.u32.u64.low 3817748708, %v4305_v52  ;;  %v4328_v32 = vmul.u32.u64.high 3817748708, %v4305_v52, %v4327_v40 }
 0x20a   : > { %v1768_v8 = vpop.f32.mrb[10].mxu0  ;;  %v2136_v10 = vsel %vm4381_vm15, %v2118_v18, %v4332_v49  ;;  %v2007_v40 = vmul.u32 18, %v2006_v47 }
 0x20b   : > { %v2203_v11 = vsel %vm2149_vm4, %v2932_v9, 0.0  ;;  %v2933_v34 = vadd.f32 %v1768_v8, %v4146_v46  ;;  %v2901_v25 = vpop.f32.mrb[11].mxu0  ;;  %v1984_v46 = vshrl.u32 %v4294_v28, 4  ;;  %v1995_v17 = vshrl.u32 %v4328_v32, 4 }
 0x20c   : > { %v2220_v58 = vadd.f32 %v2219_v23, %v2203_v11  ;;  %v2245_v35 = vmul.f32 %v2203_v11, %v2203_v11  ;;  %v4393_v23 = vmul.u32.u64.low 3817748708, %v4366_v20  ;;  %v4394_v56 = vmul.u32.u64.high 3817748708, %v4366_v20, %v4393_v23 }
 0x20d   : > { %v2204_v19 = vsel %vm4312_vm5, %v2933_v34, 0.0  ;;  %v1985_v51 = vmul.u32 18, %v1984_v46  ;;  %v1996_v59 = vmul.u32 18, %v1995_v17  ;;  %v4419_v25 = vadd.s32 136, %v4129_v42 }
 0x20e   : > { %v2262_v60 = vadd.f32 %v2261_v1, %v2245_v35  ;;  %v2221_v33 = vadd.f32 %v2220_v58, %v2204_v19  ;;  %v2246_v61 = vmul.f32 %v2204_v19, %v2204_v19  ;;  %vm2154_vm5 = vcmp.lt.s32.totalorder %v2136_v10, 16 }
 0x20f   : > { %v4390_v13 = vsub.s32 %v4275_v30, %v1985_v51  ;;  %v4423_v21 = vsub.s32 %v4305_v52, %v1996_v59  ;;  %v2017_v58 = vshrl.u32 %v4374_v37, 4  ;;  %v2137_v46 = vsel %vm4412_vm2, %v2119_v55, %v4356_v36 }
 0x210   : > { %v2263_v6 = vadd.f32 %v2262_v60, %v2246_v61  ;;  %v1773_v29 = vpop.f32.mrb[12].mxu0  ;;  %v4430_v19 = vmul.u32.u64.low 3817748708, %v4400_v31  ;;  %v4431_v53 = vmul.u32.u64.high 3817748708, %v4400_v31, %v4430_v19  ;;  %v2028_v61 = vshrl.u32 %v4394_v56, 4 }
 0x211   : > { %v2934_v39 = vadd.f32 %v1773_v29, %v4155_v15  ;;  %v2904_v45 = vpop.f32.mrb[13].mxu0  ;;  %vm2066_vm3 = vcmp.ne.s32.totalorder %v4390_v13, 0  ;;  %vm2084_vm4 = vcmp.lt.s32.totalorder %v4390_v13, 0  ;;  %vm2067_vm7 = vcmp.ne.s32.totalorder %v4423_v21, 0 }
 0x212   : > { %v1776_v12 = vpop.f32.mrb[14].mxu0  ;;  %vm4440_vm6 = vmand %vm2084_vm4, %vm2066_vm3  ;;  %vm2085_vm8 = vcmp.lt.s32.totalorder %v4423_v21, 0  ;;  %vm2155_vm9 = vcmp.lt.s32.totalorder %v2137_v46, 16  ;;  %v2121_v27 = vadd.s32 18, %v4423_v21 }
 0x213   : > { %v2205_v48 = vsel %vm2151_vm10, %v2934_v39, 0.0  ;;  %v2935_v15 = vadd.f32 %v1776_v12, %v4161_v50  ;;  %v2905_v3 = vpop.f32.mrb[15].mxu0  ;;  %vm4464_vm13 = vmand %vm2085_vm8, %vm2067_vm7 }
 0x214   : > { %v2222_v54 = vadd.f32 %v2221_v33, %v2205_v48  ;;  %v2247_v14 = vmul.f32 %v2205_v48, %v2205_v48 }
 0x215   : > { %v2206_v50 = vsel %vm4358_vm11, %v2935_v15, 0.0  ;;  %v2029_v15 = vmul.u32 18, %v2028_v61 }
 0x216   : > { %v1103_v28 = vpop.f32.mrb[20].mxu1  ;;  %v2264_v16 = vadd.f32 %v2263_v6, %v2247_v14  ;;  %v2223_v41 = vadd.f32 %v2222_v54, %v2206_v50  ;;  %v2248_v63 = vmul.f32 %v2206_v50, %v2206_v50 }
 0x217   : > { %v2760_v1 = vpop.f32.mrb[21].mxu1  ;;  %v4449_v0 = vmul.u32.u64.low 3817748708, %v4419_v25  ;;  %v4450_v6 = vmul.u32.u64.high 3817748708, %v4419_v25, %v4449_v0 }
 0x218   : > { %v1106_v9 = vpop.f32.mrb[22].mxu1  ;;  %v2265_v2 = vadd.f32 %v2264_v16, %v2248_v63  ;;  %v1781_v30 = vpop.f32.mrb[16].mxu0  ;;  %v2139_v63 = vsel %vm4464_vm13, %v2121_v27, %v4423_v21  ;;  %v2030_v1 = vsub.s32 %v4366_v20, %v2029_v15 }
 0x219   : > { %v2761_v8 = vpop.f32.mrb[23].mxu1  ;;  %v2936_v32 = vadd.f32 %v1781_v30, %v4174_v26  ;;  %v2908_v11 = vpop.f32.mrb[17].mxu0  ;;  %v2120_v26 = vadd.s32 18, %v4390_v13 }
 0x21a   : > { %v1784_v49 = vpop.f32.mrb[18].mxu0  ;;  %vm2070_vm2 = vcmp.ne.s32.totalorder %v2030_v1, 0  ;;  %vm2088_vm3 = vcmp.lt.s32.totalorder %v2030_v1, 0 }
 0x21b   : > { %v2207_v35 = vsel %vm4402_vm1, %v2936_v32, 0.0  ;;  %v2937_v7 = vadd.f32 %v1784_v49, %v4181_v44  ;;  %v2909_v43 = vpop.f32.mrb[19].mxu0  ;;  %v4445_v44 = vsub.s32 %v4309_v22, %v2007_v40  ;;  %v2138_v51 = vsel %vm4440_vm6, %v2120_v26, %v4390_v13  ;;  %vm4491_vm6 = vmand %vm2088_vm3, %vm2070_vm2 }
 0x21c   : > { %v2224_v42 = vadd.f32 %v2223_v41, %v2207_v35  ;;  %v2249_v57 = vmul.f32 %v2207_v35, %v2207_v35  ;;  %v2018_v22 = vmul.u32 18, %v2017_v58  ;;  %vm2156_vm12 = vcmp.lt.s32.totalorder %v2138_v51, 16 }
 0x21d   : > { %v2208_v60 = vsel %vm2154_vm5, %v2937_v7, 0.0  ;;  %vm2068_vm10 = vcmp.ne.s32.totalorder %v4445_v44, 0  ;;  %vm2086_vm11 = vcmp.lt.s32.totalorder %v4445_v44, 0  ;;  %v2122_v54 = vadd.s32 18, %v4445_v44 }
 0x21e   : > { %v1111_v33 = vpop.f32.mrb[24].mxu1  ;;  %v2266_v36 = vadd.f32 %v2265_v2, %v2249_v57  ;;  %v2225_v29 = vadd.f32 %v2224_v42, %v2208_v60  ;;  %v2250_v38 = vmul.f32 %v2208_v60, %v2208_v60  ;;  %v2019_v50 = vsub.s32 %v4345_v24, %v2018_v22  ;;  %vm4473_vm14 = vmand %vm2086_vm11, %vm2068_vm10 }
 0x21f   : > { %v2764_v39 = vpop.f32.mrb[25].mxu1  ;;  %v2050_v24 = vshrl.u32 %v4450_v6, 4  ;;  %v2140_v5 = vsel %vm4473_vm14, %v2122_v54, %v4445_v44  ;;  %vm2157_vm1 = vcmp.lt.s32.totalorder %v2139_v63, 16  ;;  %v2124_v43 = vadd.s32 18, %v2030_v1 }
 0x220   : > { %v1114_v45 = vpop.f32.mrb[26].mxu1  ;;  %v2267_v12 = vadd.f32 %v2266_v36, %v2250_v38  ;;  %v1789_v4 = vpop.f32.mrb[20].mxu0  ;;  %vm2069_vm15 = vcmp.ne.s32.totalorder %v2019_v50, 0  ;;  %vm2087_vm0 = vcmp.lt.s32.totalorder %v2019_v50, 0  ;;  %v2123_v11 = vadd.s32 18, %v2019_v50 }
 0x221   : > { %v2765_v17 = vpop.f32.mrb[27].mxu1  ;;  %v2938_v37 = vadd.f32 %v1789_v4, %v1103_v28  ;;  %v2912_v48 = vpop.f32.mrb[21].mxu0  ;;  %v2039_v28 = vshrl.u32 %v4431_v53, 4  ;;  %v2051_v49 = vmul.u32 18, %v2050_v24  ;;  %vm2158_vm4 = vcmp.lt.s32.totalorder %v2140_v5, 16  ;;  %vm4486_vm5 = vmand %vm2087_vm0, %vm2069_vm15 }
 0x222   : > { %v1792_v3 = vpop.f32.mrb[22].mxu0  ;;  %v2141_v44 = vsel %vm4486_vm5, %v2123_v11, %v2019_v50 }
 0x223   : > { %v2209_v14 = vsel %vm2155_vm9, %v2938_v37, 0.0  ;;  %v2939_v62 = vadd.f32 %v1792_v3, %v1106_v9  ;;  %v2913_v47 = vpop.f32.mrb[23].mxu0  ;;  %v2040_v8 = vmul.u32 18, %v2039_v28  ;;  %v2052_v60 = vsub.s32 %v4419_v25, %v2051_v49 }
 0x224   : > { %v2226_v13 = vadd.f32 %v2225_v29, %v2209_v14  ;;  %v2251_v23 = vmul.f32 %v2209_v14, %v2209_v14  ;;  %vm2159_vm9 = vcmp.lt.s32.totalorder %v2141_v44, 16 }
 0x225   : > { %v2210_v16 = vsel %vm2156_vm12, %v2939_v62, 0.0  ;;  %v2041_v19 = vsub.s32 %v4400_v31, %v2040_v8  ;;  %v2142_v31 = vsel %vm4491_vm6, %v2124_v43, %v2030_v1  ;;  %vm2072_vm10 = vcmp.ne.s32.totalorder %v2052_v60, 0 }
 0x226   : > { %v1119_v41 = vpop.f32.mrb[28].mxu1  ;;  %v2268_v59 = vadd.f32 %v2267_v12, %v2251_v23  ;;  %v2227_v9 = vadd.f32 %v2226_v13, %v2210_v16  ;;  %v2252_v10 = vmul.f32 %v2210_v16, %v2210_v16  ;;  %vm2090_vm11 = vcmp.lt.s32.totalorder %v2052_v60, 0 }
 0x227   : > { %v2768_v2 = vpop.f32.mrb[29].mxu1  ;;  %vm2071_vm7 = vcmp.ne.s32.totalorder %v2041_v19, 0  ;;  %vm2089_vm8 = vcmp.lt.s32.totalorder %v2041_v19, 0  ;;  %v2125_v22 = vadd.s32 18, %v2041_v19  ;;  %vm2160_vm12 = vcmp.lt.s32.totalorder %v2142_v31, 16  ;;  %vm2108_vm14 = vmand %vm2090_vm11, %vm2072_vm10 }
 0x228   : > { %v1122_v30 = vpop.f32.mrb[30].mxu1  ;;  %v2269_v55 = vadd.f32 %v2268_v59, %v2252_v10  ;;  %v1797_v40 = vpop.f32.mrb[24].mxu0  ;;  %vm4500_vm13 = vmand %vm2089_vm8, %vm2071_vm7  ;;  %v2126_v37 = vadd.s32 18, %v2052_v60 }
 0x229   : > { %v2769_v32 = vpop.f32.mrb[31].mxu1  ;;  %v2940_v20 = vadd.f32 %v1797_v40, %v1111_v33  ;;  %v2916_v34 = vpop.f32.mrb[25].mxu0  ;;  %v2143_v18 = vsel %vm4500_vm13, %v2125_v22, %v2041_v19 }
 0x22a   : > { %v1800_v26 = vpop.f32.mrb[26].mxu0  ;;  %v2144_v47 = vsel %vm2108_vm14, %v2126_v37, %v2052_v60  ;;  %vm2161_vm15 = vcmp.lt.s32.totalorder %v2143_v18, 16 }
 0x22b   : > { %v2211_v58 = vsel %vm2157_vm1, %v2940_v20, 0.0  ;;  %v2941_v35 = vadd.f32 %v1800_v26, %v1114_v45  ;;  %v2917_v7 = vpop.f32.mrb[27].mxu0  ;;  %vm2162_vm0 = vcmp.lt.s32.totalorder %v2144_v47, 16 }
 0x22c   : > { %v2228_v53 = vadd.f32 %v2227_v9, %v2211_v58  ;;  %v2253_v42 = vmul.f32 %v2211_v58, %v2211_v58 }
 0x22d   : > { %v2212_v46 = vsel %vm2158_vm4, %v2941_v35, 0.0 }
 0x22e   : > { %v1127_v52 = vpop.f32.mrb[32].mxu1  ;;  %v2270_v33 = vadd.f32 %v2269_v55, %v2253_v42  ;;  %v2229_v61 = vadd.f32 %v2228_v53, %v2212_v46  ;;  %v2254_v0 = vmul.f32 %v2212_v46, %v2212_v46 }
 0x22f   : > { %v2772_v6 = vpop.f32.mrb[33].mxu1 }
 0x230   : > { %v1130_v36 = vpop.f32.mrb[34].mxu1  ;;  %v2271_v29 = vadd.f32 %v2270_v33, %v2254_v0  ;;  %v1805_v38 = vpop.f32.mrb[28].mxu0 }
 0x231   : > { %v2773_v39 = vpop.f32.mrb[35].mxu1  ;;  %v2942_v45 = vadd.f32 %v1805_v38, %v1119_v41  ;;  %v2920_v51 = vpop.f32.mrb[29].mxu0 }
 0x232   : > { %v1808_v25 = vpop.f32.mrb[30].mxu0 }
 0x233   : > { %v2213_v4 = vsel %vm2159_vm9, %v2942_v45, 0.0  ;;  %v2943_v17 = vadd.f32 %v1808_v25, %v1122_v30  ;;  %v2921_v27 = vpop.f32.mrb[31].mxu0 }
 0x234   : > { %v2230_v48 = vadd.f32 %v2229_v61, %v2213_v4  ;;  %v2255_v15 = vmul.f32 %v2213_v4, %v2213_v4 }
 0x235   : > { %v2214_v3 = vsel %vm2160_vm12, %v2943_v17, 0.0 }
 0x236   : > { %v2272_v54 = vadd.f32 %v2271_v29, %v2255_v15  ;;  %v2231_v14 = vadd.f32 %v2230_v48, %v2214_v3  ;;  %v2256_v62 = vmul.f32 %v2214_v3, %v2214_v3 }
 0x238   : > { %v2273_v50 = vadd.f32 %v2272_v54, %v2256_v62  ;;  %v1813_v28 = vpop.f32.mrb[32].mxu0 }
 0x239   : > { %v2944_v13 = vadd.f32 %v1813_v28, %v1127_v52  ;;  %v2924_v23 = vpop.f32.mrb[33].mxu0 }
 0x23a   : > { %v1816_v56 = vpop.f32.mrb[34].mxu0 }
 0x23b   : > { %v2215_v16 = vsel %vm2161_vm15, %v2944_v13, 0.0  ;;  %v2945_v41 = vadd.f32 %v1816_v56, %v1130_v36  ;;  %v2925_v63 = vpop.f32.mrb[35].mxu0 }
 0x23c   : > { %v2232_v1 = vadd.f32 %v2231_v14, %v2215_v16  ;;  %v2257_v24 = vmul.f32 %v2215_v16, %v2215_v16 }
 0x23d   : > { %v2216_v59 = vsel %vm2162_vm0, %v2945_v41, 0.0 }
 0x23e   : > { %v2274_v9 = vadd.f32 %v2273_v50, %v2257_v24  ;;  %v2233_v10 = vadd.f32 %v2232_v1, %v2216_v59  ;;  %v2258_v2 = vmul.f32 %v2216_v59, %v2216_v59 }
 0x240   : > { %v2234_v30 = vrot.slane %v2233_v10, 4  ;;  %v2275_v5 = vadd.f32 %v2274_v9, %v2258_v2 }
 0x242   : > { %v2235_v8 = vadd.f32 %v2234_v30, %v2233_v10  ;;  %v2276_v55 = vrot.slane %v2275_v5, 4 }
 0x244   : > { %v2236_v40 = vrot.slane %v2235_v8, 2  ;;  %v2277_v32 = vadd.f32 %v2276_v55, %v2275_v5 }
 0x246   : > { %v2237_v11 = vadd.f32 %v2236_v40, %v2235_v8  ;;  %v2278_v20 = vrot.slane %v2277_v32, 2 }
 0x248   : > { %v2238_v34 = vrot.slane %v2237_v11, 1  ;;  %v2279_v49 = vadd.f32 %v2278_v20, %v2277_v32 }
 0x24a   : > { %v2239_v26 = vadd.f32 %v2238_v34, %v2237_v11  ;;  %v2280_v21 = vrot.slane %v2279_v49, 1 }
 0x24c   : > { %2240 = vst [vmem:[%s177_s25] sm:$0x1] %v2239_v26  ;;  %v2281_v58 = vadd.f32 %v2280_v21, %v2279_v49 }
 0x24e   : > { %2282 = vst [vmem:[%s177_s25 + $0x1] sm:$0x1] %v2281_v58 }
 0x24f PF: > { %s12_s13 = sadd.s32 1, %s3339_s13   ;;  %s4609_s9 = smov %s3331_s11 }
 0x250   : > { %p9_p7 = scmp.ge.s32.totalorder %s12_s13, 6   ;;  %s4610_s10 = smov %s3335_s12 }
 0x251   : > { %s4611_s11 = smov %s4614_s14  ;;  %s4612_s12 = smov %s4618_s15 }
 0x252   :  { %11 = sbr.rel (!%p9_p7) target bundleno = 3 (0x3), region = 66 }

// kernel: resnet_block_forward.4
= control target key start
LH: loop header
LB: loop body
LE: loop exit
PB: predicated region body
PF: predicated region fallthrough
CT: control target
= control target key end

     0   :  { %s7429_s21 = smov 0   ;;  %s7431_s22 = smov 0   ;;  %s10169_s0 = inlined_call_operand.vmem [shape: bf16[2,2,224,4], index: 0, kind: input, shape index: {}]   ;;  %s10170_s1 = inlined_call_operand.vmem [shape: bf16[9,4,128], index: 1, kind: input, shape index: {}]   ;;  %s10171_s2 = inlined_call_operand.vmem [shape: bf16[9,128,128], index: 2, kind: input, shape index: {}]   ;;  %s10172_s3 = inlined_call_operand.vmem [shape: f32[1,128], index: 3, kind: input, shape index: {}]   ;;  %s10173_s4 = inlined_call_operand.vmem [shape: f32[1,128], index: 4, kind: input, shape index: {}]   ;;  %s10174_s5 = inlined_call_operand.vmem [shape: bf16[2,2,144,128], index: 5, kind: output, shape index: {0}]   ;;  %s10175_s6 = inlined_call_operand.vmem [shape: f32[2,2,2,128], index: 6, kind: output, shape index: {1}]  }
   0x1   :  { %s7433_s23 = smov 0   ;;  %s7435_s24 = smov 0  }
   0x2   :  { %s7437_s25 = smov 0  }
   0x3 LB: > { %s26_s26 = sadd.s32 1, %s7382_s23  ;;  %s29_s27 = sadd.s32 1, %s7386_s24  ;;  %s7390_s25 = sphi %s7437_s25, %s17_s25   ;;  %s7386_s24 = sphi %s7435_s24, %s10666_s24   ;;  %s7382_s23 = sphi %s7433_s23, %s10665_s23   ;;  %s7378_s22 = sphi %s7431_s22, %s10664_s22   ;;  %s7374_s21 = sphi %s7429_s21, %s10663_s21  }
   0x4   : > { %p27_p0 = scmp.ge.s32.totalorder %s26_s26, 2  ;;  %p5254_p1 = scmp.ge.s32.totalorder %s7390_s25, 1 }
   0x5   : > { %p237_p2 = scmp.lt.s32.totalorder %s7390_s25, 5 }
   0x6   : > { %s10668_s26 = smov (%p27_p0, %s26_s26), 0  ;;  %s10670_s27 = smov (!%p27_p0, %s29_s27), %s7386_s24 }
   0x7   : > { %p238_p3 = pnand %p5254_p1, %p237_p2  ;;  %p31_p4 = scmp.ge.s32.totalorder %s10670_s27, 2 }
   0x9   : > { %s10672_s27 = smov (%p31_p4, %s10670_s27), 0  ;;  %241 = sbr.rel (%p238_p3) target bundleno = 1434 (0x59a), region = 40 }
  0x10   : > { %v5271_v0 = vld [vmem:[%s10170_s1 + $0x2] sm:$0x3]  ;;  %vm514_vm0 = vcmask 1041408   ;;  %p283_p5 = scmp.lt.s32.totalorder %s7378_s22, 1  ;;  %p285_p6 = scmp.lt.s32.totalorder %s7374_s21, 1  ;;  %vm477_vm1 = vcmask 31744  }
  0x11   : > { %7123 = vmatprep.subr.msk.bf16.mxu0 %vm514_vm0, %v5271_v0  ;;  %v516_v1 = vsel %vm514_vm0, %v5271_v0, 0  ;;  %v378_v2 = vld [vmem:[%s10170_s1] sm:$0x3]  ;;  %vm381_vm2 = vsmask.f32 7424  ;;  %vm815_vm3 = vcmask 1046528  }
  0x12   : > { %5956 = vmatpush3.bf16.msra.mxu0 %v516_v1  ;;  %s10674_s22 = smov (!%p283_p5, %s7378_s22), 1  ;;  %v671_v21 = vsel %vm514_vm0, %v378_v2, 0  ;;  %v5296_v30 = vld [vmem:[%s10170_s1 + $0x4] sm:$0x3]  ;;  %vm1204_vm4 = vsmask.f32 6400 }
  0x13   : > { %s7473_s8 = scalar_select %p285_p6, %s7374_s21, 1  ;;  %7124 = vmatprep.subr.msk.bf16.mxu0 %vm514_vm0, %v378_v2  ;;  %vm1454_vm5 = vcmask 1045504   ;;  %vm1844_vm6 = vsmask.f32 5376  ;;  %vm2095_vm7 = vcmask 1044480   ;;  %vm10176_vm8 = vmmov 0  }
  0x14   : > { %s7133_s9 = smul.u32 56, %s10674_s22  ;;  %p2416_p7 = scmp.eq.s32.totalorder %s7374_s21, 0 }
  0x15   : > { %s7132_s10 = smul.u32 28, %s7473_s8  ;;  %p2418_p8 = scmp.eq.s32.totalorder %s7374_s21, 1 }
  0x16   : > { %s2417_s14 = scalar_select %p2416_p7, 18, 0 }
  0x17   : > { %s289_s11 = sadd.s32 %s7133_s9, %s7132_s10  ;;  %s7135_s9 = smul.u32 36, %s10674_s22 }
  0x18   : > { %s5255_s12 = sshll.u32 %s289_s11, 2 }
  0x19   : > { %s7481_s15 = scalar_lea.vmem %s10169_s0, %s5255_s12 }
  0x1a   : > { %v7484_v3 = vld [vmem:[%s7481_s15] sm:$0xff]   ;;  %v7487_v4 = vld [vmem:[%s7481_s15 + $0x8] sm:$0xff]   ;;  %v7490_v5 = vld [vmem:[%s7481_s15 + $0x10] sm:$0xff]   ;;  %s2419_s21 = scalar_select %p2418_p8, 162, 180 }
  0x1b   : > { %v383_v6 = vshrl.u32 %v7484_v3, 16  ;;  %v385_v7 = vshll.u32 %v7484_v3, 16  ;;  %v390_v8 = vshll.u32 %v7487_v4, 16  ;;  %v394_v9 = vshrl.u32 %v7487_v4, 16  ;;  %v7500_v11 = vld [vmem:[%s7481_s15 + $0x18] sm:$0xff]   ;;  %v7506_v13 = vld [vmem:[%s7481_s15 + $0x20] sm:$0xff]  }
  0x1c   : > { %v7497_v10 = vshll.u32 %v7490_v5, 16  ;;  %v7503_v12 = vshrl.u32 %v7490_v5, 16  ;;  %v7511_v16 = vld [vmem:[%s7481_s15 + $0x28] sm:$0xff]   ;;  %v7515_v18 = vshll.u32 %v7500_v11, 16  ;;  %v7521_v22 = vshll.u32 %v7506_v13, 16  ;;  %v7544_v33 = vld [vmem:[%s7481_s15 + $0x30] sm:$0xff]  }
  0x1d   : > { %v387_v14 = vrot.slane %v385_v7, 1  ;;  %v392_v15 = vrot.slane %v390_v8, 1  ;;  %v7526_v25 = vshrl.u32 %v7500_v11, 16  ;;  %v7531_v28 = vshrl.u32 %v7506_v13, 16  ;;  %v7549_v35 = vld [vmem:[%s7481_s15 + $0x38] sm:$0xff]   ;;  %v7564_v41 = vld [vmem:[%s7481_s15 + $0x40] sm:$0xff]  }
  0x1e   : > { %v400_v17 = vrot.slane %v7497_v10, 1  ;;  %v408_v24 = vrot.slane %v7515_v18, 1  ;;  %v7534_v29 = vshll.u32 %v7511_v16, 16  ;;  %v416_v32 = vrot.slane %v7521_v22, 1  ;;  %v7567_v42 = vld [vmem:[%s7481_s15 + $0x48] sm:$0xff]   ;;  %v7574_v45 = vld [vmem:[%s7481_s15 + $0x50] sm:$0xff]  }
  0x1f   : > { %v388_v19 = vor.u32 %v387_v14, %v383_v6  ;;  %v396_v20 = vor.u32 %v394_v9, %v392_v15  ;;  %v7555_v38 = vshrl.u32 %v7511_v16, 16  ;;  %v7558_v39 = vshll.u32 %v7544_v33, 16  ;;  %v7577_v46 = vld [vmem:[%s7481_s15 + $0x58] sm:$0xf] }
  0x20   : > { %v404_v23 = vor.u32 %v7503_v12, %v400_v17  ;;  %v412_v34 = vor.u32 %v7526_v25, %v408_v24  ;;  %v420_v36 = vor.u32 %v7531_v28, %v416_v32  ;;  %v424_v37 = vrot.slane %v7534_v29, 1 }
  0x21   : > { %v393_v26 = vsel %vm381_vm2, %v388_v19, %v392_v15  ;;  %v401_v27 = vsel %vm381_vm2, %v396_v20, %v400_v17  ;;  %v7561_v40 = vshrl.u32 %v7544_v33, 16  ;;  %v7571_v44 = vshll.u32 %v7549_v35, 16 }
  0x22   : > { %5957 = vmatprep.mubr.msk.bf16.mxu0 %vm477_vm1, %v393_v26  ;;  %v409_v31 = vsel %vm381_vm2, %v404_v23, %v408_v24  ;;  %v417_v43 = vsel %vm381_vm2, %v412_v34, %v416_v32  ;;  %v425_v47 = vsel %vm381_vm2, %v420_v36, %v424_v37  ;;  %v432_v48 = vrot.slane %v7558_v39, 1 }
  0x23   : > { %5958 = vmatmul.mubr.msk.bf16.vlgmr.msra.gmra.mrb[0].mxu0 %vm477_vm1, %v401_v27  ;;  %v7583_v49 = vshll.u32 %v7564_v41, 16  ;;  %v7586_v50 = vshll.u32 %v7567_v42, 16  ;;  %v7590_v51 = vcombine.low %v7577_v46, %v7577_v46  ;;  %v428_v52 = vor.u32 %v7555_v38, %v424_v37  ;;  %v5311_v27 = vld [vmem:[%s10170_s1 + $0x6] sm:$0x3] }
  0x24   : > { %5982 = vmatpush3.bf16.msra.mxu0 %v671_v21  ;;  %5961 = vmatprep.mubr.msk.bf16.mxu0 %vm477_vm1, %v409_v31  ;;  %v7595_v53 = vshll.u32 %v7574_v45, 16  ;;  %v436_v54 = vor.u32 %v7561_v40, %v432_v48  ;;  %v440_v55 = vrot.slane %v7571_v44, 1  ;;  %v7600_v56 = vshrl.u32 %v7549_v35, 16 }
  0x25   : > { %7125 = vmatprep.subr.msk.bf16.mxu0 %vm514_vm0, %v5296_v30  ;;  %v7603_v57 = vshrl.u32 %v7564_v41, 16  ;;  %v448_v58 = vrot.slane %v7583_v49, 1  ;;  %v456_v59 = vrot.slane %v7586_v50, 1  ;;  %v7608_v60 = vshrl.u32 %v7567_v42, 16 }
  0x26   : > { %v470_v61 = vshll.u32 %v7590_v51, 16  ;;  %v433_v62 = vsel %vm381_vm2, %v428_v52, %v432_v48  ;;  %v464_v63 = vrot.slane %v7595_v53, 1  ;;  %v7614_v0 = vshrl.u32 %v7574_v45, 16  ;;  %v5324_v48 = vld [vmem:[%s10170_s1 + $0x8] sm:$0x3] }
  0x27   : > { %v441_v1 = vsel %vm381_vm2, %v436_v54, %v440_v55  ;;  %v474_v6 = vshrl.u32 %v7590_v51, 16  ;;  %v444_v7 = vor.u32 %v7600_v56, %v440_v55  ;;  %v452_v14 = vor.u32 %v7603_v57, %v448_v58 }
  0x28   : > { %v472_v2 = vrot.slane %v470_v61, 1  ;;  %v460_v19 = vor.u32 %v7608_v60, %v456_v59  ;;  %v468_v20 = vor.u32 %v7614_v0, %v464_v63  ;;  %v876_v26 = vsel %vm514_vm0, %v5296_v30, 0 }
  0x29   : > { %v449_v15 = vsel %vm381_vm2, %v444_v7, %v448_v58  ;;  %v457_v17 = vsel %vm381_vm2, %v452_v14, %v456_v59  ;;  %v7646_v31 = vrot.slane %v390_v8, 2  ;;  %v7652_v30 = vrot.slane %v394_v9, 1 }
  0x2a   : > { %v465_v21 = vsel %vm381_vm2, %v460_v19, %v464_v63  ;;  %v473_v23 = vsel %vm381_vm2, %v468_v20, %v472_v2  ;;  %v476_v24 = vor.u32 %v474_v6, %v472_v2  ;;  %v816_v8 = vrot.slane %v7484_v3, 1 }
  0x2b   : > { %5962 = vmatmul.mubr.msk.bf16.gmra.mrb[4].mxu0 %vm477_vm1, %v417_v43  ;;  %v1207_v32 = vor.u32 %v7646_v31, %v7652_v30  ;;  %v817_v9 = vrot.slane %v7487_v4, 1  ;;  %v819_v36 = vrot.slane %v7490_v5, 1  ;;  %v821_v37 = vrot.slane %v7500_v11, 1 }
  0x2c   : > { %5965 = vmatprep.mubr.msk.bf16.mxu0 %vm477_vm1, %v425_v47  ;;  %v1049_v47 = vsel %vm514_vm0, %v5311_v27, 0  ;;  %v823_v52 = vrot.slane %v7506_v13, 1  ;;  %v825_v54 = vrot.slane %v7511_v16, 1  ;;  %v827_v59 = vrot.slane %v7544_v33, 1 }
  0x2d   : > { %v818_v34 = vsel %vm815_vm3, %v816_v8, %v817_v9  ;;  %v820_v43 = vsel %vm815_vm3, %v817_v9, %v819_v36  ;;  %v829_v61 = vrot.slane %v7549_v35, 1  ;;  %v833_v2 = vrot.slane %v7567_v42, 1 }
  0x2e   : > { %v824_v55 = vsel %vm815_vm3, %v821_v37, %v823_v52  ;;  %v826_v58 = vsel %vm815_vm3, %v823_v52, %v825_v54  ;;  %v835_v14 = vrot.slane %v7574_v45, 1  ;;  %v1299_v20 = vsel %vm514_vm0, %v5324_v48, 0 }
  0x2f   : > { %v830_v63 = vsel %vm815_vm3, %v827_v59, %v829_v61  ;;  %v1217_v52 = vrot.slane %v7521_v22, 2 }
  0x33   : > { %5966 = vmatmul.mubr.msk.bf16.gmra.mrb[8].mxu0 %vm477_vm1, %v433_v62  ;;  %v828_v62 = vsel %vm815_vm3, %v825_v54, %v827_v59  ;;  %v1220_v59 = vrot.slane %v7555_v38, 1 }
  0x34   : > { %5969 = vmatprep.mubr.msk.bf16.mxu0 %vm477_vm1, %v441_v1  ;;  %v831_v1 = vrot.slane %v7564_v41, 1 }
  0x36   : > { %v832_v6 = vsel %vm815_vm3, %v829_v61, %v831_v1  ;;  %v834_v7 = vsel %vm815_vm3, %v831_v1, %v833_v2  ;;  %v1221_v61 = vrot.slane %v7534_v29, 2 }
  0x38   : > { %v1222_v1 = vor.u32 %v1221_v61, %v1220_v59 }
  0x3b   : > { %5970 = vmatmul.mubr.msk.bf16.gmra.mrb[12].mxu0 %vm477_vm1, %v449_v15  ;;  %v837_v15 = vrot.slane %v7590_v51, 1 }
  0x3c   : > { %5973 = vmatprep.mubr.msk.bf16.mxu0 %vm477_vm1, %v457_v17  ;;  %v836_v17 = vsel %vm815_vm3, %v833_v2, %v835_v14 }
  0x3d   : > { %v838_v19 = vsel %vm815_vm3, %v835_v14, %v837_v15 }
  0x43   : > { %5974 = vmatmul.mubr.msk.bf16.gmra.mrb[16].mxu0 %vm477_vm1, %v465_v21  ;;  %v333_v21 = vld [vmem:[%s7481_s15 + $0x5c] sm:$0xf] }
  0x44   : > { %5977 = vmatprep.mubr.msk.bf16.mxu0 %vm477_vm1, %v473_v23  ;;  %v7726_v23 = vld [vmem:[%s7481_s15 + $0x60] sm:$0xf] }
  0x4b   : > { %5978 = vmatmul.mubr.msk.bf16.gmra.mrb[20].mxu0 %vm477_vm1, %v476_v24  ;;  %v7729_v24 = vcombine.low %v7577_v46, %v333_v21  ;;  %v1209_v46 = vrot.slane %v7497_v10, 2 }
  0x4c   : > { %5983 = vmatprep.mubr.msk.bf16.mxu0 %vm477_vm1, %v7484_v3  ;;  %v822_v3 = vsel %vm815_vm3, %v819_v36, %v821_v37  ;;  %v1208_v36 = vrot.slane %v7503_v12, 1 }
  0x4e   : > { %v1210_v37 = vor.u32 %v1209_v46, %v1208_v36  ;;  %v1241_v36 = vrot.slane %v7595_v53, 2 }
  0x53   : > { %5984 = vmatmul.mubr.msk.bf16.vlgmr.msra.gmra.mrb[0].mxu0 %vm477_vm1, %v7487_v4 }
  0x54   : > { %6008 = vmatpush3.bf16.msra.mxu0 %v876_v26  ;;  %5987 = vmatprep.mubr.msk.bf16.mxu0 %vm477_vm1, %v7490_v5  ;;  %v7733_v26 = vcombine.low %v7726_v23, %v7726_v23 }
  0x55   : > { %7126 = vmatprep.subr.msk.bf16.mxu0 %vm514_vm0, %v5311_v27  ;;  %v1035_v27 = vrot.slane %v7729_v24, 1 }
  0x56   : > { %v1037_v8 = vrot.slane %v7733_v26, 1 }
  0x57   : > { %v1036_v9 = vsel %vm815_vm3, %v835_v14, %v1035_v27  ;;  %v1229_v14 = vrot.slane %v7571_v44, 2 }
  0x5b   : > { %5988 = vmatmul.mubr.msk.bf16.gmra.mrb[4].mxu0 %vm477_vm1, %v7500_v11 }
  0x5c   : > { %5991 = vmatprep.mubr.msk.bf16.mxu0 %vm477_vm1, %v7506_v13 }
  0x63   : > { %5992 = vmatmul.mubr.msk.bf16.gmra.mrb[8].mxu0 %vm477_vm1, %v7511_v16 }
  0x64   : > { %5995 = vmatprep.mubr.msk.bf16.mxu0 %vm477_vm1, %v7544_v33 }
  0x6b   : > { %5996 = vmatmul.mubr.msk.bf16.gmra.mrb[12].mxu0 %vm477_vm1, %v7549_v35 }
  0x6c   : > { %5999 = vmatprep.mubr.msk.bf16.mxu0 %vm477_vm1, %v7564_v41 }
  0x73   : > { %6000 = vmatmul.mubr.msk.bf16.gmra.mrb[16].mxu0 %vm477_vm1, %v7567_v42 }
  0x74   : > { %6003 = vmatprep.mubr.msk.bf16.mxu0 %vm477_vm1, %v7574_v45 }
  0x7b   : > { %6004 = vmatmul.mubr.msk.bf16.gmra.mrb[20].mxu0 %vm477_vm1, %v7590_v51  ;;  %v5337_v51 = vld [vmem:[%s10170_s1 + $0xa] sm:$0x3] }
  0x7c   : > { %6009 = vmatprep.mubr.msk.bf16.mxu0 %vm477_vm1, %v818_v34  ;;  %v1038_v34 = vsel %vm815_vm3, %v1035_v27, %v1037_v8  ;;  %v1515_v31 = vsel %vm514_vm0, %v5337_v51, 0  ;;  %v1236_v27 = vrot.slane %v7608_v60, 1 }
  0x83   : > { %6010 = vmatmul.mubr.msk.bf16.vlgmr.msra.gmra.mrb[0].mxu0 %vm477_vm1, %v820_v43 }
  0x84   : > { %6034 = vmatpush3.bf16.msra.mxu0 %v1049_v47  ;;  %6013 = vmatprep.mubr.msk.bf16.mxu0 %vm477_vm1, %v822_v3  ;;  %v1213_v47 = vrot.slane %v7515_v18, 2 }
  0x85   : > { %7127 = vmatprep.subr.msk.bf16.mxu0 %vm514_vm0, %v5324_v48  ;;  %v1216_v48 = vrot.slane %v7531_v28, 1 }
  0x8b   : > { %6014 = vmatmul.mubr.msk.bf16.gmra.mrb[4].mxu0 %vm477_vm1, %v824_v55 }
  0x8c   : > { %6017 = vmatprep.mubr.msk.bf16.mxu0 %vm477_vm1, %v826_v58 }
  0x93   : > { %6018 = vmatmul.mubr.msk.bf16.gmra.mrb[8].mxu0 %vm477_vm1, %v828_v62 }
  0x94   : > { %6021 = vmatprep.mubr.msk.bf16.mxu0 %vm477_vm1, %v830_v63 }
  0x9b   : > { %6022 = vmatmul.mubr.msk.bf16.gmra.mrb[12].mxu0 %vm477_vm1, %v832_v6 }
  0x9c   : > { %6025 = vmatprep.mubr.msk.bf16.mxu0 %vm477_vm1, %v834_v7 }
  0xa3   : > { %6026 = vmatmul.mubr.msk.bf16.gmra.mrb[16].mxu0 %vm477_vm1, %v836_v17 }
  0xa4   : > { %6029 = vmatprep.mubr.msk.bf16.mxu0 %vm477_vm1, %v838_v19  ;;  %v1233_v19 = vrot.slane %v7583_v49, 2 }
  0xab   : > { %6030 = vmatmul.mubr.msk.bf16.gmra.mrb[20].mxu0 %vm477_vm1, %v837_v15 }
  0xac   : > { %6035 = vmatprep.mubr.msk.bf16.mxu0 %vm477_vm1, %v820_v43  ;;  %v1212_v43 = vrot.slane %v7526_v25, 1 }
  0xae   : > { %v1214_v54 = vor.u32 %v1213_v47, %v1212_v43  ;;  %v1248_v43 = vshll.u32 %v7729_v24, 16 }
  0xb3   : > { %6036 = vmatmul.mubr.msk.bf16.vlgmr.msra.gmra.mrb[0].mxu0 %vm477_vm1, %v822_v3  ;;  %v1211_v3 = vsel %vm1204_vm4, %v1207_v32, %v1210_v37  ;;  %v1224_v32 = vrot.slane %v7561_v40, 1 }
  0xb4   : > { %6060 = vmatpush3.bf16.msra.mxu0 %v1299_v20  ;;  %6039 = vmatprep.mubr.msk.bf16.mxu0 %vm477_vm1, %v824_v55  ;;  %v1218_v55 = vor.u32 %v1217_v52, %v1216_v48  ;;  %v1257_v48 = vshll.u32 %v7733_v26, 16 }
  0xb5   : > { %7128 = vmatprep.subr.msk.bf16.mxu0 %vm514_vm0, %v5337_v51 }
  0xb6   : > { %v1219_v30 = vsel %vm1204_vm4, %v1214_v54, %v1218_v55  ;;  %v1259_v61 = vrot.slane %v1257_v48, 2 }
  0xbb   : > { %6040 = vmatmul.mubr.msk.bf16.gmra.mrb[4].mxu0 %vm477_vm1, %v826_v58  ;;  %v1215_v58 = vsel %vm1204_vm4, %v1210_v37, %v1214_v54  ;;  %v1245_v37 = vshrl.u32 %v7729_v24, 16 }
  0xbc   : > { %6043 = vmatprep.mubr.msk.bf16.mxu0 %vm477_vm1, %v828_v62  ;;  %v1225_v62 = vrot.slane %v7558_v39, 2 }
  0xbd   : > { %v1247_v54 = vrot.slane %v1245_v37, 1 }
  0xbe   : > { %v1226_v2 = vor.u32 %v1225_v62, %v1224_v32 }
  0xc0   : > { %v1227_v15 = vsel %vm1204_vm4, %v1222_v1, %v1226_v2 }
  0xc3   : > { %6044 = vmatmul.mubr.msk.bf16.gmra.mrb[8].mxu0 %vm477_vm1, %v830_v63  ;;  %v5352_v63 = vld [vmem:[%s10170_s1 + $0xc] sm:$0x3] }
  0xc4   : > { %6047 = vmatprep.mubr.msk.bf16.mxu0 %vm477_vm1, %v832_v6  ;;  %v1223_v6 = vsel %vm1204_vm4, %v1218_v55, %v1222_v1  ;;  %v1250_v55 = vrot.slane %v1248_v43, 2  ;;  %v1455_v1 = vrot.slane %v7487_v4, 2  ;;  %v5366_v4 = vld [vmem:[%s10170_s1 + $0xe] sm:$0x3] }
  0xc5   : > { %v1939_v48 = vsel %vm514_vm0, %v5366_v4, 0 }
  0xcb   : > { %6048 = vmatmul.mubr.msk.bf16.gmra.mrb[12].mxu0 %vm477_vm1, %v834_v7  ;;  %v1228_v7 = vrot.slane %v7600_v56, 1 }
  0xcc   : > { %6051 = vmatprep.mubr.msk.bf16.mxu0 %vm477_vm1, %v836_v17  ;;  %v1232_v17 = vrot.slane %v7603_v57, 1 }
  0xcd   : > { %v1230_v20 = vor.u32 %v1229_v14, %v1228_v7  ;;  %v1458_v7 = vrot.slane %v7500_v11, 2  ;;  %v1460_v14 = vrot.slane %v7506_v13, 2  ;;  %v1464_v11 = vrot.slane %v7544_v33, 2 }
  0xce   : > { %v1234_v51 = vor.u32 %v1233_v19, %v1232_v17  ;;  %v1688_v17 = vsel %vm514_vm0, %v5352_v63, 0 }
  0xcf   : > { %v1231_v21 = vsel %vm1204_vm4, %v1226_v2, %v1230_v20  ;;  %v1456_v2 = vrot.slane %v7490_v5, 2  ;;  %v1461_v19 = vsel %vm1454_vm5, %v1458_v7, %v1460_v14  ;;  %v1462_v5 = vrot.slane %v7511_v16, 2 }
  0xd1   : > { %v1463_v13 = vsel %vm1454_vm5, %v1460_v14, %v1462_v5  ;;  %v1848_v14 = vrot.slane %v7526_v25, 2 }
  0xd3   : > { %6052 = vmatmul.mubr.msk.bf16.gmra.mrb[16].mxu0 %vm477_vm1, %v1036_v9  ;;  %v1235_v9 = vsel %vm1204_vm4, %v1230_v20, %v1234_v51  ;;  %v1466_v20 = vrot.slane %v7549_v35, 2 }
  0xd4   : > { %6055 = vmatprep.mubr.msk.bf16.mxu0 %vm477_vm1, %v1038_v34  ;;  %v1240_v34 = vrot.slane %v7614_v0, 1 }
  0xd6   : > { %v1242_v47 = vor.u32 %v1241_v36, %v1240_v34  ;;  %v1474_v36 = vrot.slane %v7729_v24, 2 }
  0xdb   : > { %6056 = vmatmul.mubr.msk.bf16.gmra.mrb[20].mxu0 %vm477_vm1, %v1037_v8  ;;  %v1237_v8 = vrot.slane %v7586_v50, 2 }
  0xdc   : > { %6061 = vmatprep.mubr.msk.bf16.mxu0 %vm477_vm1, %v1211_v3  ;;  %v1254_v3 = vshrl.u32 %v7733_v26, 16 }
  0xdd   : > { %v1238_v46 = vor.u32 %v1237_v8, %v1236_v27  ;;  %v1470_v27 = vrot.slane %v7567_v42, 2  ;;  %v1472_v8 = vrot.slane %v7574_v45, 2 }
  0xde   : > { %v1256_v59 = vrot.slane %v1254_v3, 1 }
  0xdf   : > { %v1239_v52 = vsel %vm1204_vm4, %v1234_v51, %v1238_v46  ;;  %v1468_v51 = vrot.slane %v7564_v41, 2  ;;  %v1473_v34 = vsel %vm1454_vm5, %v1470_v27, %v1472_v8 }
  0xe1   : > { %v1469_v16 = vsel %vm1454_vm5, %v1466_v20, %v1468_v51 }
  0xe3   : > { %6062 = vmatmul.mubr.msk.bf16.vlgmr.msra.gmra.mrb[0].mxu0 %vm477_vm1, %v1215_v58  ;;  %v1243_v58 = vsel %vm1204_vm4, %v1238_v46, %v1242_v47  ;;  %v1476_v46 = vrot.slane %v7733_v26, 2  ;;  %v7241_v26 = vld [vmem:[%s10171_s2] sm:$0xff]  }
  0xe4   : > { %6086 = vmatpush3.bf16.msra.mxu0 %v1515_v31  ;;  %6065 = vmatprep.mubr.msk.bf16.mxu0 %vm477_vm1, %v1219_v30  ;;  %v1251_v31 = vor.u32 %v1250_v55, %v1247_v54  ;;  %v1260_v30 = vor.u32 %v1259_v61, %v1256_v59  ;;  %v10184_v54 = vmov 0.0   ;;  %v7243_v55 = vld [vmem:[%s10171_s2 + $0x8] sm:$0xff]   ;;  %v335_v59 = vld [vmem:[%s7481_s15 + $0x64] sm:$0xf] }
  0xe5   : > { %7129 = vmatprep.subr.msk.bf16.mxu0 %vm514_vm0, %v5352_v63  ;;  %v1465_v63 = vsel %vm1454_vm5, %v1462_v5, %v1464_v11  ;;  %v1477_v3 = vsel %vm1454_vm5, %v1474_v36, %v1476_v46  ;;  %6241 = vmatprep.subr.bf16.mxu1 %v10184_v54  ;;  %2974 = vst [vmem:[#allocation2] sm:$0x1] %v10184_v54  ;;  %2975 = vst [vmem:[#allocation2 + $0xb5] sm:$0xff] %v10184_v54  ;;  %v336_v61 = vld [vmem:[%s7481_s15 + $0x68] sm:$0xf] }
  0xe6   : > { %v1252_v32 = vsel %vm1204_vm4, %v1242_v47, %v1251_v31  ;;  %v1261_v62 = vsel %vm1204_vm4, %v1251_v31, %v1260_v30  ;;  %v1475_v47 = vsel %vm1454_vm5, %v1472_v8, %v1474_v36  ;;  %6242 = vmatpush3.bf16.msra.mxu1 %v7241_v26  ;;  %v7871_v31 = vcombine.low %v7726_v23, %v335_v59 }
  0xe7   : > { %6243 = vmatprep.subr.bf16.mxu1 %v10184_v54  ;;  %v1849_v23 = vrot.slane %v7515_v18, 3  ;;  %6257 = vmatprep.mubr.msk.bf16.mxu1 %vm10176_vm8, %v10184_v54 }
  0xea   : > { %6244 = vmatpush3.bf16.msra.mxu1 %v7243_v55 }
  0xeb   : > { %6066 = vmatmul.mubr.msk.bf16.gmra.mrb[4].mxu0 %vm477_vm1, %v1223_v6  ;;  %v1457_v6 = vsel %vm1454_vm5, %v1455_v1, %v1456_v2  ;;  %6245 = vmatprep.subr.bf16.mxu1 %v10184_v54 }
  0xec   : > { %6069 = vmatprep.mubr.msk.bf16.mxu0 %vm477_vm1, %v1227_v15  ;;  %v1459_v15 = vsel %vm1454_vm5, %v1456_v2, %v1458_v7  ;;  %v1846_v7 = vrot.slane %v7497_v10, 3  ;;  %v1857_v10 = vrot.slane %v7534_v29, 3  ;;  %v1865_v29 = vrot.slane %v7571_v44, 3 }
  0xed   : > { %v1872_v44 = vrot.slane %v7608_v60, 2  ;;  %v1881_v60 = vrot.slane %v1248_v43, 3 }
  0xf3   : > { %6070 = vmatmul.mubr.msk.bf16.gmra.mrb[8].mxu0 %vm477_vm1, %v1231_v21  ;;  %v1467_v21 = vsel %vm1454_vm5, %v1464_v11, %v1466_v20 }
  0xf4   : > { %6073 = vmatprep.mubr.msk.bf16.mxu0 %vm477_vm1, %v1235_v9  ;;  %v1471_v9 = vsel %vm1454_vm5, %v1468_v51, %v1470_v27 }
  0xfb   : > { %6074 = vmatmul.mubr.msk.bf16.gmra.mrb[12].mxu0 %vm477_vm1, %v1239_v52  ;;  %v5379_v52 = vld [vmem:[%s10170_s1 + $0x10] sm:$0x3] }
  0xfc   : > { %6077 = vmatprep.mubr.msk.bf16.mxu0 %vm477_vm1, %v1243_v58  ;;  %v7245_v58 = vld [vmem:[%s10171_s2 + $0x10] sm:$0xff]  }
  0xfd   : > { %6246 = vmatpush3.bf16.msra.mxu1 %v7245_v58 }
  0xfe   : > { %6247 = vmatprep.subr.bf16.mxu1 %v10184_v54 }
 0x103   : > { %6078 = vmatmul.mubr.msk.bf16.gmra.mrb[16].mxu0 %vm477_vm1, %v1252_v32  ;;  %v1674_v32 = vrot.slane %v7871_v31, 2 }
 0x104   : > { %6081 = vmatprep.mubr.msk.bf16.mxu0 %vm477_vm1, %v1261_v62 }
 0x105   : > { %v1675_v1 = vsel %vm1454_vm5, %v1474_v36, %v1674_v32  ;;  %v1876_v36 = vrot.slane %v7614_v0, 2  ;;  %v1888_v0 = vshll.u32 %v7871_v31, 16 }
 0x107   : > { %v1890_v43 = vrot.slane %v1888_v0, 3 }
 0x10b   : > { %6082 = vmatmul.mubr.msk.bf16.gmra.mrb[20].mxu0 %vm477_vm1, %v1260_v30  ;;  %v5351_v30 = vcombine.low %v336_v61, %v336_v61 }
 0x10c   : > { %6087 = vmatprep.mubr.msk.bf16.mxu0 %vm477_vm1, %v1457_v6  ;;  %v1845_v6 = vrot.slane %v7503_v12, 2  ;;  %v1856_v12 = vrot.slane %v7555_v38, 2  ;;  %v1864_v38 = vrot.slane %v7600_v56, 2 }
 0x10d   : > { %v1676_v62 = vrot.slane %v5351_v30, 2 }
 0x10e   : > { %v1858_v25 = vor.u32 %v1857_v10, %v1856_v12  ;;  %v1866_v51 = vor.u32 %v1865_v29, %v1864_v38  ;;  %v2103_v10 = vrot.slane %v7544_v33, 3  ;;  %v2107_v33 = vrot.slane %v7564_v41, 3 }
 0x10f   : > { %v1677_v2 = vsel %vm1454_vm5, %v1674_v32, %v1676_v62  ;;  %v2111_v38 = vrot.slane %v7574_v45, 3  ;;  %v2113_v29 = vrot.slane %v7729_v24, 3  ;;  %v7248_v45 = vld [vmem:[%s10171_s2 + $0x58] sm:$0xff]   ;;  %v7250_v24 = vld [vmem:[%s10171_s2 + $0x60] sm:$0xff]  }
 0x111   : > { %v2114_v41 = vsel %vm2095_vm7, %v2111_v38, %v2113_v29 }
 0x113   : > { %6088 = vmatmul.mubr.msk.bf16.vlgmr.msra.gmra.mrb[0].mxu0 %vm477_vm1, %v1459_v15 }
 0x114   : > { %6112 = vmatpush3.bf16.msra.mxu0 %v1688_v17  ;;  %6091 = vmatprep.mubr.msk.bf16.mxu0 %vm477_vm1, %v1461_v19  ;;  %v1850_v17 = vor.u32 %v1849_v23, %v1848_v14  ;;  %v7315_v23 = vld [vmem:[%s7481_s15 + $0x20] sm:$0xff]  }
 0x115   : > { %7130 = vmatprep.subr.msk.bf16.mxu0 %vm514_vm0, %v5366_v4  ;;  %v1853_v4 = vrot.slane %v7521_v22, 3  ;;  %v2156_v22 = vsel %vm514_vm0, %v5379_v52, 0 }
 0x11b   : > { %6092 = vmatmul.mubr.msk.bf16.gmra.mrb[4].mxu0 %vm477_vm1, %v1463_v13 }
 0x11c   : > { %6095 = vmatprep.mubr.msk.bf16.mxu0 %vm477_vm1, %v1465_v63 }
 0x123   : > { %6096 = vmatmul.mubr.msk.bf16.gmra.mrb[8].mxu0 %vm477_vm1, %v1467_v21 }
 0x124   : > { %6099 = vmatprep.mubr.msk.bf16.mxu0 %vm477_vm1, %v1469_v16 }
 0x12b   : > { %6100 = vmatmul.mubr.msk.bf16.gmra.mrb[12].mxu0 %vm477_vm1, %v1471_v9 }
 0x12c   : > { %6103 = vmatprep.mubr.msk.bf16.mxu0 %vm477_vm1, %v1473_v34 }
 0x133   : > { %6104 = vmatmul.mubr.msk.bf16.gmra.mrb[16].mxu0 %vm477_vm1, %v1475_v47 }
 0x134   : > { %6107 = vmatprep.mubr.msk.bf16.mxu0 %vm477_vm1, %v1477_v3  ;;  %v1885_v3 = vshrl.u32 %v7871_v31, 16 }
 0x136   : > { %v1887_v26 = vrot.slane %v1885_v3, 2 }
 0x13b   : > { %6108 = vmatmul.mubr.msk.bf16.gmra.mrb[20].mxu0 %vm477_vm1, %v1476_v46 }
 0x13c   : > { %6113 = vmatprep.mubr.msk.bf16.mxu0 %vm477_vm1, %v1459_v15  ;;  %v1847_v15 = vor.u32 %v1846_v7, %v1845_v6  ;;  %v7314_v6 = vld [vmem:[%s7481_s15 + $0x18] sm:$0xff]  }
 0x13d   : > { %v2097_v7 = vrot.slane %v7314_v6, 3 }
 0x13e   : > { %v1851_v5 = vsel %vm1844_vm6, %v1847_v15, %v1850_v17  ;;  %v2099_v15 = vrot.slane %v7315_v23, 3 }
 0x143   : > { %6114 = vmatmul.mubr.msk.bf16.vlgmr.msra.gmra.mrb[0].mxu0 %vm477_vm1, %v1461_v19  ;;  %v1852_v19 = vrot.slane %v7531_v28, 2  ;;  %v1861_v28 = vrot.slane %v7558_v39, 3 }
 0x144   : > { %6138 = vmatpush3.bf16.msra.mxu0 %v1939_v48  ;;  %6117 = vmatprep.mubr.msk.bf16.mxu0 %vm477_vm1, %v1463_v13  ;;  %v1860_v13 = vrot.slane %v7561_v40, 2  ;;  %v1868_v40 = vrot.slane %v7603_v57, 2  ;;  %v1877_v57 = vrot.slane %v7595_v53, 3 }
 0x145   : > { %7131 = vmatprep.subr.msk.bf16.mxu0 %vm514_vm0, %v5379_v52  ;;  %v1854_v18 = vor.u32 %v1853_v4, %v1852_v19  ;;  %v2100_v4 = vsel %vm2095_vm7, %v2097_v7, %v2099_v15 }
 0x146   : > { %v1862_v20 = vor.u32 %v1861_v28, %v1860_v13  ;;  %v7246_v13 = vld [vmem:[%s10171_s2 + $0x50] sm:$0xff]  }
 0x147   : > { %v1855_v11 = vsel %vm1844_vm6, %v1850_v17, %v1854_v18  ;;  %v7316_v17 = vld [vmem:[%s7481_s15 + $0x28] sm:$0xff]  }
 0x148   : > { %v1863_v39 = vsel %vm1844_vm6, %v1858_v25, %v1862_v20  ;;  %v1867_v56 = vsel %vm1844_vm6, %v1862_v20, %v1866_v51  ;;  %v2101_v19 = vrot.slane %v7316_v17, 3 }
 0x14a   : > { %v2102_v12 = vsel %vm2095_vm7, %v2099_v15, %v2101_v19 }
 0x14b   : > { %6118 = vmatmul.mubr.msk.bf16.gmra.mrb[4].mxu0 %vm477_vm1, %v1465_v63  ;;  %v1859_v63 = vsel %vm1844_vm6, %v1854_v18, %v1858_v25  ;;  %v7244_v18 = vld [vmem:[%s10171_s2 + $0x48] sm:$0xff]   ;;  %v2105_v25 = vrot.slane %v7549_v35, 3  ;;  %v2109_v35 = vrot.slane %v7567_v42, 3  ;;  %v2115_v42 = vrot.slane %v7871_v31, 3  ;;  %v7247_v31 = vld [vmem:[%s10171_s2 + $0x18] sm:$0xff]  }
 0x14c   : > { %6121 = vmatprep.mubr.msk.bf16.mxu0 %vm477_vm1, %v1467_v21  ;;  %v1869_v21 = vrot.slane %v7583_v49, 3  ;;  %6248 = vmatpush3.bf16.msra.mxu1 %v7247_v31 }
 0x14d   : > { %v2106_v28 = vsel %vm2095_vm7, %v2103_v10, %v2105_v25  ;;  %v2112_v20 = vsel %vm2095_vm7, %v2109_v35, %v2111_v38  ;;  %6249 = vmatprep.subr.bf16.mxu1 %v10184_v54 }
 0x14e   : > { %v1870_v27 = vor.u32 %v1869_v21, %v1868_v40  ;;  %v7252_v21 = vld [vmem:[%s10171_s2 + $0x68] sm:$0xff]  }
 0x153   : > { %6122 = vmatmul.mubr.msk.bf16.gmra.mrb[8].mxu0 %vm477_vm1, %v1469_v16  ;;  %v1873_v16 = vrot.slane %v7586_v50, 3  ;;  %v1880_v50 = vrot.slane %v1245_v37, 2 }
 0x154   : > { %6125 = vmatprep.mubr.msk.bf16.mxu0 %vm477_vm1, %v1471_v9  ;;  %v337_v9 = vld [vmem:[%s7481_s15 + $0x6c] sm:$0xf] }
 0x155   : > { %v1874_v8 = vor.u32 %v1873_v16, %v1872_v44  ;;  %v7913_v49 = vcombine.low %v336_v61, %v337_v9  ;;  %v1882_v53 = vor.u32 %v1881_v60, %v1880_v50  ;;  %v1891_v61 = vor.u32 %v1890_v43, %v1887_v26  ;;  %v7254_v44 = vld [vmem:[%s10171_s2 + $0x70] sm:$0xff]   ;;  %v7251_v16 = vld [vmem:[%s10171_s2 + $0x28] sm:$0xff]   ;;  %v7255_v9 = vld [vmem:[%s10171_s2 + $0x38] sm:$0xff]  }
 0x157   : > { %v1875_v46 = vsel %vm1844_vm6, %v1870_v27, %v1874_v8  ;;  %v1894_v48 = vshrl.u32 %v7913_v49, 16  ;;  %v1897_v52 = vshll.u32 %v7913_v49, 16  ;;  %v1892_v32 = vsel %vm1844_vm6, %v1882_v53, %v1891_v61 }
 0x159   : > { %v1896_v58 = vrot.slane %v1894_v48, 2  ;;  %v1899_v59 = vrot.slane %v1897_v52, 3 }
 0x15b   : > { %6126 = vmatmul.mubr.msk.bf16.gmra.mrb[12].mxu0 %vm477_vm1, %v1473_v34  ;;  %v1871_v34 = vsel %vm1844_vm6, %v1866_v51, %v1870_v27  ;;  %v1900_v30 = vor.u32 %v1899_v59, %v1896_v58  ;;  %v2117_v51 = vrot.slane %v7913_v49, 3  ;;  %v7256_v27 = vld [vmem:[%s10171_s2 + $0x78] sm:$0xff]  }
 0x15c   : > { %6129 = vmatprep.mubr.msk.bf16.mxu0 %vm477_vm1, %v1475_v47  ;;  %v1878_v47 = vor.u32 %v1877_v57, %v1876_v36 }
 0x15d   : > { %v2118_v40 = vsel %vm2095_vm7, %v2115_v42, %v2117_v51 }
 0x15e   : > { %v1879_v37 = vsel %vm1844_vm6, %v1874_v8, %v1878_v47  ;;  %v1883_v55 = vsel %vm1844_vm6, %v1878_v47, %v1882_v53  ;;  %v7253_v8 = vld [vmem:[%s10171_s2 + $0x30] sm:$0xff]  }
 0x163   : > { %6130 = vmatmul.mubr.msk.bf16.gmra.mrb[16].mxu0 %vm477_vm1, %v1675_v1  ;;  %v7313_v1 = vld [vmem:[%s7481_s15 + $0x10] sm:$0xff]   ;;  %s7134_s15 = smul.u32 18, %s7473_s8 }
 0x164   : > { %6133 = vmatprep.mubr.msk.bf16.mxu0 %vm477_vm1, %v1677_v2  ;;  %v2096_v2 = vrot.slane %v7313_v1, 3 }
 0x165   : > { %s298_s10 = sadd.s32 %s7135_s9, %s7134_s15 }
 0x166   : > { %v2098_v14 = vsel %vm2095_vm7, %v2096_v2, %v2097_v7  ;;  %s5256_s11 = sshll.u32 %s298_s10, 2 }
 0x16b   : > { %6134 = vmatmul.mubr.msk.bf16.gmra.mrb[20].mxu0 %vm477_vm1, %v1676_v62  ;;  %v1901_v62 = vsel %vm1844_vm6, %v1891_v61, %v1900_v30 }
 0x16c   : > { %6139 = vmatprep.mubr.msk.bf16.mxu0 %vm477_vm1, %v1851_v5  ;;  %v7242_v5 = vld [vmem:[%s10171_s2 + $0x40] sm:$0xff]  }
 0x173   : > { %6140 = vmatmul.mubr.msk.bf16.vlgmr.msra.gmra.mrb[0].mxu0 %vm477_vm1, %v1855_v11  ;;  %v2104_v11 = vsel %vm2095_vm7, %v2101_v19, %v2103_v10 }
 0x174   : > { %6164 = vmatpush3.bf16.msra.mxu0 %v2156_v22  ;;  %6143 = vmatprep.mubr.msk.bf16.mxu0 %vm477_vm1, %v1859_v63  ;;  %v2108_v22 = vsel %vm2095_vm7, %v2105_v25, %v2107_v33  ;;  %v2110_v63 = vsel %vm2095_vm7, %v2107_v33, %v2109_v35 }
 0x175   : > { %6189 = vmatprep.subr.bf16.mxu0 %v10184_v54 }
 0x17b   : > { %6144 = vmatmul.mubr.msk.bf16.gmra.mrb[4].mxu0 %vm477_vm1, %v1863_v39  ;;  %v2116_v39 = vsel %vm2095_vm7, %v2113_v29, %v2115_v42 }
 0x17c   : > { %6147 = vmatprep.mubr.msk.bf16.mxu0 %vm477_vm1, %v1867_v56  ;;  %v7249_v56 = vld [vmem:[%s10171_s2 + $0x20] sm:$0xff]  }
 0x17d   : > { %6250 = vmatpush3.bf16.msra.mxu1 %v7249_v56 }
 0x17e   : > { %6251 = vmatprep.subr.bf16.mxu1 %v10184_v54 }
 0x181   : > { %6252 = vmatpush3.bf16.msra.mxu1 %v7251_v16 }
 0x182   : > { %6253 = vmatprep.subr.bf16.mxu1 %v10184_v54 }
 0x183   : > { %6148 = vmatmul.mubr.msk.bf16.gmra.mrb[8].mxu0 %vm477_vm1, %v1871_v34  ;;  %v2392_v34 = vlaneseq }
 0x184   : > { %6151 = vmatprep.mubr.msk.bf16.mxu0 %vm477_vm1, %v1875_v46 }
 0x185   : > { %6254 = vmatpush3.bf16.msra.mxu1 %v7253_v8  ;;  %v8026_v36 = vshrl.u32 %v2392_v34, 7 }
 0x186   : > { %6255 = vmatprep.subr.bf16.mxu1 %v10184_v54 }
 0x187   : > { %v8029_v57 = vadd.s32 16, %v8026_v36  ;;  %v8036_v50 = vmul.u32.u64.low 3817748708, %v8026_v36  ;;  %v8037_v60 = vmul.u32.u64.high 3817748708, %v8026_v36, %v8036_v50  ;;  %v8040_v47 = vadd.s32 24, %v8026_v36 }
 0x188   : > { %v8048_v48 = vadd.s32 8, %v8026_v36  ;;  %v8052_v26 = vadd.s32 48, %v8026_v36  ;;  %v8059_v58 = vadd.s32 32, %v8026_v36  ;;  %v8071_v1 = vadd.s32 56, %v8026_v36 }
 0x189   : > { %6256 = vmatpush3.bf16.msra.mxu1 %v7255_v9  ;;  %v8032_v49 = vmul.u32.u64.low 3817748708, %v8029_v57  ;;  %v8033_v46 = vmul.u32.u64.high 3817748708, %v8029_v57, %v8032_v49  ;;  %v8043_v3 = vmul.u32.u64.low 3817748708, %v8040_v47  ;;  %v8044_v0 = vmul.u32.u64.high 3817748708, %v8040_v47, %v8043_v3 }
 0x18a   : > { %6293 = vmatprep.subr.bf16.mxu1 %v10184_v54  ;;  %v2497_v52 = vshrl.u32 %v8037_v60, 4  ;;  %v8075_v2 = vmul.u32.u64.low 3817748708, %v8059_v58  ;;  %v8076_v6 = vmul.u32.u64.high 3817748708, %v8059_v58, %v8075_v2  ;;  %v8084_v23 = vadd.s32 40, %v8026_v36 }
 0x18b   : > { %6152 = vmatmul.mubr.msk.bf16.gmra.mrb[12].mxu0 %vm477_vm1, %v1879_v37  ;;  %v2519_v53 = vshrl.u32 %v8033_v46, 4  ;;  %v2530_v61 = vshrl.u32 %v8044_v0, 4  ;;  %v8088_v17 = vmul.u32.u64.low 3817748708, %v8071_v1  ;;  %v8089_v19 = vmul.u32.u64.high 3817748708, %v8071_v1, %v8088_v17 }
 0x18c   : > { %6155 = vmatprep.mubr.msk.bf16.mxu0 %vm477_vm1, %v1883_v55  ;;  %v8055_v43 = vmul.u32.u64.low 3817748708, %v8048_v48  ;;  %v8056_v55 = vmul.u32.u64.high 3817748708, %v8048_v48, %v8055_v43  ;;  %v2498_v59 = vmul.u32 18, %v2497_v52  ;;  %v8104_v10 = vadd.s32 80, %v8026_v36 }
 0x18d   : > { %v2520_v37 = vmul.u32 18, %v2519_v53  ;;  %v8117_v35 = vadd.s32 88, %v8026_v36  ;;  %v2541_v29 = vshrl.u32 %v8076_v6, 4  ;;  %v2574_v31 = vshrl.u32 %v8089_v19, 4 }
 0x18e   : > { %v8079_v7 = vsub.s32 %v8026_v36, %v2498_v59  ;;  %v2508_v15 = vshrl.u32 %v8056_v55, 4  ;;  %v8166_v9 = vadd.s32 120, %v8026_v36  ;;  %v8174_v46 = vadd.s32 104, %v8026_v36 }
 0x18f   : > { %v2542_v8 = vmul.u32 18, %v2541_v29  ;;  %v2575_v52 = vmul.u32 18, %v2574_v31  ;;  %v8266_v31 = vadd.s32 144, %v8026_v36 }
 0x190   : > { %vm2744_vm12 = vcmp.ne.s32.totalorder %v8079_v7, 0  ;;  %vm2767_vm13 = vcmp.lt.s32.totalorder %v8079_v7, 0  ;;  %v2509_v33 = vmul.u32 18, %v2508_v15  ;;  %v8126_v38 = vadd.s32 18, %v8079_v7 }
 0x191   : > { %vm8131_vm14 = vmand %vm2767_vm13, %vm2744_vm12  ;;  %v8191_v55 = vsub.s32 %v8059_v58, %v2542_v8  ;;  %v8212_v2 = vmul.u32.u64.low 3817748708, %v8174_v46  ;;  %v8213_v6 = vmul.u32.u64.high 3817748708, %v8174_v46, %v8212_v2  ;;  %v8227_v17 = vsub.s32 %v8071_v1, %v2575_v52 }
 0x192   : > { %v2836_v16 = vsel %vm8131_vm14, %v8126_v38, %v8079_v7  ;;  %v10283_v8 = vmov 0 }
 0x193   : > { %6156 = vmatmul.mubr.msk.bf16.gmra.mrb[16].mxu0 %vm477_vm1, %v1892_v32  ;;  %v8258_v29 = vadd.s32 18, %v8191_v55 }
 0x194   : > { %6159 = vmatprep.mubr.msk.bf16.mxu0 %vm477_vm1, %v1901_v62  ;;  %v8066_v32 = vmul.u32.u64.low 3817748708, %v8052_v26  ;;  %v8067_v62 = vmul.u32.u64.high 3817748708, %v8052_v26, %v8066_v32 }
 0x19b   : > { %6160 = vmatmul.mubr.msk.bf16.gmra.mrb[20].mxu0 %vm477_vm1, %v1900_v30  ;;  %v8063_v30 = vsub.s32 %v8029_v57, %v2520_v37 }
 0x19c   : > { %6165 = vmatprep.mubr.msk.bf16.mxu0 %vm477_vm1, %v2098_v14  ;;  %v2531_v14 = vmul.u32 18, %v2530_v61  ;;  %v8194_v59 = vmul.u32.u64.low 3817748708, %v8166_v9  ;;  %v8195_v61 = vmul.u32.u64.high 3817748708, %v8166_v9, %v8194_v59 }
 0x19d   : > { %vm2746_vm9 = vcmp.ne.s32.totalorder %v8063_v30, 0  ;;  %vm2769_vm10 = vcmp.lt.s32.totalorder %v8063_v30, 0 }
 0x19e   : > { %vm8094_vm11 = vmand %vm2769_vm10, %vm2746_vm9 }
 0x1a3   : > { %6166 = vmatmul.mubr.msk.bf16.vlgmr.msra.gmra.mrb[0].mxu0 %vm477_vm1, %v2100_v4  ;;  %v8092_v4 = vadd.s32 18, %v8063_v30 }
 0x1a4   : > { %6169 = vmatprep.mubr.msk.bf16.mxu0 %vm477_vm1, %v2102_v12  ;;  %6190 = vmatpush3.bf16.msra.mxu0 %v7242_v5  ;;  %v8101_v12 = vsub.s32 %v8040_v47, %v2531_v14  ;;  %v10288_v5 = vmov 0 }
 0x1a5   : > { %6191 = vmatprep.subr.bf16.mxu0 %v10184_v54 }
 0x1a6   : > { %vm2747_vm15 = vcmp.ne.s32.totalorder %v8101_v12, 0  ;;  %vm2770_vm0 = vcmp.lt.s32.totalorder %v8101_v12, 0  ;;  %v2816_v53 = vadd.s32 18, %v8101_v12 }
 0x1a7   : > { %vm8205_vm4 = vmand %vm2770_vm0, %vm2747_vm15 }
 0x1a8   : > { %6192 = vmatpush3.bf16.msra.mxu0 %v7244_v18  ;;  %v2563_v18 = vshrl.u32 %v8067_v62, 4 }
 0x1a9   : > { %6193 = vmatprep.subr.bf16.mxu0 %v10184_v54 }
 0x1ab   : > { %6170 = vmatmul.mubr.msk.bf16.gmra.mrb[4].mxu0 %vm477_vm1, %v2104_v11  ;;  %v8108_v25 = vmul.u32.u64.low 3817748708, %v8084_v23  ;;  %v8109_v11 = vmul.u32.u64.high 3817748708, %v8084_v23, %v8108_v25 }
 0x1ac   : > { %6173 = vmatprep.mubr.msk.bf16.mxu0 %vm477_vm1, %v2106_v28  ;;  %6194 = vmatpush3.bf16.msra.mxu0 %v7246_v13  ;;  %v8112_v13 = vadd.s32 64, %v8026_v36  ;;  %v8114_v28 = vstv %s2417_s14  ;;  %s10078_s14 = scalar_lea.vmem %s10174_s5, %s5256_s11 }
 0x1ad   : > { %6195 = vmatprep.subr.bf16.mxu0 %v10184_v54  ;;  %v2552_v60 = vshrl.u32 %v8109_v11, 4  ;;  %vm2423_vm2 = vcmp.ge.s32.totalorder %v8029_v57, %v8114_v28  ;;  %vm2421_vm6 = vcmp.ge.s32.totalorder %v8026_v36, %v8114_v28  ;;  %vm2424_vm12 = vcmp.ge.s32.totalorder %v8040_v47, %v8114_v28 }
 0x1af   : > { %v2553_v14 = vmul.u32 18, %v2552_v60  ;;  %v2640_v60 = vshrl.u32 %v8213_v6, 4  ;;  %v10301_v6 = vmov 0 }
 0x1b0   : > { %6196 = vmatpush3.bf16.msra.mxu0 %v7248_v45 }
 0x1b1   : > { %6197 = vmatprep.subr.bf16.mxu0 %v10184_v54  ;;  %v2641_v2 = vmul.u32 18, %v2640_v60  ;;  %v8527_v60 = vld [vmem:[%s10172_s3] ss:$0 sm:$0xff] }
 0x1b3   : > { %6174 = vmatmul.mubr.msk.bf16.gmra.mrb[8].mxu0 %vm477_vm1, %v2108_v22  ;;  %v8119_v22 = vstv %s2419_s21  ;;  %s5257_s21 = sshll.u32 %s10674_s22, 1 }
 0x1b4   : > { %6177 = vmatprep.mubr.msk.bf16.mxu0 %vm477_vm1, %v2110_v63  ;;  %6198 = vmatpush3.bf16.msra.mxu0 %v7250_v24  ;;  %v2838_v63 = vsel %vm8094_vm11, %v8092_v4, %v8063_v30  ;;  %v8148_v24 = vadd.s32 112, %v8026_v36  ;;  %vm2447_vm3 = vcmp.lt.s32.totalorder %v8029_v57, %v8119_v22  ;;  %vm2445_vm7 = vcmp.lt.s32.totalorder %v8026_v36, %v8119_v22  ;;  %s306_s16 = sadd.s32 %s5257_s21, %s7473_s8 }
 0x1b5   : > { %6199 = vmatprep.subr.bf16.mxu0 %v10184_v54  ;;  %vm2448_vm13 = vcmp.lt.s32.totalorder %v8040_v47, %v8119_v22  ;;  %vm2446_vm15 = vcmp.lt.s32.totalorder %v8048_v48, %v8119_v22  ;;  %v2662_v4 = vshrl.u32 %v8195_v61, 4  ;;  %v8356_v61 = vadd.s32 128, %v8026_v36  ;;  %s5258_s17 = sshll.u32 %s306_s16, 1 }
 0x1b6   : > { %v8181_v3 = vmul.u32.u64.low 3817748708, %v8148_v24  ;;  %v8182_v0 = vmul.u32.u64.high 3817748708, %v8148_v24, %v8181_v3  ;;  %v10306_v47 = vmov 0  ;;  %v10329_v30 = vmov 0  ;;  %s308_s20 = scalar_lea.vmem %s10175_s6, %s5258_s17 }
 0x1b7   : > { %v10291_v3 = vmov 0  ;;  %v2663_v59 = vmul.u32 18, %v2662_v4  ;;  %v10334_v4 = vmov 0 }
 0x1b8   : > { %6200 = vmatpush3.bf16.msra.mxu0 %v7252_v21  ;;  %v8152_v21 = vmul.u32.u64.low 3817748708, %v8117_v35  ;;  %v8153_v56 = vmul.u32.u64.high 3817748708, %v8117_v35, %v8152_v21 }
 0x1b9   : > { %6201 = vmatprep.subr.bf16.mxu0 %v10184_v54 }
 0x1ba   : > { %v2618_v19 = vshrl.u32 %v8153_v56, 4 }
 0x1bb   : > { %6178 = vmatmul.mubr.msk.bf16.gmra.mrb[12].mxu0 %vm477_vm1, %v2112_v20 }
 0x1bc   : > { %6181 = vmatprep.mubr.msk.bf16.mxu0 %vm477_vm1, %v2114_v41  ;;  %6202 = vmatpush3.bf16.msra.mxu0 %v7254_v44  ;;  %v8137_v41 = vmul.u32.u64.low 3817748708, %v8104_v10  ;;  %v8138_v42 = vmul.u32.u64.high 3817748708, %v8104_v10, %v8137_v41  ;;  %v8156_v44 = vadd.s32 96, %v8026_v36  ;;  %v2619_v21 = vmul.u32 18, %v2618_v19 }
 0x1bd   : > { %6203 = vmatprep.subr.bf16.mxu0 %v10184_v54 }
 0x1be   : > { %v8186_v37 = vmul.u32.u64.low 3817748708, %v8156_v44  ;;  %v8187_v43 = vmul.u32.u64.high 3817748708, %v8156_v44, %v8186_v37  ;;  %v2607_v62 = vshrl.u32 %v8138_v42, 4  ;;  %v8339_v52 = vsub.s32 %v8117_v35, %v2619_v21 }
 0x1c0   : > { %6204 = vmatpush3.bf16.msra.mxu0 %v7256_v27  ;;  %v8163_v27 = vsub.s32 %v8048_v48, %v2509_v33  ;;  %v2608_v41 = vmul.u32 18, %v2607_v62  ;;  %v2629_v56 = vshrl.u32 %v8187_v43, 4  ;;  %v10296_v43 = vmov 0 }
 0x1c1   : > { %6605 = vmatprep.subr.bf16.mxu0 %v10184_v54 }
 0x1c2   : > { %vm2768_vm5 = vcmp.lt.s32.totalorder %v8163_v27, 0  ;;  %v2814_v11 = vadd.s32 18, %v8163_v27  ;;  %v2630_v37 = vmul.u32 18, %v2629_v56 }
 0x1c3   : > { %6182 = vmatmul.mubr.msk.bf16.gmra.mrb[16].mxu0 %vm477_vm1, %v2116_v39  ;;  %v2564_v39 = vmul.u32 18, %v2563_v18  ;;  %v2839_v18 = vsel %vm8205_vm4, %v2816_v53, %v8101_v12 }
 0x1c4   : > { %6185 = vmatprep.mubr.msk.bf16.mxu0 %vm477_vm1, %v2118_v40  ;;  %v8144_v40 = vmul.u32.u64.low 3817748708, %v8112_v13  ;;  %v8145_v45 = vmul.u32.u64.high 3817748708, %v8112_v13, %v8144_v40  ;;  %v8416_v19 = vsub.s32 %v8156_v44, %v2630_v37 }
 0x1c5   : > { %v8177_v50 = vsub.s32 %v8052_v26, %v2564_v39  ;;  %v8262_v39 = vsub.s32 %v8084_v23, %v2553_v14 }
 0x1c6   : > { %v2585_v15 = vshrl.u32 %v8145_v45, 4  ;;  %v2651_v45 = vshrl.u32 %v8182_v0, 4  ;;  %v8567_v37 = vadd.s32 18, %v8416_v19 }
 0x1c7   : > { %vm2750_vm9 = vcmp.ne.s32.totalorder %v8177_v50, 0  ;;  %vm2773_vm10 = vcmp.lt.s32.totalorder %v8177_v50, 0  ;;  %v8245_v33 = vadd.s32 18, %v8177_v50 }
 0x1c8   : > { %vm8252_vm4 = vmand %vm2773_vm10, %vm2750_vm9  ;;  %v2586_v40 = vmul.u32 18, %v2585_v15  ;;  %vm2774_vm9 = vcmp.lt.s32.totalorder %v8227_v17, 0  ;;  %vm8276_vm10 = vcmp.lt.s32.totalorder %v2838_v63, 16  ;;  %v8308_v63 = vadd.s32 18, %v8227_v17 }
 0x1c9   : > { %v10284_v8 = vsel %vm8276_vm10, 4294967295, %v10283_v8  ;;  %v2652_v20 = vmul.u32 18, %v2651_v45  ;;  %v8473_v45 = vadd.s32 18, %v8339_v52 }
 0x1ca   : > { %10285 = vst [vmem:[#allocation3_spill] sm:$0xff] %v10284_v8  ;;  %v8327_v38 = vsub.s32 %v8112_v13, %v2586_v40  ;;  %v8642_v40 = vadd.s32 176, %v8026_v36 }
 0x1cb   : > { %6186 = vmatmul.mubr.msk.bf16.gmra.mrb[20].mxu0 %vm477_vm1, %v2117_v51  ;;  %v8141_v51 = vadd.s32 72, %v8026_v36  ;;  %vm2745_vm1 = vcmp.ne.s32.totalorder %v8163_v27, 0  ;;  %v8396_v15 = vsub.s32 %v8148_v24, %v2652_v20  ;;  %v10338_v20 = vmov 0 }
 0x1cc   : > { %6205 = vmatprep.mubr.msk.bf16.mxu0 %vm10176_vm8, %v10184_v54  ;;  %vm8239_vm0 = vmand %vm2768_vm5, %vm2745_vm1  ;;  %vm2748_vm8 = vcmp.ne.s32.totalorder %v8191_v55, 0  ;;  %vm2771_vm1 = vcmp.lt.s32.totalorder %v8191_v55, 0  ;;  %vm2751_vm5 = vcmp.ne.s32.totalorder %v8227_v17, 0  ;;  %10362 = vst [vmem:[#allocation15_spill] sm:$0xff] %v8642_v40 }
 0x1cd   : > { %v8170_v34 = vmul.u32.u64.low 3817748708, %v8141_v51  ;;  %v8171_v49 = vmul.u32.u64.high 3817748708, %v8141_v51, %v8170_v34  ;;  %vm8293_vm11 = vmand %vm2771_vm1, %vm2748_vm8  ;;  %vm8314_vm8 = vcmp.lt.s32.totalorder %v2839_v18, 16  ;;  %10304 = vst [vmem:[#allocation8_spill] sm:$0xff] %v8396_v15  ;;  %v8431_v18 = vsub.s32 %v8166_v9, %v2663_v59 }
 0x1ce   : > { %v2837_v34 = vsel %vm8239_vm0, %v2814_v11, %v8163_v27  ;;  %vm8303_vm0 = vcmp.lt.s32.totalorder %v2836_v16, 16  ;;  %v8311_v27 = vsub.s32 %v8104_v10, %v2608_v41  ;;  %v10292_v3 = vsel %vm8314_vm8, 4294967295, %v10291_v3  ;;  %vm8322_vm14 = vmand %vm2774_vm9, %vm2751_vm5 }
 0x1cf   : > { %v2596_v42 = vshrl.u32 %v8171_v49, 4  ;;  %v2842_v49 = vsel %vm8252_vm4, %v8245_v33, %v8177_v50  ;;  %v10289_v5 = vsel %vm8303_vm0, 4294967295, %v10288_v5  ;;  %10293 = vst [vmem:[#allocation5_spill] sm:$0xff] %v10292_v3  ;;  %v2840_v53 = vsel %vm8293_vm11, %v8258_v29, %v8191_v55  ;;  %vm8347_vm1 = vmand %vm2423_vm2, %vm2447_vm3 }
 0x1d0   : > { %10290 = vst [vmem:[#allocation4_spill] sm:$0xff] %v10289_v5  ;;  %v8330_v16 = vmul.u32.u64.low 3817748708, %v8266_v31  ;;  %v8331_v0 = vmul.u32.u64.high 3817748708, %v8266_v31, %v8330_v16  ;;  %vm2749_vm4 = vcmp.ne.s32.totalorder %v8262_v39, 0  ;;  %v10297_v43 = vsel %vm8347_vm1, 4294967295, %v10296_v43  ;;  %vm8364_vm9 = vmand %vm2421_vm6, %vm2445_vm7 }
 0x1d1   : > { %v2597_v50 = vmul.u32 18, %v2596_v42  ;;  %10298 = vst [vmem:[#allocation6_spill] sm:$0xff] %v10297_v43  ;;  %vm2772_vm5 = vcmp.lt.s32.totalorder %v8262_v39, 0  ;;  %v8353_v55 = vadd.s32 18, %v8262_v39  ;;  %v2843_v32 = vsel %vm8322_vm14, %v8308_v63, %v8227_v17  ;;  %vm8382_vm3 = vmand %vm2424_vm12, %vm2448_vm13  ;;  %v10478_v5 = vld [vmem:[#allocation3_spill] sm:$0xff] }
 0x1d2   : > { %v10302_v6 = vsel %vm8382_vm3, 4294967295, %v10301_v6  ;;  %v8392_v14 = vadd.s32 18, %v8311_v27  ;;  %vm10305_vm12 = vcmp.ge.s32.totalorder %v8048_v48, %v8114_v28  ;;  %vm8408_vm6 = vcmp.lt.s32.totalorder %v2837_v34, 16 }
 0x1d3   : > { %v8374_v62 = vsub.s32 %v8141_v51, %v2597_v50  ;;  %10303 = vst [vmem:[#allocation7_spill] sm:$0xff] %v10302_v6  ;;  %vm8404_vm13 = vmand %vm10305_vm12, %vm2446_vm15  ;;  %v10308_v17 = vmov 0  ;;  %v8434_v25 = vmul.u32.u64.low 3817748708, %v8356_v61  ;;  %v8435_v11 = vmul.u32.u64.high 3817748708, %v8356_v61, %v8434_v25 }
 0x1d4   : > { %v10307_v47 = vsel %vm8404_vm13, 4294967295, %v10306_v47  ;;  %v10309_v17 = vsel %vm8408_vm6, 4294967295, %v10308_v17  ;;  %vm8426_vm12 = vmand %vm2772_vm5, %vm2749_vm4  ;;  %v8438_v33 = vadd.s32 152, %v8026_v36  ;;  %vm10313_vm4 = vcmp.ne.s32.totalorder %v8311_v27, 0 }
 0x1d5   : > { %10310 = vst [vmem:[#allocation9_spill] sm:$0xff] %v10309_v17  ;;  %vm10314_vm5 = vcmp.lt.s32.totalorder %v8311_v27, 0  ;;  %v8453_v29 = vadd.s32 18, %v8327_v38  ;;  %v8458_v41 = vsub.s32 %v8174_v46, %v2641_v2  ;;  %vm8460_vm2 = vcmp.lt.s32.totalorder %v2842_v49, 16 }
 0x1d6   : > { %vm8448_vm11 = vmand %vm10314_vm5, %vm10313_vm4  ;;  %v10318_v42 = vmov 0  ;;  %vm10320_vm15 = vcmp.ne.s32.totalorder %v8327_v38, 0  ;;  %vm10321_vm4 = vcmp.lt.s32.totalorder %v8327_v38, 0  ;;  %v2695_v21 = vshrl.u32 %v8331_v0, 4 }
 0x1d7   : > { %10317 = vst [vmem:[#allocation10_spill] sm:$0xff] %v8458_v41  ;;  %v10319_v42 = vsel %vm8460_vm2, 4294967295, %v10318_v42  ;;  %vm8468_vm5 = vmand %vm10321_vm4, %vm10320_vm15  ;;  %vm10324_vm13 = vcmp.ne.s32.totalorder %v8339_v52, 0  ;;  %vm10325_vm6 = vcmp.lt.s32.totalorder %v8339_v52, 0  ;;  %v8495_v34 = vadd.s32 18, %v8374_v62 }
 0x1d8   : > { %vm8490_vm7 = vmand %vm10325_vm6, %vm10324_vm13  ;;  %v8498_v49 = vadd.s32 18, %v8396_v15  ;;  %vm8506_vm14 = vcmp.lt.s32.totalorder %v2840_v53, 16  ;;  %vm10332_vm6 = vcmp.ne.s32.totalorder %v8374_v62, 0  ;;  %vm10333_vm13 = vcmp.lt.s32.totalorder %v8374_v62, 0 }
 0x1d9   : > { %v10330_v30 = vsel %vm8506_vm14, 4294967295, %v10329_v30  ;;  %vm8514_vm10 = vmand %vm10333_vm13, %vm10332_vm6  ;;  %v8521_v63 = vmul.u32.u64.low 3817748708, %v8438_v33  ;;  %v8522_v50 = vmul.u32.u64.high 3817748708, %v8438_v33, %v8521_v63  ;;  %v2841_v7 = vsel %vm8426_vm12, %v8353_v55, %v8262_v39 }
 0x1da   : > { %10328 = vst [vmem:[#allocation11_spill] sm:$0xff] %v8498_v49  ;;  %10331 = vst [vmem:[#allocation12_spill] sm:$0xff] %v10330_v30  ;;  %v10335_v4 = vsel %vm8514_vm10, 4294967295, %v10334_v4  ;;  %vm10336_vm13 = vcmp.ne.s32.totalorder %v8396_v15, 0  ;;  %vm10337_vm4 = vcmp.lt.s32.totalorder %v8396_v15, 0  ;;  %v8548_v16 = vadd.s32 136, %v8026_v36 }
 0x1db   : > { %vm8541_vm15 = vmand %vm10337_vm4, %vm10336_vm13  ;;  %vm8550_vm6 = vcmp.lt.s32.totalorder %v2843_v32, 16  ;;  %v10341_v0 = vmov 0  ;;  %v2846_v39 = vsel %vm8448_vm11, %v8392_v14, %v8311_v27  ;;  %vm10343_vm12 = vcmp.ne.s32.totalorder %v8416_v19, 0  ;;  %v8572_v32 = vld [vmem:[%s10173_s4] ss:$0 sm:$0xff] }
 0x1dc   : > { %v10339_v20 = vsel %vm8541_vm15, 4294967295, %v10338_v20  ;;  %10340 = vst [vmem:[#allocation13_spill] sm:$0xff] %v8548_v16  ;;  %v10342_v0 = vsel %vm8550_vm6, 4294967295, %v10341_v0  ;;  %vm10344_vm4 = vcmp.lt.s32.totalorder %v8416_v19, 0  ;;  %v10345_v53 = vmov 0 }
 0x1dd   : > { %vm8562_vm13 = vmand %vm10344_vm4, %vm10343_vm12  ;;  %v2696_v55 = vmul.u32 18, %v2695_v21  ;;  %v2844_v27 = vsel %vm8468_vm5, %v8453_v29, %v8327_v38  ;;  %vm10347_vm12 = vcmp.ne.s32.totalorder %v8431_v18, 0  ;;  %vm10348_vm4 = vcmp.lt.s32.totalorder %v8431_v18, 0 }
 0x1de   : > { %v10346_v53 = vsel %vm8562_vm13, 4294967295, %v10345_v53  ;;  %vm8590_vm2 = vmand %vm10348_vm4, %vm10347_vm12  ;;  %v10349_v14 = vmov 0  ;;  %v8595_v48 = vadd.s32 18, %v8431_v18  ;;  %v8598_v25 = vadd.s32 18, %v8458_v41 }
 0x1df   : > { %v10350_v14 = vsel %vm8590_vm2, 4294967295, %v10349_v14  ;;  %vm8601_vm5 = vcmp.lt.s32.totalorder %v2841_v7, 16  ;;  %v10351_v29 = vmov 0  ;;  %vm10354_vm12 = vcmp.ne.s32.totalorder %v8458_v41, 0 }
 0x1e0   : > { %v10352_v29 = vsel %vm8601_vm5, 4294967295, %v10351_v29  ;;  %vm10355_vm4 = vcmp.lt.s32.totalorder %v8458_v41, 0  ;;  %v10356_v63 = vmov 0  ;;  %v2673_v7 = vshrl.u32 %v8435_v11, 4 }
 0x1e1   : > { %10353 = vst [vmem:[#allocation14_spill] sm:$0xff] %v10352_v29  ;;  %vm8617_vm11 = vmand %vm10355_vm4, %vm10354_vm12  ;;  %vm10358_vm14 = vcmp.lt.s32.totalorder %v8052_v26, %v8119_v22  ;;  %vm10359_vm10 = vcmp.ge.s32.totalorder %v8052_v26, %v8114_v28  ;;  %v10360_v21 = vmov 0  ;;  %vm10366_vm12 = vcmp.lt.s32.totalorder %v8059_v58, %v8119_v22 }
 0x1e2   : > { %v10357_v63 = vsel %vm8617_vm11, 4294967295, %v10356_v63  ;;  %vm8629_vm15 = vmand %vm10359_vm10, %vm10358_vm14  ;;  %vm10367_vm4 = vcmp.ge.s32.totalorder %v8059_v58, %v8114_v28  ;;  %v10368_v49 = vmov 0  ;;  %vm8677_vm10 = vcmp.lt.s32.totalorder %v2846_v39, 16 }
 0x1e3   : > { %v10361_v21 = vsel %vm8629_vm15, 4294967295, %v10360_v21  ;;  %vm8673_vm5 = vmand %vm10367_vm4, %vm10366_vm12  ;;  %vm10373_vm12 = vcmp.lt.s32.totalorder %v8071_v1, %v8119_v22  ;;  %vm10374_vm4 = vcmp.ge.s32.totalorder %v8071_v1, %v8114_v28  ;;  %v10375_v39 = vmov 0 }
 0x1e4   : > { %v10369_v49 = vsel %vm8673_vm5, 4294967295, %v10368_v49  ;;  %vm8699_vm13 = vmand %vm10374_vm4, %vm10373_vm12  ;;  %vm10379_vm11 = vnez %v10284_v8  ;;  %vm10381_vm4 = vcmp.lt.s32.totalorder %v8084_v23, %v8119_v22  ;;  %vm10382_vm2 = vcmp.ge.s32.totalorder %v8084_v23, %v8114_v28 }
 0x1e5   : > { %v10376_v39 = vsel %vm8699_vm13, 4294967295, %v10375_v39  ;;  %vm10380_vm14 = vmand %vm8347_vm1, %vm10379_vm11  ;;  %v10383_v41 = vmov 0  ;;  %vm10394_vm15 = vnez %v10307_v47 }
 0x1e6   : > { %vm8736_vm12 = vmand %vm10382_vm2, %vm10381_vm4  ;;  %vm10386_vm2 = vnez %v10330_v30 }
 0x1e7   : > { %v10384_v41 = vsel %vm8736_vm12, 4294967295, %v10383_v41  ;;  %vm10385_vm1 = vmand %vm8364_vm9, %vm8303_vm0 }
 0x276   : > { %v6167_v59 = vpop.f32.mrb[0].mxu0 }
 0x277   : > { %v2318_v38 = vmul.f32 %v6167_v59, %v8527_v60  ;;  %v2192_v12 = vpop.f32.mrb[1].mxu0 }
 0x278   : > { %v2316_v59 = vmul.f32 %v8527_v60, %v2192_v12  ;;  %v6168_v54 = vpop.f32.mrb[2].mxu0  ;;  %v8638_v11 = vmul.u32.u64.low 3817748708, %v8548_v16  ;;  %v8639_v12 = vmul.u32.u64.high 3817748708, %v8548_v16, %v8638_v11 }
 0x279   : > { %v8645_v2 = vadd.f32 %v8572_v32, %v2318_v38  ;;  %v2319_v26 = vmul.f32 %v6168_v54, %v8527_v60  ;;  %v2195_v15 = vpop.f32.mrb[3].mxu0  ;;  %v8661_v11 = vsub.s32 %v8266_v31, %v2696_v55  ;;  %v10370_v38 = vmov 0 }
 0x27a   : > { %v8664_v54 = vadd.f32 %v8572_v32, %v2316_v59  ;;  %v2317_v16 = vmul.f32 %v8527_v60, %v2195_v15  ;;  %v10371_v38 = vsel %vm8677_vm10, 4294967295, %v10370_v38  ;;  %v2674_v15 = vmul.u32 18, %v2673_v7 }
 0x27b   : > { %10363 = vst [vmem:[#allocation16_spill] sm:$0xff] %v8645_v2  ;;  %v8691_v59 = vadd.f32 %v8572_v32, %v2319_v26  ;;  %v2706_v26 = vshrl.u32 %v8522_v50, 4  ;;  %v8719_v1 = vmul.u32.u64.low 3817748708, %v8642_v40  ;;  %v8720_v7 = vmul.u32.u64.high 3817748708, %v8642_v40, %v8719_v1 }
 0x27c   : > { %v2369_v55 = vmax.f32 %v8664_v54, 0.0  ;;  %v2347_v58 = vadd.f32 %v8572_v32, %v2317_v16  ;;  %v10378_v50 = vmax.f32 %v8645_v2, 0.0  ;;  %vm8755_vm10 = vcmp.lt.s32.totalorder %v2844_v27, 16 }
 0x27d   : > { %10372 = vst [vmem:[#allocation17_spill] sm:$0xff] %v8691_v59  ;;  %v10387_v54 = vmov 0  ;;  %v10389_v40 = vmax.f32 %v8691_v59, 0.0  ;;  %v10392_v59 = vmov 0  ;;  %v2684_v6 = vshrl.u32 %v8639_v12, 4 }
 0x27e   : > { %v2953_v16 = vsel %vm10380_vm14, %v10378_v50, 0.0  ;;  %v2951_v23 = vsel %vm10385_vm1, %v2369_v55, 0.0  ;;  %v2370_v1 = vmax.f32 %v2347_v58, 0.0  ;;  %v6171_v50 = vpop.f32.mrb[4].mxu0  ;;  %v10388_v54 = vsel %vm8755_vm10, 4294967295, %v10387_v54  ;;  %vm10390_vm1 = vmand %vm8382_vm3, %vm8314_vm8 }
 0x27f   : > { %2979 = vst [vmem:[#allocation2 + $0x11] sm:$0xff] %v2953_v16  ;;  %v8764_v16 = vadd.s32 18, %v8661_v11  ;;  %v8767_v58 = vadd.s32 160, %v8026_v36  ;;  %2977 = vst [vmem:[#allocation2 + $0x1] sm:$0xff] %v2951_v23  ;;  %v2954_v27 = vsel %vm10390_vm1, %v10389_v40, 0.0  ;;  %v2322_v2 = vmul.f32 %v6171_v50, %v8527_v60  ;;  %v2208_v8 = vpop.f32.mrb[5].mxu0 }
 0x280   : > { %v10391_v23 = vsel %vm8490_vm7, %v8473_v45, %v8339_v52  ;;  %v8795_v40 = vsub.s32 %v8356_v61, %v2674_v15  ;;  %v2707_v50 = vmul.u32 18, %v2706_v26  ;;  %2980 = vst [vmem:[#allocation2 + $0x19] sm:$0xff] %v2954_v27  ;;  %vm10395_vm14 = vnez %v10309_v17  ;;  %v6172_v56 = vpop.f32.mrb[6].mxu0  ;;  %v7262_v26 = vld [vmem:[%s10171_s2 + $0x200] sm:$0xff]  }
 0x281   : > { %vm8786_vm11 = vcmp.lt.s32.totalorder %v10391_v23, 16  ;;  %vm10396_vm7 = vmand %vm10394_vm15, %vm10395_vm14  ;;  %v2320_v45 = vmul.f32 %v8527_v60, %v2208_v8  ;;  %vm10397_vm8 = vcmp.ne.s32.totalorder %v8661_v11, 0  ;;  %vm10398_vm1 = vcmp.lt.s32.totalorder %v8661_v11, 0  ;;  %v2211_v3 = vpop.f32.mrb[7].mxu0 }
 0x282   : > { %v10393_v59 = vsel %vm8786_vm11, 4294967295, %v10392_v59  ;;  %v2952_v52 = vsel %vm10396_vm7, %v2370_v1, 0.0  ;;  %vm8807_vm3 = vmand %vm10398_vm1, %vm10397_vm8  ;;  %v8812_v15 = vadd.s32 168, %v8026_v36  ;;  %v8818_v27 = vadd.f32 %v8572_v32, %v2322_v2 }
 0x283   : > { %2978 = vst [vmem:[#allocation2 + $0x9] sm:$0xff] %v2952_v52  ;;  %v2323_v8 = vmul.f32 %v6172_v56, %v8527_v60  ;;  %vm10402_vm8 = vcmp.lt.s32.totalorder %v8104_v10, %v8119_v22  ;;  %vm10403_vm1 = vcmp.ge.s32.totalorder %v8104_v10, %v8114_v28  ;;  %v10404_v36 = vmov 0  ;;  %vm10417_vm4 = vmand %vm10394_vm15, %vm10395_vm14 }
 0x284   : > { %10401 = vst [vmem:[#allocation18_spill] sm:$0xff] %v8818_v27  ;;  %vm8827_vm7 = vmand %vm10403_vm1, %vm10402_vm8  ;;  %v8833_v52 = vadd.f32 %v8572_v32, %v2320_v45  ;;  %v2321_v2 = vmul.f32 %v8527_v60, %v2211_v3  ;;  %vm10407_vm10 = vnez %v10335_v4  ;;  %v10409_v56 = vmov 0 }
 0x285   : > { %v10405_v36 = vsel %vm8827_vm7, 4294967295, %v10404_v36  ;;  %v10408_v10 = vsel %vm10407_vm10, %v8495_v34, %v8374_v62  ;;  %v8850_v12 = vmul.u32.u64.low 3817748708, %v8767_v58  ;;  %v8851_v45 = vmul.u32.u64.high 3817748708, %v8767_v58, %v8850_v12 }
 0x286   : > { %vm8845_vm8 = vcmp.lt.s32.totalorder %v10408_v10, 16  ;;  %v10224_v3 = vmax.f32 %v8818_v27, 0.0  ;;  %v8855_v43 = vadd.f32 %v8572_v32, %v2323_v8  ;;  %vm10412_vm1 = vcmp.lt.s32.totalorder %v8112_v13, %v8119_v22 }
 0x287   : > { %v10410_v56 = vsel %vm8845_vm8, 4294967295, %v10409_v56  ;;  %vm10413_vm11 = vcmp.ge.s32.totalorder %v8112_v13, %v8114_v28  ;;  %v10414_v62 = vmov 0  ;;  %vm10416_vm8 = vmand %vm8364_vm9, %vm8303_vm0  ;;  %v7326_v34 = vpack.c.bf16 %v2370_v1, %v2369_v55  ;;  %v10423_v1 = vld [vmem:[#allocation11_spill] sm:$0xff] }
 0x288   : > { %10411 = vst [vmem:[#allocation19_spill] sm:$0xff] %v8855_v43  ;;  %vm8863_vm10 = vmand %vm10413_vm11, %vm10412_vm1  ;;  %v8886_v57 = vsub.s32 %v8438_v33, %v2707_v50  ;;  %v10225_v47 = vmax.f32 %v8833_v52, 0.0  ;;  %v8890_v4 = vadd.f32 %v8572_v32, %v2321_v2  ;;  %vm10418_vm9 = vcmp.lt.s32.totalorder %v8117_v35, %v8119_v22  ;;  %v10424_v50 = vld [vmem:[#allocation8_spill] sm:$0xff] }
 0x289   : > { %v10415_v62 = vsel %vm8863_vm10, 4294967295, %v10414_v62  ;;  %vm7325_vm12 = vmpackc.low %vm10417_vm4, %vm10416_vm8  ;;  %vm10419_vm15 = vcmp.ge.s32.totalorder %v8117_v35, %v8114_v28  ;;  %v10420_v55 = vmov 0  ;;  %vm10422_vm4 = vnez %v10339_v20  ;;  %v7264_v35 = vld [vmem:[%s10171_s2 + $0x208] sm:$0xff]  }
 0x28a   : > { %7327 = vmatmul.mubr.msk.bf16.vlgmr.msra.gmra.mrb[24].mxu0 %vm7325_vm12, %v7326_v34  ;;  %vm8898_vm12 = vmand %vm10419_vm15, %vm10418_vm9  ;;  %v10425_v8 = vsel %vm10422_vm4, %v10423_v1, %v10424_v50  ;;  %v10426_v10 = vmov 0  ;;  %v10428_v2 = vmov 0.0   ;;  %vm10429_vm1 = vmmov 0  }
 0x28b   : > { %v10421_v55 = vsel %vm8898_vm12, 4294967295, %v10420_v55  ;;  %vm8907_vm8 = vcmp.lt.s32.totalorder %v10425_v8, 16  ;;  %6209 = vmatprep.mubr.msk.bf16.mxu0 %vm10429_vm1, %v10428_v2  ;;  %v8914_v12 = vmul.u32.u64.low 3817748708, %v8812_v15  ;;  %v8915_v34 = vmul.u32.u64.high 3817748708, %v8812_v15, %v8914_v12  ;;  %6606 = vmatpush3.bf16.msra.mxu0 %v7262_v26 }
 0x28c   : > { %v10427_v10 = vsel %vm8907_vm8, 4294967295, %v10426_v10  ;;  %vm10430_vm9 = vnez %v10361_v21  ;;  %vm10431_vm15 = vnez %v10319_v42  ;;  %v10226_v1 = vmax.f32 %v8855_v43, 0.0  ;;  %6607 = vmatprep.subr.bf16.mxu0 %v10428_v2  ;;  %v6175_v12 = vpop.f32.mrb[8].mxu0  ;;  %v10481_v43 = vld [vmem:[#allocation7_spill] sm:$0xff] }
 0x28d   : > { %vm10432_vm4 = vmand %vm10430_vm9, %vm10431_vm15  ;;  %vm10433_vm6 = vnez %v10371_v38  ;;  %v2685_v26 = vmul.u32 18, %v2684_v6  ;;  %v10230_v8 = vmax.f32 %v8890_v4, 0.0  ;;  %vm10435_vm14 = vcmp.lt.s32.totalorder %v8141_v51, %v8119_v22 }
 0x28e   : > { %v2957_v20 = vsel %vm10432_vm4, %v10224_v3, 0.0  ;;  %vm10434_vm4 = vmand %vm8673_vm5, %vm10386_vm2  ;;  %vm10436_vm0 = vcmp.ge.s32.totalorder %v8141_v51, %v8114_v28  ;;  %v10437_v6 = vmov 0  ;;  %v8958_v2 = vadd.s32 18, %v8795_v40  ;;  %v2224_v3 = vpop.f32.mrb[9].mxu0 }
 0x28f   : > { %2983 = vst [vmem:[#allocation2 + $0x31] sm:$0xff] %v2957_v20  ;;  %v2955_v50 = vsel %vm10434_vm4, %v10225_v47, 0.0  ;;  %vm8952_vm11 = vmand %vm10436_vm0, %vm10435_vm14  ;;  %vm10439_vm4 = vnez %v10342_v0  ;;  %v2326_v51 = vmul.f32 %v6175_v12, %v8527_v60  ;;  %v7257_v47 = vld [vmem:[%s10171_s2 + $0x80] sm:$0xff]   ;;  %vm10441_vm0 = vcmp.lt.s32.totalorder %v8148_v24, %v8119_v22  ;;  %6608 = vmatpush3.bf16.msra.mxu0 %v7264_v35 }
 0x290   : > { %v10438_v6 = vsel %vm8952_vm11, 4294967295, %v10437_v6  ;;  %2981 = vst [vmem:[#allocation2 + $0x21] sm:$0xff] %v2955_v50  ;;  %vm10440_vm15 = vmand %vm8699_vm13, %vm10439_vm4  ;;  %vm10442_vm14 = vcmp.ge.s32.totalorder %v8148_v24, %v8114_v28  ;;  %v10443_v50 = vmov 0  ;;  %vm10445_vm4 = vnez %v10346_v53 }
 0x291   : > { %v2958_v20 = vsel %vm10440_vm15, %v10226_v1, 0.0  ;;  %vm8977_vm8 = vmand %vm10442_vm14, %vm10441_vm0  ;;  %v10446_v12 = vsel %vm10445_vm4, %v8567_v37, %v8416_v19  ;;  %v10447_v1 = vmov 0  ;;  %v2739_v13 = vshrl.u32 %v8720_v7, 4  ;;  %v6176_v19 = vpop.f32.mrb[10].mxu0  ;;  %v3000_v37 = vld [vmem:[#allocation2] sm:$0xff] }
 0x292   : > { %v10444_v50 = vsel %vm8977_vm8, 4294967295, %v10443_v50  ;;  %vm8986_vm15 = vcmp.lt.s32.totalorder %v10446_v12, 16  ;;  %2984 = vst [vmem:[#allocation2 + $0x39] sm:$0xff] %v2958_v20  ;;  %vm10449_vm0 = vnez %v10384_v41  ;;  %vm10450_vm14 = vnez %v10352_v29  ;;  %v3001_v12 = vld [vmem:[#allocation2 + $0x8] sm:$0xff]  ;;  %v2227_v20 = vpop.f32.mrb[11].mxu0 }
 0x293   : > { %v10448_v1 = vsel %vm8986_vm15, 4294967295, %v10447_v1  ;;  %vm10451_vm9 = vmand %vm10449_vm0, %vm10450_vm14  ;;  %v2324_v53 = vmul.f32 %v8527_v60, %v2224_v3  ;;  %vm10452_vm4 = vcmp.lt.s32.totalorder %v8156_v44, %v8119_v22  ;;  %vm10453_vm13 = vcmp.ge.s32.totalorder %v8156_v44, %v8114_v28 }
 0x294   : > { %v2956_v24 = vsel %vm10451_vm9, %v10230_v8, 0.0  ;;  %vm9006_vm2 = vmand %vm10453_vm13, %vm10452_vm4  ;;  %v10454_v7 = vmov 0  ;;  %v9016_v3 = vadd.f32 %v8572_v32, %v2326_v51  ;;  %v2327_v44 = vmul.f32 %v6176_v19, %v8527_v60  ;;  %v10465_v19 = vld [vmem:[#allocation13_spill] sm:$0xff] }
 0x295   : > { %v10455_v7 = vsel %vm9006_vm2, 4294967295, %v10454_v7  ;;  %2982 = vst [vmem:[#allocation2 + $0x29] sm:$0xff] %v2956_v24  ;;  %v3018_v8 = vpack.c.bf16 %v3001_v12, %v3000_v37  ;;  %vm10457_vm4 = vcmp.lt.s32.totalorder %v8166_v9, %v8119_v22  ;;  %vm10458_vm5 = vcmp.ge.s32.totalorder %v8166_v9, %v8114_v28  ;;  %v9045_v12 = vld [vmem:[#allocation2 + $0xb5] sm:$0xff] }
 0x296   : > { %vm9029_vm9 = vmand %vm10458_vm5, %vm10457_vm4  ;;  %v10459_v35 = vmov 0  ;;  %vm10461_vm14 = vnez %v10350_v14  ;;  %v10463_v24 = vmov 0  ;;  %v9043_v37 = vsub.s32 %v10465_v19, %v2685_v26  ;;  %6609 = vmatprep.subr.bf16.mxu0 %v9045_v12  ;;  %v7265_v26 = vld [vmem:[%s10171_s2 + $0x210] sm:$0xff]  }
 0x297   : > { %v10460_v35 = vsel %vm9029_vm9, 4294967295, %v10459_v35  ;;  %v10462_v51 = vsel %vm10461_vm14, %v8595_v48, %v8431_v18  ;;  %v9049_v9 = vadd.f32 %v8572_v32, %v2324_v53  ;;  %v2325_v18 = vmul.f32 %v8527_v60, %v2227_v20  ;;  %6258 = vmatmul.mubr.bf16.vlgmr.msra.gmra.mrb[0].mxu1 %v3018_v8  ;;  %v10483_v53 = vld [vmem:[#allocation5_spill] sm:$0xff]  ;;  %v10486_v8 = vld [vmem:[#allocation16_spill] sm:$0xff]  ;;  %6610 = vmatpush3.bf16.msra.mxu0 %v7265_v26 }
 0x298   : > { %vm9038_vm13 = vcmp.lt.s32.totalorder %v10462_v51, 16  ;;  %vm10467_vm14 = vcmp.lt.s32.totalorder %v8174_v46, %v8119_v22  ;;  %vm10468_vm9 = vcmp.ge.s32.totalorder %v8174_v46, %v8114_v28  ;;  %v10469_v14 = vmov 0  ;;  %v10472_v46 = vld [vmem:[#allocation10_spill] sm:$0xff]  ;;  %6294 = vmatpush3.bf16.msra.mxu1 %v7257_v47  ;;  %6261 = vmatprep.mubr.msk.bf16.mxu1 %vm10429_vm1, %v9045_v12 }
 0x299   : > { %v10464_v24 = vsel %vm9038_vm13, 4294967295, %v10463_v24  ;;  %vm9062_vm13 = vmand %vm10468_vm9, %vm10467_vm14  ;;  %v2717_v48 = vshrl.u32 %v8851_v45, 4  ;;  %v9072_v20 = vadd.f32 %v8572_v32, %v2327_v44  ;;  %vm10471_vm4 = vnez %v10357_v63  ;;  %v10476_v45 = vld [vmem:[#allocation6_spill] sm:$0xff]  ;;  %v10488_v44 = vld [vmem:[#allocation17_spill] sm:$0xff]  ;;  %6295 = vmatprep.subr.bf16.mxu1 %v9045_v12  ;;  %6611 = vmatprep.subr.bf16.mxu0 %v9045_v12 }
 0x29a   : > { %v10470_v14 = vsel %vm9062_vm13, 4294967295, %v10469_v14  ;;  %v10473_v51 = vsel %vm10471_vm4, %v8598_v25, %v10472_v46  ;;  %v10474_v17 = vmov 0  ;;  %vm10477_vm14 = vnez %v10476_v45  ;;  %v7258_v45 = vld [vmem:[%s10171_s2 + $0x88] sm:$0xff]  }
 0x29b   : > { %vm9079_vm9 = vcmp.lt.s32.totalorder %v10473_v51, 16  ;;  %vm10479_vm13 = vnez %v10478_v5  ;;  %vm10482_vm15 = vnez %v10481_v43  ;;  %vm10484_vm8 = vnez %v10483_v53 }
 0x29c   : > { %v10475_v17 = vsel %vm9079_vm9, 4294967295, %v10474_v17  ;;  %vm10480_vm2 = vmand %vm10477_vm14, %vm10479_vm13  ;;  %v10487_v63 = vmax.f32 %v10486_v8, 0.0  ;;  %v10489_v27 = vmax.f32 %v10488_v44, 0.0  ;;  %vm10490_vm4 = vcmp.ne.s32.totalorder %v8795_v40, 0  ;;  %6296 = vmatpush3.bf16.msra.mxu1 %v7258_v45 }
 0x29d   : > { %vm10485_vm5 = vmand %vm10482_vm15, %vm10484_vm8  ;;  %vm10491_vm9 = vcmp.lt.s32.totalorder %v8795_v40, 0  ;;  %v9106_v43 = vadd.s32 18, %v8886_v57  ;;  %v9114_v51 = vadd.f32 %v8572_v32, %v2325_v18  ;;  %v10494_v8 = vsel %vm8807_vm3, %v8764_v16, %v8661_v11  ;;  %v3003_v16 = vld [vmem:[#allocation2 + $0x18] sm:$0xff]  ;;  %6297 = vmatprep.subr.bf16.mxu1 %v9045_v12 }
 0x29e   : > { %vm7328_vm12 = vmpackc.low %vm10485_vm5, %vm10480_vm2  ;;  %v7329_v25 = vpack.c.bf16 %v10489_v27, %v10487_v63  ;;  %v10244_v27 = vmax.f32 %v9049_v9, 0.0  ;;  %v10495_v63 = vmov 0  ;;  %vm10497_vm5 = vcmp.ne.s32.totalorder %v8886_v57, 0 }
 0x29f   : > { %vm9101_vm0 = vmand %vm10491_vm9, %vm10490_vm4  ;;  %vm10498_vm9 = vcmp.lt.s32.totalorder %v8886_v57, 0  ;;  %v2740_v18 = vmul.u32 18, %v2739_v13  ;;  %v2728_v44 = vshrl.u32 %v8915_v34, 4  ;;  %v10501_v23 = vmax.f32 %v9016_v3, 0.0  ;;  %v7266_v13 = vld [vmem:[%s10171_s2 + $0x218] sm:$0xff]  }
 0x2a0   : > { %7330 = vmatmul.mubr.msk.bf16.gmra.mrb[28].mxu0 %vm7328_vm12, %v7329_v25  ;;  %vm9126_vm12 = vcmp.lt.s32.totalorder %v10494_v8, 16  ;;  %vm9134_vm14 = vmand %vm10498_vm9, %vm10497_vm5  ;;  %vm10503_vm4 = vnez %v10410_v56  ;;  %v6179_v8 = vpop.f32.mrb[12].mxu0  ;;  %vm10506_vm2 = vcmp.lt.s32.totalorder %v8266_v31, %v8119_v22  ;;  %vm10507_vm9 = vcmp.ge.s32.totalorder %v8266_v31, %v8114_v28 }
 0x2a1   : > { %v10496_v63 = vsel %vm9126_vm12, 4294967295, %v10495_v63  ;;  %vm10502_vm3 = vmand %vm8827_vm7, %vm10433_vm6  ;;  %6213 = vmatprep.mubr.msk.bf16.mxu0 %vm10429_vm1, %v9045_v12  ;;  %v2718_v53 = vmul.u32 18, %v2717_v48  ;;  %v10510_v25 = vmax.f32 %v9072_v20, 0.0  ;;  %vm10512_vm8 = vnez %v10393_v59  ;;  %v2240_v46 = vpop.f32.mrb[13].mxu0  ;;  %6612 = vmatpush3.bf16.msra.mxu0 %v7266_v13 }
 0x2a2   : > { %v2961_v11 = vsel %vm10502_vm3, %v10501_v23, 0.0  ;;  %vm10504_vm3 = vnez %v10388_v54  ;;  %v3002_v23 = vld [vmem:[#allocation2 + $0x10] sm:$0xff]  ;;  %vm9173_vm5 = vmand %vm10507_vm9, %vm10506_vm2  ;;  %v2330_v5 = vmul.f32 %v6179_v8, %v8527_v60  ;;  %vm10514_vm2 = vnez %v10427_v10  ;;  %6613 = vmatprep.subr.bf16.mxu0 %v9045_v12 }
 0x2a3   : > { %2987 = vst [vmem:[#allocation2 + $0x51] sm:$0xff] %v2961_v11  ;;  %vm10505_vm15 = vmand %vm8863_vm10, %vm10504_vm3  ;;  %v10508_v11 = vmov 0  ;;  %vm10515_vm9 = vnez %v10444_v50  ;;  %v10516_v48 = vmax.f32 %v9114_v51, 0.0  ;;  %v2729_v47 = vmul.u32 18, %v2728_v44 }
 0x2a4   : > { %v2959_v34 = vsel %vm10505_vm15, %v10244_v27, 0.0  ;;  %v10509_v11 = vsel %vm9173_vm5, 4294967295, %v10508_v11  ;;  %v2852_v27 = vsel %vm9101_vm0, %v8958_v2, %v8795_v40  ;;  %vm10511_vm15 = vnez %v10421_v55  ;;  %vm10517_vm0 = vmand %vm8952_vm11, %vm10503_vm4 }
 0x2a5   : > { %2985 = vst [vmem:[#allocation2 + $0x41] sm:$0xff] %v2959_v34  ;;  %vm10513_vm13 = vmand %vm10511_vm15, %vm10512_vm8  ;;  %v2855_v40 = vsel %vm9134_vm14, %v9106_v43, %v8886_v57  ;;  %v9198_v2 = vadd.s32 18, %v9043_v37  ;;  %v2960_v26 = vsel %vm10517_vm0, %v10516_v48, 0.0  ;;  %v2328_v34 = vmul.f32 %v8527_v60, %v2240_v46  ;;  %v7259_v43 = vld [vmem:[%s10171_s2 + $0x90] sm:$0xff]   ;;  %v10526_v48 = vld [vmem:[#allocation15_spill] sm:$0xff] }
 0x2a6   : > { %v2962_v31 = vsel %vm10513_vm13, %v10510_v25, 0.0  ;;  %v6180_v25 = vpop.f32.mrb[14].mxu0  ;;  %vm10518_vm13 = vcmp.lt.s32.totalorder %v8356_v61, %v8119_v22  ;;  %vm10519_vm14 = vcmp.ge.s32.totalorder %v8356_v61, %v8114_v28  ;;  %v10520_v57 = vmov 0  ;;  %2986 = vst [vmem:[#allocation2 + $0x49] sm:$0xff] %v2960_v26  ;;  %6298 = vmatpush3.bf16.msra.mxu1 %v7259_v43  ;;  %v3005_v61 = vld [vmem:[#allocation2 + $0x28] sm:$0xff] }
 0x2a7   : > { %2988 = vst [vmem:[#allocation2 + $0x59] sm:$0xff] %v2962_v31  ;;  %vm9215_vm6 = vmand %vm10519_vm14, %vm10518_vm13  ;;  %v9223_v8 = vadd.f32 %v8572_v32, %v2330_v5  ;;  %v2331_v45 = vmul.f32 %v6180_v25, %v8527_v60  ;;  %v2243_v31 = vpop.f32.mrb[15].mxu0  ;;  %v3019_v46 = vpack.c.bf16 %v3003_v16, %v3002_v23  ;;  %vm10522_vm0 = vcmp.ne.s32.totalorder %v9043_v37, 0  ;;  %6299 = vmatprep.subr.bf16.mxu1 %v9045_v12 }
 0x2a8   : > { %v10521_v57 = vsel %vm9215_vm6, 4294967295, %v10520_v57  ;;  %vm10523_vm13 = vcmp.lt.s32.totalorder %v9043_v37, 0  ;;  %v9236_v44 = vsub.s32 %v10526_v48, %v2740_v18  ;;  %v9239_v5 = vadd.f32 %v8572_v32, %v2328_v34 }
 0x2a9   : > { %vm9230_vm14 = vmand %vm10523_vm13, %vm10522_vm0  ;;  %vm10528_vm15 = vnez %v10455_v7  ;;  %v2329_v16 = vmul.f32 %v8527_v60, %v2243_v31  ;;  %v9247_v23 = vsub.s32 %v8767_v58, %v2718_v53  ;;  %v10258_v26 = vmax.f32 %v9223_v8, 0.0  ;;  %6262 = vmatmul.mubr.bf16.gmra.mrb[4].mxu1 %v3019_v46  ;;  %v6183_v31 = vpop.f32.mrb[16].mxu0 }
 0x2aa   : > { %v9251_v25 = vadd.f32 %v8572_v32, %v2331_v45  ;;  %vm9253_vm0 = vcmp.lt.s32.totalorder %v2852_v27, 16  ;;  %v10530_v18 = vmov 0  ;;  %vm10532_vm13 = vcmp.lt.s32.totalorder %v8438_v33, %v8119_v22  ;;  %6265 = vmatprep.mubr.msk.bf16.mxu1 %vm10429_vm1, %v9045_v12  ;;  %v7260_v45 = vld [vmem:[%s10171_s2 + $0x98] sm:$0xff]  }
 0x2ab   : > { %v10531_v18 = vsel %vm9253_vm0, 4294967295, %v10530_v18  ;;  %vm10533_vm7 = vcmp.ge.s32.totalorder %v8438_v33, %v8114_v28  ;;  %vm9267_vm11 = vcmp.lt.s32.totalorder %v2855_v40, 16  ;;  %vm10538_vm3 = vnez %v10369_v49  ;;  %v7268_v40 = vld [vmem:[%s10171_s2 + $0x220] sm:$0xff]   ;;  %6300 = vmatpush3.bf16.msra.mxu1 %v7260_v45 }
 0x2ac   : > { %10529 = vst [vmem:[#allocation11_spill] sm:$0xff] %v9251_v25  ;;  %vm9263_vm4 = vmand %vm10533_vm7, %vm10532_vm13  ;;  %vm10539_vm10 = vnez %v10330_v30  ;;  %vm10541_vm0 = vnez %v10384_v41  ;;  %vm10542_vm5 = vnez %v10352_v29  ;;  %v10544_v33 = vmax.f32 %v8833_v52, 0.0  ;;  %6614 = vmatpush3.bf16.msra.mxu0 %v7268_v40  ;;  %6301 = vmatprep.subr.bf16.mxu1 %v9045_v12  ;;  %v7261_v45 = vld [vmem:[%s10171_s2 + $0xa0] sm:$0xff]  }
 0x2ad   : > { %vm10540_vm6 = vmand %vm10538_vm3, %vm10539_vm10  ;;  %v10545_v27 = vmax.f32 %v8890_v4, 0.0  ;;  %v10262_v49 = vmax.f32 %v9239_v5, 0.0  ;;  %vm10546_vm7 = vnez %v10464_v24  ;;  %vm10547_vm3 = vnez %v10460_v35  ;;  %6615 = vmatprep.subr.bf16.mxu0 %v9045_v12 }
 0x2ae   : > { %vm10543_vm12 = vmand %vm10541_vm0, %vm10542_vm5  ;;  %v9294_v41 = vadd.f32 %v8572_v32, %v2329_v16  ;;  %v2853_v52 = vsel %vm9230_vm14, %v9198_v2, %v9043_v37  ;;  %v9305_v4 = vsub.s32 %v8812_v15, %v2729_v47  ;;  %v10256_v2 = vmax.f32 %v9251_v25, 0.0 }
 0x2af   : > { %vm7331_vm8 = vmpackc.low %vm10543_vm12, %vm10540_vm6  ;;  %v7332_v34 = vpack.c.bf16 %v10545_v27, %v10544_v33  ;;  %vm10549_vm12 = vnez %v10475_v17  ;;  %vm10550_vm14 = vnez %v10470_v14  ;;  %vm10553_vm13 = vcmp.lt.s32.totalorder %v10465_v19, %v8119_v22  ;;  %v2256_v27 = vpop.f32.mrb[17].mxu0  ;;  %6302 = vmatpush3.bf16.msra.mxu1 %v7261_v45  ;;  %v9493_v45 = vld [vmem:[%s10171_s2 + $0x230] sm:$0xff]  }
 0x2b0   : > { %v10259_v47 = vmax.f32 %v9294_v41, 0.0  ;;  %vm10554_vm6 = vcmp.ge.s32.totalorder %v10465_v19, %v8114_v28  ;;  %v10555_v46 = vmov 0  ;;  %v9346_v16 = vadd.s32 18, %v9236_v44  ;;  %6303 = vmatprep.subr.bf16.mxu1 %v9045_v12 }
 0x2b1   : > { %7333 = vmatmul.mubr.msk.bf16.gmra.mrb[32].mxu0 %vm7331_vm8, %v7332_v34  ;;  %vm10548_vm8 = vmand %vm10515_vm9, %vm10514_vm2  ;;  %v2334_v33 = vmul.f32 %v6183_v31, %v8527_v60  ;;  %v9364_v34 = vadd.s32 18, %v9247_v23  ;;  %v6184_v31 = vpop.f32.mrb[18].mxu0  ;;  %vm10564_vm9 = vcmp.lt.s32.totalorder %v9236_v44, 0  ;;  %vm10570_vm10 = vcmp.lt.s32.totalorder %v9247_v23, 0 }
 0x2b2   : > { %v2965_v37 = vsel %vm10548_vm8, %v10258_v26, 0.0  ;;  %6217 = vmatprep.mubr.msk.bf16.mxu0 %vm10429_vm1, %v9045_v12  ;;  %vm10551_vm8 = vnez %v10448_v1  ;;  %vm9341_vm0 = vmand %vm10554_vm6, %vm10553_vm13  ;;  %vm10558_vm13 = vnez %v10496_v63  ;;  %vm10559_vm6 = vnez %v10509_v11  ;;  %v2259_v26 = vpop.f32.mrb[19].mxu0  ;;  %v7263_v63 = vld [vmem:[%s10171_s2 + $0xa8] sm:$0xff]  }
 0x2b3   : > { %2991 = vst [vmem:[#allocation2 + $0x71] sm:$0xff] %v2965_v37  ;;  %vm10552_vm5 = vmand %vm10528_vm15, %vm10551_vm8  ;;  %v10556_v46 = vsel %vm9341_vm0, 4294967295, %v10555_v46  ;;  %v2364_v40 = vadd.f32 %v8572_v32, %v2334_v33  ;;  %v2333_v33 = vmul.f32 %v8527_v60, %v2259_v26  ;;  %vm2467_vm8 = vcmp.lt.s32.totalorder %v10526_v48, %v8119_v22  ;;  %6304 = vmatpush3.bf16.msra.mxu1 %v7263_v63 }
 0x2b4   : > { %v2963_v43 = vsel %vm10552_vm5, %v10262_v49, 0.0  ;;  %vm10557_vm5 = vmand %vm10547_vm3, %vm10546_vm7  ;;  %v2834_v26 = vadd.s32 18, %v9305_v4  ;;  %vm10573_vm15 = vnez %v10361_v21  ;;  %vm10576_vm2 = vnez %v10376_v39  ;;  %v7267_v39 = vld [vmem:[%s10171_s2 + $0xb0] sm:$0xff]   ;;  %6305 = vmatprep.subr.bf16.mxu1 %v9045_v12 }
 0x2b5   : > { %2989 = vst [vmem:[#allocation2 + $0x61] sm:$0xff] %v2963_v43  ;;  %v2966_v19 = vsel %vm10557_vm5, %v10256_v2, 0.0  ;;  %vm10560_vm5 = vmand %vm10550_vm14, %vm10549_vm12  ;;  %v2332_v43 = vmul.f32 %v8527_v60, %v2256_v27  ;;  %v3004_v2 = vld [vmem:[#allocation2 + $0x20] sm:$0xff]  ;;  %v2387_v49 = vmax.f32 %v2364_v40, 0.0  ;;  %vm10577_vm7 = vnez %v10342_v0 }
 0x2b6   : > { %2992 = vst [vmem:[#allocation2 + $0x79] sm:$0xff] %v2966_v19  ;;  %v2964_v37 = vsel %vm10560_vm5, %v10259_v47, 0.0  ;;  %v2335_v19 = vmul.f32 %v6184_v31, %v8527_v60  ;;  %v3020_v47 = vpack.c.bf16 %v3005_v61, %v3004_v2  ;;  %vm10563_vm5 = vcmp.ne.s32.totalorder %v9236_v44, 0  ;;  %v7269_v2 = vld [vmem:[%s10171_s2 + $0x228] sm:$0xff]   ;;  %vm2901_vm14 = vmand %vm9263_vm4, %vm9267_vm11  ;;  %v10581_v40 = vld [vmem:[#allocation19_spill] sm:$0xff] }
 0x2b7   : > { %2990 = vst [vmem:[#allocation2 + $0x69] sm:$0xff] %v2964_v37  ;;  %vm9386_vm12 = vmand %vm10564_vm9, %vm10563_vm5  ;;  %v9399_v61 = vadd.f32 %v8572_v32, %v2332_v43  ;;  %vm9402_vm9 = vcmp.lt.s32.totalorder %v2853_v52, 16  ;;  %v10567_v37 = vmov 0  ;;  %vm10569_vm5 = vcmp.ne.s32.totalorder %v9247_v23, 0  ;;  %v10579_v52 = vld [vmem:[#allocation18_spill] sm:$0xff]  ;;  %6616 = vmatpush3.bf16.msra.mxu0 %v7269_v2  ;;  %6306 = vmatpush3.bf16.msra.mxu1 %v7267_v39 }
 0x2b8   : > { %v10568_v37 = vsel %vm9402_vm9, 4294967295, %v10567_v37  ;;  %vm9410_vm3 = vmand %vm10570_vm10, %vm10569_vm5  ;;  %v10571_v31 = vmov 0  ;;  %v2365_v29 = vadd.f32 %v8572_v32, %v2335_v19  ;;  %6266 = vmatmul.mubr.bf16.gmra.mrb[8].mxu1 %v3020_v47  ;;  %vm10574_vm10 = vnez %v10319_v42  ;;  %6617 = vmatprep.subr.bf16.mxu0 %v9045_v12 }
 0x2b9   : > { %v10572_v31 = vsel %vm9410_vm3, 4294967295, %v10571_v31  ;;  %vm10575_vm5 = vmand %vm10573_vm15, %vm10574_vm10  ;;  %v10580_v43 = vmax.f32 %v10579_v52, 0.0  ;;  %v10582_v47 = vmax.f32 %v10581_v40, 0.0  ;;  %v2385_v30 = vmax.f32 %v9399_v61, 0.0  ;;  %6269 = vmatprep.mubr.msk.bf16.mxu1 %vm10429_vm1, %v9045_v12  ;;  %6307 = vmatprep.subr.bf16.mxu1 %v9045_v12  ;;  %v4686_v61 = vld [vmem:[#allocation2 + $0x3e] sm:$0xff] }
 0x2ba   : > { %vm10578_vm3 = vmand %vm10576_vm2, %vm10577_vm7  ;;  %v9438_v25 = vadd.f32 %v8572_v32, %v2333_v33  ;;  %v2858_v21 = vsel %vm9386_vm12, %v9346_v16, %v9236_v44  ;;  %vm10583_vm2 = vcmp.ne.s32.totalorder %v9305_v4, 0  ;;  %v2388_v16 = vmax.f32 %v2365_v29, 0.0 }
 0x2bb   : > { %vm7334_vm0 = vmpackc.low %vm10578_vm3, %vm10575_vm5  ;;  %v7335_v19 = vpack.c.bf16 %v10582_v47, %v10580_v43  ;;  %vm10584_vm3 = vcmp.lt.s32.totalorder %v9305_v4, 0  ;;  %vm10589_vm15 = vnez %v10572_v31  ;;  %vm10598_vm11 = vcmp.lt.s32.totalorder %v8767_v58, %v8119_v22  ;;  %6618 = vmatpush3.bf16.msra.mxu0 %v9493_v45 }
 0x2bc   : > { %vm9450_vm5 = vmand %vm10584_vm3, %vm10583_vm2  ;;  %v2856_v27 = vsel %vm10589_vm15, %v9364_v34, %v9247_v23  ;;  %v2386_v11 = vmax.f32 %v9438_v25, 0.0  ;;  %v3006_v23 = vld [vmem:[#allocation2 + $0x30] sm:$0xff]  ;;  %v3007_v34 = vld [vmem:[#allocation2 + $0x38] sm:$0xff]  ;;  %v2970_v2 = vsel %vm2901_vm14, %v2388_v16, 0.0  ;;  %vm9511_vm3 = vcmp.lt.s32.totalorder %v2858_v21, 16  ;;  %6619 = vmatprep.subr.bf16.mxu0 %v9045_v12 }
 0x2bd   : > { %7336 = vmatmul.mubr.msk.bf16.gmra.mrb[36].mxu0 %vm7334_vm0, %v7335_v19  ;;  %vm10587_vm12 = vmand %vm10559_vm6, %vm10558_vm13  ;;  %vm10588_vm0 = vnez %v10556_v46  ;;  %vm10590_vm13 = vnez %v10521_v57  ;;  %vm10591_vm6 = vnez %v10531_v18  ;;  %v2857_v13 = vsel %vm9450_vm5, %v2834_v26, %v9305_v4  ;;  %2996 = vst [vmem:[#allocation2 + $0x99] sm:$0xff] %v2970_v2  ;;  %v3015_v4 = vld [vmem:[#allocation2 + $0x78] sm:$0xff]  ;;  %v3394_v25 = vld [vmem:[#allocation2 + $0xa] sm:$0xff] }
 0x2be   : > { %6221 = vmatprep.mubr.msk.bf16.mxu0 %vm10429_vm1, %v9045_v12  ;;  %v2969_v44 = vsel %vm10587_vm12, %v2387_v49, 0.0  ;;  %vm10269_vm2 = vmand %vm10588_vm0, %vm9402_vm9  ;;  %v6187_v49 = vpop.f32.mrb[20].mxu0  ;;  %vm10599_vm4 = vcmp.ge.s32.totalorder %v8767_v58, %v8114_v28  ;;  %vm10604_vm5 = vcmp.lt.s32.totalorder %v8812_v15, %v8119_v22  ;;  %v3021_v21 = vpack.c.bf16 %v3007_v34, %v3006_v23  ;;  %v3008_v34 = vld [vmem:[#allocation2 + $0x40] sm:$0xff] }
 0x2bf   : > { %2995 = vst [vmem:[#allocation2 + $0x91] sm:$0xff] %v2969_v44  ;;  %vm10592_vm12 = vmand %vm10590_vm13, %vm10591_vm6  ;;  %v2338_v33 = vmul.f32 %v6187_v49, %v8527_v60  ;;  %v2272_v53 = vpop.f32.mrb[21].mxu0  ;;  %vm10613_vm10 = vnez %v10438_v6  ;;  %vm10614_vm9 = vnez %v10410_v56  ;;  %v10626_v31 = vmax.f32 %v9072_v20, 0.0 }
 0x2c0   : > { %v2967_v29 = vsel %vm10592_vm12, %v2385_v30, 0.0  ;;  %vm10593_vm12 = vcmp.ge.s32.totalorder %v10526_v48, %v8114_v28  ;;  %v2968_v48 = vsel %vm10269_vm2, %v2386_v11, 0.0  ;;  %v2336_v43 = vmul.f32 %v8527_v60, %v2272_v53  ;;  %vm9532_vm14 = vmand %vm10599_vm4, %vm10598_vm11  ;;  %v6188_v26 = vpop.f32.mrb[22].mxu0  ;;  %6270 = vmatmul.mubr.bf16.gmra.mrb[12].mxu1 %v3021_v21  ;;  %v3011_v53 = vld [vmem:[#allocation2 + $0x58] sm:$0xff] }
 0x2c1   : > { %2993 = vst [vmem:[#allocation2 + $0x81] sm:$0xff] %v2967_v29  ;;  %vm9507_vm15 = vmand %vm10593_vm12, %vm2467_vm8  ;;  %vm9536_vm8 = vcmp.lt.s32.totalorder %v2856_v27, 16  ;;  %v2368_v47 = vadd.f32 %v8572_v32, %v2338_v33  ;;  %v2275_v19 = vpop.f32.mrb[23].mxu0  ;;  %vm10605_vm12 = vcmp.ge.s32.totalorder %v8812_v15, %v8114_v28  ;;  %vm9560_vm4 = vcmp.lt.s32.totalorder %v2857_v13, 16  ;;  %v9569_v15 = vld [vmem:[%s10171_s2 + $0x238] sm:$0xff]   ;;  %6273 = vmatprep.mubr.msk.bf16.mxu1 %vm10429_vm1, %v9045_v12 }
 0x2c2   : > { %2994 = vst [vmem:[#allocation2 + $0x89] sm:$0xff] %v2968_v48  ;;  %vm9547_vm2 = vmand %vm10605_vm12, %vm10604_vm5  ;;  %v2366_v22 = vadd.f32 %v8572_v32, %v2336_v43  ;;  %v2337_v44 = vmul.f32 %v8527_v60, %v2275_v19  ;;  %vm10610_vm12 = vnez %v10415_v62  ;;  %vm10611_vm11 = vnez %v10388_v54  ;;  %6620 = vmatpush3.bf16.msra.mxu0 %v9569_v15  ;;  %v3012_v48 = vld [vmem:[#allocation2 + $0x60] sm:$0xff]  ;;  %v4685_v21 = vld [vmem:[#allocation2 + $0x36] sm:$0xff] }
 0x2c3   : > { %v2391_v16 = vmax.f32 %v2368_v47, 0.0  ;;  %vm2902_vm5 = vmand %vm9532_vm14, %vm9536_vm8  ;;  %v10616_v60 = vmax.f32 %v9049_v9, 0.0  ;;  %v10617_v27 = vmax.f32 %v9114_v51, 0.0  ;;  %v3009_v51 = vld [vmem:[#allocation2 + $0x48] sm:$0xff]  ;;  %v10625_v33 = vmax.f32 %v9016_v3, 0.0  ;;  %v3396_v28 = vld [vmem:[#allocation2 + $0x1a] sm:$0xff] }
 0x2c4   : > { %vm10612_vm7 = vmand %vm10610_vm12, %vm10611_vm11  ;;  %v2389_v29 = vmax.f32 %v2366_v22, 0.0  ;;  %v2367_v49 = vadd.f32 %v8572_v32, %v2337_v44  ;;  %v7270_v32 = vld [vmem:[%s10171_s2 + $0xb8] sm:$0xff]   ;;  %v3022_v2 = vpack.c.bf16 %v3009_v51, %v3008_v34  ;;  %v10634_v3 = vmax.f32 %v9294_v41, 0.0  ;;  %v4684_v47 = vld [vmem:[#allocation2 + $0x2e] sm:$0xff] }
 0x2c5   : > { %vm10615_vm0 = vmand %vm10613_vm10, %vm10614_vm9  ;;  %v7338_v63 = vpack.c.bf16 %v10617_v27, %v10616_v60  ;;  %6308 = vmatpush3.bf16.msra.mxu1 %v7270_v32  ;;  %v7341_v52 = vpack.c.bf16 %v10626_v31, %v10625_v33  ;;  %v4702_v22 = vpack.c.bf16 %v4686_v61, %v4685_v21  ;;  %v7274_v44 = vld [vmem:[%s10171_s2 + $0xc8] sm:$0xff]   ;;  %v3395_v27 = vld [vmem:[#allocation2 + $0x12] sm:$0xff] }
 0x2c6   : > { %vm7337_vm6 = vmpackc.low %vm10615_vm0, %vm10612_vm7  ;;  %v2971_v6 = vsel %vm2902_vm5, %v2389_v29, 0.0  ;;  %v2390_v9 = vmax.f32 %v2367_v49, 0.0  ;;  %6345 = vmatprep.subr.bf16.mxu1 %v9045_v12  ;;  %vm10619_vm0 = vnez %v10405_v36  ;;  %v3010_v36 = vld [vmem:[#allocation2 + $0x50] sm:$0xff]  ;;  %vm10628_vm5 = vnez %v10448_v1  ;;  %v3397_v32 = vld [vmem:[#allocation2 + $0x22] sm:$0xff] }
 0x2c7   : > { %7339 = vmatmul.mubr.msk.bf16.gmra.mrb[40].mxu0 %vm7337_vm6, %v7338_v63  ;;  %vm10618_vm7 = vmand %vm9507_vm15, %vm9511_vm3  ;;  %2997 = vst [vmem:[#allocation2 + $0xa1] sm:$0xff] %v2971_v6  ;;  %vm10622_vm6 = vnez %v10421_v55  ;;  %vm10623_vm15 = vnez %v10393_v59  ;;  %v3023_v13 = vpack.c.bf16 %v3011_v53, %v3010_v36  ;;  %v10633_v55 = vmax.f32 %v9239_v5, 0.0  ;;  %v10642_v5 = vld [vmem:[#allocation11_spill] sm:$0xff]  ;;  %v4688_v60 = vld [vmem:[#allocation2 + $0x4e] sm:$0xff] }
 0x2c8   : > { %6225 = vmatprep.mubr.msk.bf16.mxu0 %vm10429_vm1, %v9045_v12  ;;  %v2973_v62 = vsel %vm10618_vm7, %v2391_v16, 0.0  ;;  %vm2903_vm10 = vmand %vm9547_vm2, %vm9560_vm4  ;;  %6274 = vmatmul.mubr.bf16.gmra.mrb[16].mxu1 %v3022_v2  ;;  %vm10620_vm2 = vnez %v10371_v38  ;;  %vm10627_vm4 = vnez %v10455_v7  ;;  %vm10630_vm7 = vnez %v10470_v14  ;;  %v3013_v7 = vld [vmem:[#allocation2 + $0x68] sm:$0xff]  ;;  %v7275_v63 = vld [vmem:[%s10171_s2 + $0xd0] sm:$0xff]  }
 0x2c9   : > { %2999 = vst [vmem:[#allocation2 + $0xb1] sm:$0xf] %v2973_v62  ;;  %v2972_v23 = vsel %vm2903_vm10, %v2390_v9, 0.0  ;;  %vm10621_vm3 = vmand %vm10619_vm0, %vm10620_vm2  ;;  %6277 = vmatprep.mubr.msk.bf16.mxu1 %vm10429_vm1, %v9045_v12  ;;  %vm10631_vm10 = vnez %v10475_v17  ;;  %v7344_v20 = vpack.c.bf16 %v10634_v3, %v10633_v55  ;;  %v3024_v43 = vpack.c.bf16 %v3013_v7, %v3012_v48  ;;  %v3017_v57 = vld [vmem:[#allocation2 + $0x88] sm:$0xff]  ;;  %v7276_v62 = vld [vmem:[%s10171_s2 + $0xd8] sm:$0xff]  }
 0x2ca   : > { %2998 = vst [vmem:[#allocation2 + $0xa9] sm:$0xff] %v2972_v23  ;;  %vm10624_vm14 = vmand %vm10622_vm6, %vm10623_vm15  ;;  %vm10635_vm6 = vnez %v10444_v50  ;;  %v10641_v14 = vmax.f32 %v9223_v8, 0.0  ;;  %v10643_v41 = vmax.f32 %v10642_v5, 0.0  ;;  %v3014_v50 = vld [vmem:[#allocation2 + $0x70] sm:$0xff]  ;;  %v4683_v8 = vld [vmem:[#allocation2 + $0x26] sm:$0xff]  ;;  %v9700_v29 = vpack.c.bf16 %v3396_v28, %v3395_v27 }
 0x2cb   : > { %vm7340_vm8 = vmpackc.low %vm10624_vm14, %vm10621_vm3  ;;  %vm10636_vm14 = vnez %v10427_v10  ;;  %v3025_v26 = vpack.c.bf16 %v3015_v4, %v3014_v50  ;;  %v4701_v58 = vpack.c.bf16 %v4684_v47, %v4683_v8  ;;  %v4687_v16 = vld [vmem:[#allocation2 + $0x46] sm:$0xff]  ;;  %v4690_v9 = vld [vmem:[#allocation2 + $0x5e] sm:$0xff] }
 0x2cc   : > { %vm10629_vm12 = vmand %vm10627_vm4, %vm10628_vm5  ;;  %vm10638_vm4 = vnez %v10460_v35  ;;  %v7347_v40 = vpack.c.bf16 %v10643_v41, %v10641_v14  ;;  %v7350_v35 = vpack.c.bf16 %v2386_v11, %v2385_v30  ;;  %v3393_v30 = vld [vmem:[#allocation2 + $0x2] sm:$0xff]  ;;  %v4703_v49 = vpack.c.bf16 %v4688_v60, %v4687_v16  ;;  %v3398_v6 = vld [vmem:[#allocation2 + $0x2a] sm:$0xff] }
 0x2cd   : > { %vm10632_vm0 = vmand %vm10630_vm7, %vm10631_vm10  ;;  %v7273_v11 = vld [vmem:[%s10171_s2 + $0xc0] sm:$0xff]   ;;  %v3411_v39 = vpack.c.bf16 %v3394_v25, %v3393_v30  ;;  %v4689_v51 = vld [vmem:[#allocation2 + $0x56] sm:$0xff]  ;;  %v9712_v23 = vpack.c.bf16 %v3398_v6, %v3397_v32 }
 0x2ce   : > { %vm7343_vm3 = vmpackc.low %vm10632_vm0, %vm10629_vm12  ;;  %vm10639_vm12 = vnez %v10464_v24  ;;  %v4704_v34 = vpack.c.bf16 %v4690_v9, %v4689_v51  ;;  %v7277_v2 = vld [vmem:[%s10171_s2 + $0xe0] sm:$0xff]   ;;  %v7278_v33 = vld [vmem:[%s10171_s2 + $0xe8] sm:$0xff]  }
 0x2cf   : > { %7342 = vmatmul.mubr.msk.bf16.gmra.mrb[44].mxu0 %vm7340_vm8, %v7341_v52  ;;  %vm10637_vm8 = vmand %vm10635_vm6, %vm10636_vm14  ;;  %v3400_v31 = vld [vmem:[#allocation2 + $0x3a] sm:$0xff]  ;;  %v4691_v52 = vld [vmem:[#allocation2 + $0x66] sm:$0xff] }
 0x2d0   : > { %6229 = vmatprep.mubr.msk.bf16.mxu0 %vm10429_vm1, %v9045_v12  ;;  %6278 = vmatmul.mubr.bf16.gmra.mrb[20].mxu1 %v3023_v13  ;;  %vm10640_vm7 = vmand %vm10638_vm4, %vm10639_vm12  ;;  %vm10647_vm4 = vnez %v10568_v37  ;;  %v4692_v36 = vld [vmem:[#allocation2 + $0x6e] sm:$0xff]  ;;  %v3401_v7 = vld [vmem:[#allocation2 + $0x42] sm:$0xff] }
 0x2d1   : > { %6281 = vmatprep.mubr.msk.bf16.mxu1 %vm10429_vm1, %v9045_v12  ;;  %vm7346_vm0 = vmpackc.low %vm10640_vm7, %vm10637_vm8  ;;  %vm10646_vm8 = vnez %v10556_v46  ;;  %v3016_v46 = vld [vmem:[#allocation2 + $0x80] sm:$0xff]  ;;  %v3399_v53 = vld [vmem:[#allocation2 + $0x32] sm:$0xff]  ;;  %v4705_v55 = vpack.c.bf16 %v4692_v36, %v4691_v52 }
 0x2d2   : > { %vm10648_vm7 = vmand %vm10646_vm8, %vm10647_vm4  ;;  %v3026_v19 = vpack.c.bf16 %v3017_v57, %v3016_v46  ;;  %v3414_v13 = vpack.c.bf16 %v3400_v31, %v3399_v53  ;;  %v7279_v3 = vld [vmem:[%s10171_s2 + $0xf0] sm:$0xff]   ;;  %v3408_v8 = vld [vmem:[#allocation2 + $0x7a] sm:$0xff] }
 0x2d3   : > { %v3402_v48 = vld [vmem:[#allocation2 + $0x4a] sm:$0xff]  ;;  %v4693_v14 = vld [vmem:[#allocation2 + $0x76] sm:$0xff]  ;;  %v7281_v25 = vld [vmem:[%s10171_s2 + $0x100] sm:$0xff]  }
 0x2d4   : > { %v3415_v5 = vpack.c.bf16 %v3402_v48, %v3401_v7  ;;  %v3403_v50 = vld [vmem:[#allocation2 + $0x52] sm:$0xff]  ;;  %v7282_v61 = vld [vmem:[%s10171_s2 + $0x108] sm:$0xff]   ;;  %v3625_v16 = vld [vmem:[#allocation2 + $0x9a] sm:$0xff] }
 0x2d5   : > { %v3407_v47 = vld [vmem:[#allocation2 + $0x72] sm:$0xff]  ;;  %v3824_v32 = vld [vmem:[#allocation2 + $0x1b] sm:$0xff]  ;;  %v7290_v31 = vld [vmem:[%s10171_s2 + $0x148] sm:$0xff]  }
 0x2d6   : > { %v3418_v46 = vpack.c.bf16 %v3408_v8, %v3407_v47  ;;  %v7284_v21 = vld [vmem:[%s10171_s2 + $0x118] sm:$0xff]   ;;  %v3825_v52 = vld [vmem:[#allocation2 + $0x23] sm:$0xff]  ;;  %v3826_v36 = vld [vmem:[#allocation2 + $0x2b] sm:$0xff] }
 0x2d7   : > { %7345 = vmatmul.mubr.msk.bf16.gmra.mrb[48].mxu0 %vm7343_vm3, %v7344_v20  ;;  %vm10644_vm3 = vnez %v10531_v18  ;;  %v7280_v20 = vld [vmem:[%s10171_s2 + $0xf8] sm:$0xff]   ;;  %v3830_v8 = vld [vmem:[#allocation2 + $0x4b] sm:$0xff] }
 0x2d8   : > { %6233 = vmatprep.mubr.msk.bf16.mxu0 %vm10429_vm1, %v9045_v12  ;;  %6282 = vmatmul.mubr.bf16.gmra.mrb[24].mxu1 %v3024_v43  ;;  %vm10645_vm6 = vmand %vm10590_vm13, %vm10644_vm3  ;;  %v4694_v43 = vld [vmem:[#allocation2 + $0x7e] sm:$0xff]  ;;  %v3823_v51 = vld [vmem:[#allocation2 + $0x13] sm:$0xff] }
 0x2d9   : > { %6285 = vmatprep.mubr.msk.bf16.mxu1 %vm10429_vm1, %v9045_v12  ;;  %v4706_v41 = vpack.c.bf16 %v4694_v43, %v4693_v14  ;;  %v7288_v28 = vld [vmem:[%s10171_s2 + $0x138] sm:$0xff]  }
 0x2da   : > { %v7292_v48 = vld [vmem:[%s10171_s2 + $0x158] sm:$0xff]  }
 0x2db   : > { %v3828_v43 = vld [vmem:[#allocation2 + $0x3b] sm:$0xff] }
 0x2df   : > { %7348 = vmatmul.mubr.msk.bf16.gmra.mrb[52].mxu0 %vm7346_vm0, %v7347_v40  ;;  %vm7349_vm0 = vmpackc.low %vm10648_vm7, %vm10645_vm6  ;;  %v3404_v40 = vld [vmem:[#allocation2 + $0x5a] sm:$0xff] }
 0x2e0   : > { %6237 = vmatprep.mubr.msk.bf16.mxu0 %vm10429_vm1, %v9045_v12  ;;  %6286 = vmatmul.mubr.bf16.gmra.mrb[28].mxu1 %v3025_v26  ;;  %v3416_v4 = vpack.c.bf16 %v3404_v40, %v3403_v50  ;;  %v3405_v26 = vld [vmem:[#allocation2 + $0x62] sm:$0xff] }
 0x2e1   : > { %6289 = vmatprep.mubr.msk.bf16.mxu1 %vm10429_vm1, %v9045_v12  ;;  %v7293_v50 = vld [vmem:[%s10171_s2 + $0x160] sm:$0xff]  }
 0x2e7   : > { %7351 = vmatmul.mubr.msk.bf16.gmra.mrb[56].mxu0 %vm7349_vm0, %v7350_v35  ;;  %v3406_v35 = vld [vmem:[#allocation2 + $0x6a] sm:$0xff] }
 0x2e8   : > { %6621 = vmatprep.mubr.msk.bf16.mxu0 %vm10429_vm1, %v9045_v12  ;;  %6290 = vmatmul.mubr.bf16.gmra.mrb[32].mxu1 %v3026_v19  ;;  %v3417_v57 = vpack.c.bf16 %v3406_v35, %v3405_v26  ;;  %v3409_v19 = vld [vmem:[#allocation2 + $0x82] sm:$0xff] }
 0x2e9   : > { %6309 = vmatprep.mubr.msk.bf16.mxu1 %vm10429_vm1, %v9045_v12  ;;  %v7294_v35 = vld [vmem:[%s10171_s2 + $0x168] sm:$0xff]  }
 0x2ef   : > { %6622 = vmatmul.mubr.bf16.vlgmr.msra.gmra.mrb[60].mxu0 %v4701_v58  ;;  %v3410_v58 = vld [vmem:[#allocation2 + $0x8a] sm:$0xff] }
 0x2f0   : > { %6625 = vmatprep.mubr.msk.bf16.mxu0 %vm10429_vm1, %v9045_v12  ;;  %6310 = vmatmul.mubr.bf16.vlgmr.msra.gmra.mrb[0].mxu1 %v3411_v39  ;;  %v3419_v30 = vpack.c.bf16 %v3410_v58, %v3409_v19  ;;  %v7285_v39 = vld [vmem:[%s10171_s2 + $0x120] sm:$0xff]   ;;  %v7295_v58 = vld [vmem:[%s10171_s2 + $0x170] sm:$0xff]  }
 0x2f1   : > { %6346 = vmatpush3.bf16.msra.mxu1 %v7273_v11  ;;  %6313 = vmatprep.mubr.msk.bf16.mxu1 %vm10429_vm1, %v9045_v12  ;;  %v7283_v11 = vld [vmem:[%s10171_s2 + $0x110] sm:$0xff]  }
 0x2f2   : > { %6347 = vmatprep.subr.bf16.mxu1 %v9045_v12 }
 0x2f5   : > { %6348 = vmatpush3.bf16.msra.mxu1 %v7274_v44  ;;  %v7287_v44 = vld [vmem:[%s10171_s2 + $0x130] sm:$0xff]  }
 0x2f6   : > { %6349 = vmatprep.subr.bf16.mxu1 %v9045_v12 }
 0x2f7   : > { %6626 = vmatmul.mubr.bf16.gmra.mrb[64].mxu0 %v4702_v22  ;;  %v7286_v22 = vld [vmem:[%s10171_s2 + $0x128] sm:$0xff]  }
 0x2f8   : > { %6629 = vmatprep.mubr.msk.bf16.mxu0 %vm10429_vm1, %v9045_v12  ;;  %6314 = vmatmul.mubr.bf16.gmra.mrb[4].mxu1 %v9700_v29 }
 0x2f9   : > { %6317 = vmatprep.mubr.msk.bf16.mxu1 %vm10429_vm1, %v9045_v12  ;;  %6350 = vmatpush3.bf16.msra.mxu1 %v7275_v63  ;;  %v3624_v63 = vld [vmem:[#allocation2 + $0x92] sm:$0xff] }
 0x2fa   : > { %6351 = vmatprep.subr.bf16.mxu1 %v9045_v12 }
 0x2fd   : > { %6352 = vmatpush3.bf16.msra.mxu1 %v7276_v62 }
 0x2fe   : > { %6353 = vmatprep.subr.bf16.mxu1 %v9045_v12 }
 0x2ff   : > { %6630 = vmatmul.mubr.bf16.gmra.mrb[68].mxu0 %v4703_v49  ;;  %v3634_v49 = vpack.c.bf16 %v3625_v16, %v3624_v63  ;;  %v3834_v63 = vld [vmem:[#allocation2 + $0x6b] sm:$0xff] }
 0x300   : > { %6633 = vmatprep.mubr.msk.bf16.mxu0 %vm10429_vm1, %v9045_v12  ;;  %6318 = vmatmul.mubr.bf16.gmra.mrb[8].mxu1 %v9712_v23 }
 0x301   : > { %6321 = vmatprep.mubr.msk.bf16.mxu1 %vm10429_vm1, %v9045_v12  ;;  %6354 = vmatpush3.bf16.msra.mxu1 %v7277_v2  ;;  %v3841_v2 = vpack.c.bf16 %v3824_v32, %v3823_v51 }
 0x302   : > { %6355 = vmatprep.subr.bf16.mxu1 %v9045_v12 }
 0x305   : > { %6356 = vmatpush3.bf16.msra.mxu1 %v7278_v33 }
 0x306   : > { %6357 = vmatprep.subr.bf16.mxu1 %v9045_v12 }
 0x307   : > { %6634 = vmatmul.mubr.bf16.gmra.mrb[72].mxu0 %v4704_v34 }
 0x308   : > { %6637 = vmatprep.mubr.msk.bf16.mxu0 %vm10429_vm1, %v9045_v12  ;;  %6322 = vmatmul.mubr.bf16.gmra.mrb[12].mxu1 %v3414_v13 }
 0x309   : > { %6325 = vmatprep.mubr.msk.bf16.mxu1 %vm10429_vm1, %v9045_v12  ;;  %6358 = vmatpush3.bf16.msra.mxu1 %v7279_v3  ;;  %v7291_v3 = vld [vmem:[%s10171_s2 + $0x150] sm:$0xff]  }
 0x30a   : > { %6359 = vmatprep.subr.bf16.mxu1 %v9045_v12 }
 0x30d   : > { %6360 = vmatpush3.bf16.msra.mxu1 %v7280_v20  ;;  %v3842_v20 = vpack.c.bf16 %v3826_v36, %v3825_v52 }
 0x30e   : > { %6397 = vmatprep.subr.bf16.mxu1 %v9045_v12 }
 0x30f   : > { %6638 = vmatmul.mubr.bf16.gmra.mrb[76].mxu0 %v4705_v55 }
 0x310   : > { %6641 = vmatprep.mubr.msk.bf16.mxu0 %vm10429_vm1, %v9045_v12  ;;  %6326 = vmatmul.mubr.bf16.gmra.mrb[16].mxu1 %v3415_v5 }
 0x311   : > { %6329 = vmatprep.mubr.msk.bf16.mxu1 %vm10429_vm1, %v9045_v12 }
 0x317   : > { %6642 = vmatmul.mubr.bf16.gmra.mrb[80].mxu0 %v4706_v41  ;;  %v3827_v41 = vld [vmem:[#allocation2 + $0x33] sm:$0xff] }
 0x318   : > { %6330 = vmatmul.mubr.bf16.gmra.mrb[20].mxu1 %v3416_v4 }
 0x319   : > { %6333 = vmatprep.mubr.msk.bf16.mxu1 %vm10429_vm1, %v9045_v12 }
 0x320   : > { %6334 = vmatmul.mubr.bf16.gmra.mrb[24].mxu1 %v3417_v57 }
 0x321   : > { %6337 = vmatprep.mubr.msk.bf16.mxu1 %vm10429_vm1, %v9045_v12 }
 0x328   : > { %6338 = vmatmul.mubr.bf16.gmra.mrb[28].mxu1 %v3418_v46 }
 0x329   : > { %6341 = vmatprep.mubr.msk.bf16.mxu1 %vm10429_vm1, %v9045_v12 }
 0x330   : > { %6342 = vmatmul.mubr.bf16.gmra.mrb[32].mxu1 %v3419_v30 }
 0x331   : > { %6361 = vmatprep.mubr.msk.bf16.mxu1 %vm10429_vm1, %v9045_v12 }
 0x338   : > { %6362 = vmatmul.mubr.bf16.vlgmr.msra.gmra.mrb[0].mxu1 %v9700_v29 }
 0x339   : > { %6398 = vmatpush3.bf16.msra.mxu1 %v7281_v25  ;;  %6365 = vmatprep.mubr.msk.bf16.mxu1 %vm10429_vm1, %v9045_v12 }
 0x33a   : > { %6399 = vmatprep.subr.bf16.mxu1 %v9045_v12 }
 0x33d   : > { %6400 = vmatpush3.bf16.msra.mxu1 %v7282_v61  ;;  %v7296_v61 = vld [vmem:[%s10171_s2 + $0x178] sm:$0xff]  }
 0x33e   : > { %6401 = vmatprep.subr.bf16.mxu1 %v9045_v12 }
 0x340   : > { %6366 = vmatmul.mubr.bf16.gmra.mrb[4].mxu1 %v9712_v23  ;;  %v7289_v23 = vld [vmem:[%s10171_s2 + $0x140] sm:$0xff]  }
 0x341   : > { %6369 = vmatprep.mubr.msk.bf16.mxu1 %vm10429_vm1, %v9045_v12  ;;  %6402 = vmatpush3.bf16.msra.mxu1 %v7283_v11  ;;  %v3832_v11 = vld [vmem:[#allocation2 + $0x5b] sm:$0xff] }
 0x342   : > { %6403 = vmatprep.subr.bf16.mxu1 %v9045_v12 }
 0x345   : > { %6404 = vmatpush3.bf16.msra.mxu1 %v7284_v21 }
 0x346   : > { %6405 = vmatprep.subr.bf16.mxu1 %v9045_v12 }
 0x348   : > { %6370 = vmatmul.mubr.bf16.gmra.mrb[8].mxu1 %v3414_v13 }
 0x349   : > { %6373 = vmatprep.mubr.msk.bf16.mxu1 %vm10429_vm1, %v9045_v12  ;;  %6406 = vmatpush3.bf16.msra.mxu1 %v7285_v39 }
 0x34a   : > { %6407 = vmatprep.subr.bf16.mxu1 %v9045_v12 }
 0x34d   : > { %6408 = vmatpush3.bf16.msra.mxu1 %v7286_v22  ;;  %v3831_v22 = vld [vmem:[#allocation2 + $0x53] sm:$0xff] }
 0x34e   : > { %6409 = vmatprep.subr.bf16.mxu1 %v9045_v12 }
 0x350   : > { %6374 = vmatmul.mubr.bf16.gmra.mrb[12].mxu1 %v3415_v5 }
 0x351   : > { %6377 = vmatprep.mubr.msk.bf16.mxu1 %vm10429_vm1, %v9045_v12  ;;  %6410 = vmatpush3.bf16.msra.mxu1 %v7287_v44 }
 0x352   : > { %6411 = vmatprep.subr.bf16.mxu1 %v9045_v12 }
 0x355   : > { %6412 = vmatpush3.bf16.msra.mxu1 %v7288_v28  ;;  %v3845_v28 = vpack.c.bf16 %v3832_v11, %v3831_v22  ;;  %v7297_v11 = vld [vmem:[%s10171_s2 + $0x180] sm:$0xff]  }
 0x356   : > { %6449 = vmatprep.subr.bf16.mxu1 %v9045_v12 }
 0x358   : > { %6378 = vmatmul.mubr.bf16.gmra.mrb[16].mxu1 %v3416_v4  ;;  %v3843_v4 = vpack.c.bf16 %v3828_v43, %v3827_v41 }
 0x359   : > { %6381 = vmatprep.mubr.msk.bf16.mxu1 %vm10429_vm1, %v9045_v12 }
 0x35d   : > { %v9800_v60 = vpop.f32.mrb[24].mxu0 }
 0x35e   : > { %v6207_v27 = vpop.f32.mrb[25].mxu0 }
 0x35f   : > { %v9802_v29 = vpop.f32.mrb[26].mxu0  ;;  %v3833_v27 = vld [vmem:[#allocation2 + $0x63] sm:$0xff] }
 0x360   : > { %6382 = vmatmul.mubr.bf16.gmra.mrb[20].mxu1 %v3417_v57  ;;  %v6208_v62 = vpop.f32.mrb[27].mxu0  ;;  %v3829_v57 = vld [vmem:[#allocation2 + $0x43] sm:$0xff] }
 0x361   : > { %6385 = vmatprep.mubr.msk.bf16.mxu1 %vm10429_vm1, %v9045_v12 }
 0x368   : > { %6386 = vmatmul.mubr.bf16.gmra.mrb[24].mxu1 %v3418_v46 }
 0x369   : > { %6389 = vmatprep.mubr.msk.bf16.mxu1 %vm10429_vm1, %v9045_v12 }
 0x370   : > { %6390 = vmatmul.mubr.bf16.gmra.mrb[28].mxu1 %v3419_v30  ;;  %v3844_v30 = vpack.c.bf16 %v3830_v8, %v3829_v57 }
 0x371   : > { %6393 = vmatprep.mubr.msk.bf16.mxu1 %vm10429_vm1, %v9045_v12 }
 0x373   : > { %v9806_v6 = vpop.f32.mrb[28].mxu0 }
 0x374   : > { %v6211_v9 = vpop.f32.mrb[29].mxu0 }
 0x375   : > { %v9811_v34 = vpop.f32.mrb[30].mxu0  ;;  %v3846_v9 = vpack.c.bf16 %v3834_v63, %v3833_v27  ;;  %v4040_v27 = vld [vmem:[#allocation2 + $0x24] sm:$0xff]  ;;  %v4041_v63 = vld [vmem:[#allocation2 + $0x2c] sm:$0xff] }
 0x376   : > { %v6212_v33 = vpop.f32.mrb[31].mxu0 }
 0x378   : > { %6394 = vmatmul.mubr.bf16.gmra.mrb[32].mxu1 %v3634_v49 }
 0x379   : > { %6413 = vmatprep.mubr.msk.bf16.mxu1 %vm10429_vm1, %v9045_v12 }
 0x380   : > { %6414 = vmatmul.mubr.bf16.vlgmr.msra.gmra.mrb[0].mxu1 %v3841_v2 }
 0x381   : > { %6450 = vmatpush3.bf16.msra.mxu1 %v7289_v23  ;;  %6417 = vmatprep.mubr.msk.bf16.mxu1 %vm10429_vm1, %v9045_v12  ;;  %v3836_v23 = vld [vmem:[#allocation2 + $0x7b] sm:$0xff] }
 0x382   : > { %6451 = vmatprep.subr.bf16.mxu1 %v9045_v12 }
 0x384   : > { %v9819_v53 = vpop.f32.mrb[32].mxu0 }
 0x385   : > { %v6215_v13 = vpop.f32.mrb[33].mxu0  ;;  %6452 = vmatpush3.bf16.msra.mxu1 %v7290_v31  ;;  %v3835_v31 = vld [vmem:[#allocation2 + $0x73] sm:$0xff] }
 0x386   : > { %v9821_v55 = vpop.f32.mrb[34].mxu0  ;;  %6453 = vmatprep.subr.bf16.mxu1 %v9045_v12  ;;  %v3847_v36 = vpack.c.bf16 %v3836_v23, %v3835_v31  ;;  %v7299_v23 = vld [vmem:[%s10171_s2 + $0x190] sm:$0xff]  }
 0x387   : > { %v6216_v7 = vpop.f32.mrb[35].mxu0 }
 0x388   : > { %6418 = vmatmul.mubr.bf16.gmra.mrb[4].mxu1 %v3842_v20  ;;  %v3838_v20 = vld [vmem:[#allocation2 + $0x8b] sm:$0xff] }
 0x389   : > { %6421 = vmatprep.mubr.msk.bf16.mxu1 %vm10429_vm1, %v9045_v12  ;;  %6454 = vmatpush3.bf16.msra.mxu1 %v7291_v3  ;;  %v3837_v3 = vld [vmem:[#allocation2 + $0x83] sm:$0xff] }
 0x38a   : > { %6455 = vmatprep.subr.bf16.mxu1 %v9045_v12 }
 0x38d   : > { %6456 = vmatpush3.bf16.msra.mxu1 %v7292_v48 }
 0x38e   : > { %6457 = vmatprep.subr.bf16.mxu1 %v9045_v12 }
 0x390   : > { %v9833_v14 = vpop.f32.mrb[36].mxu0  ;;  %6422 = vmatmul.mubr.bf16.gmra.mrb[8].mxu1 %v3843_v4 }
 0x391   : > { %v6219_v5 = vpop.f32.mrb[37].mxu0  ;;  %6425 = vmatprep.mubr.msk.bf16.mxu1 %vm10429_vm1, %v9045_v12  ;;  %6458 = vmatpush3.bf16.msra.mxu1 %v7293_v50  ;;  %v3840_v50 = vld [vmem:[#allocation2 + $0x9b] sm:$0xff] }
 0x392   : > { %v9835_v40 = vpop.f32.mrb[38].mxu0  ;;  %6459 = vmatprep.subr.bf16.mxu1 %v9045_v12  ;;  %v3848_v5 = vpack.c.bf16 %v3838_v20, %v3837_v3 }
 0x393   : > { %v6220_v26 = vpop.f32.mrb[39].mxu0 }
 0x395   : > { %6460 = vmatpush3.bf16.msra.mxu1 %v7294_v35  ;;  %v3839_v35 = vld [vmem:[#allocation2 + $0x93] sm:$0xff] }
 0x396   : > { %6461 = vmatprep.subr.bf16.mxu1 %v9045_v12  ;;  %v3849_v8 = vpack.c.bf16 %v3840_v50, %v3839_v35  ;;  %v7302_v35 = vld [vmem:[%s10171_s2 + $0x1a8] sm:$0xff]  }
 0x398   : > { %6426 = vmatmul.mubr.bf16.gmra.mrb[12].mxu1 %v3844_v30 }
 0x399   : > { %6429 = vmatprep.mubr.msk.bf16.mxu1 %vm10429_vm1, %v9045_v12  ;;  %6462 = vmatpush3.bf16.msra.mxu1 %v7295_v58  ;;  %v4039_v58 = vld [vmem:[#allocation2 + $0x1c] sm:$0xff] }
 0x39a   : > { %v9847_v47 = vpop.f32.mrb[40].mxu0  ;;  %6463 = vmatprep.subr.bf16.mxu1 %v9045_v12 }
 0x39b   : > { %v6223_v46 = vpop.f32.mrb[41].mxu0 }
 0x39c   : > { %v9849_v19 = vpop.f32.mrb[42].mxu0 }
 0x39d   : > { %v6224_v25 = vpop.f32.mrb[43].mxu0  ;;  %6464 = vmatpush3.bf16.msra.mxu1 %v7296_v61  ;;  %v4038_v61 = vld [vmem:[#allocation2 + $0x14] sm:$0xff] }
 0x39e   : > { %6501 = vmatprep.subr.bf16.mxu1 %v9045_v12  ;;  %v4056_v22 = vpack.c.bf16 %v4039_v58, %v4038_v61 }
 0x3a0   : > { %6430 = vmatmul.mubr.bf16.gmra.mrb[16].mxu1 %v3845_v28 }
 0x3a1   : > { %6433 = vmatprep.mubr.msk.bf16.mxu1 %vm10429_vm1, %v9045_v12 }
 0x3a2   : > { %v9861_v21 = vpop.f32.mrb[44].mxu0 }
 0x3a3   : > { %v6227_v39 = vpop.f32.mrb[45].mxu0 }
 0x3a4   : > { %v9863_v44 = vpop.f32.mrb[46].mxu0 }
 0x3a5   : > { %v6228_v16 = vpop.f32.mrb[47].mxu0 }
 0x3a6   : > { %v9899_v16 = vld [vmem:[#allocation2 + $0xb5] sm:$0xff] }
 0x3a8   : > { %6434 = vmatmul.mubr.bf16.gmra.mrb[20].mxu1 %v3846_v9 }
 0x3a9   : > { %6437 = vmatprep.mubr.msk.bf16.mxu1 %vm10429_vm1, %v9045_v12 }
 0x3aa   : > { %v9868_v49 = vpop.f32.mrb[48].mxu0 }
 0x3ab   : > { %v6231_v62 = vpop.f32.mrb[49].mxu0 }
 0x3ac   : > { %v9870_v32 = vpop.f32.mrb[50].mxu0 }
 0x3ad   : > { %v6232_v51 = vpop.f32.mrb[51].mxu0 }
 0x3b0   : > { %6438 = vmatmul.mubr.bf16.gmra.mrb[24].mxu1 %v3847_v36  ;;  %v7300_v36 = vld [vmem:[%s10171_s2 + $0x198] sm:$0xff]  }
 0x3b1   : > { %6441 = vmatprep.mubr.msk.bf16.mxu1 %vm10429_vm1, %v9045_v12 }
 0x3b2   : > { %v9874_v2 = vpop.f32.mrb[52].mxu0 }
 0x3b3   : > { %v6235_v33 = vpop.f32.mrb[53].mxu0 }
 0x3b4   : > { %v9876_v52 = vpop.f32.mrb[54].mxu0  ;;  %v9914_v33 = vpack.c.bf16 %v4041_v63, %v4040_v27  ;;  %v4047_v27 = vld [vmem:[#allocation2 + $0x5c] sm:$0xff] }
 0x3b5   : > { %v6236_v13 = vpop.f32.mrb[55].mxu0 }
 0x3b6   : > { %v4043_v13 = vld [vmem:[#allocation2 + $0x3c] sm:$0xff] }
 0x3b8   : > { %6442 = vmatmul.mubr.bf16.gmra.mrb[28].mxu1 %v3848_v5 }
 0x3b9   : > { %6445 = vmatprep.mubr.msk.bf16.mxu1 %vm10429_vm1, %v9045_v12 }
 0x3ba   : > { %v9880_v7 = vpop.f32.mrb[56].mxu0 }
 0x3bb   : > { %v6239_v48 = vpop.f32.mrb[57].mxu0 }
 0x3bc   : > { %v9882_v43 = vpop.f32.mrb[58].mxu0  ;;  %v4042_v48 = vld [vmem:[#allocation2 + $0x34] sm:$0xff] }
 0x3bd   : > { %v6240_v41 = vpop.f32.mrb[59].mxu0  ;;  %v4058_v50 = vpack.c.bf16 %v4043_v13, %v4042_v48  ;;  %v4049_v48 = vld [vmem:[#allocation2 + $0x6c] sm:$0xff] }
 0x3be   : > { %v7301_v41 = vld [vmem:[%s10171_s2 + $0x1a0] sm:$0xff]  }
 0x3c0   : > { %6446 = vmatmul.mubr.bf16.gmra.mrb[32].mxu1 %v3849_v8  ;;  %v4044_v8 = vld [vmem:[#allocation2 + $0x44] sm:$0xff] }
 0x3c1   : > { %6465 = vmatprep.mubr.msk.bf16.mxu1 %vm10429_vm1, %v9045_v12  ;;  %v7298_v12 = vld [vmem:[%s10171_s2 + $0x188] sm:$0xff]  }
 0x3c2   : > { %v9886_v4 = vpop.f32.mrb[60].mxu0 }
 0x3c3   : > { %v6623_v26 = vpop.f32.mrb[61].mxu0 }
 0x3c4   : > { %v9888_v57 = vpop.f32.mrb[62].mxu0 }
 0x3c5   : > { %v6624_v46 = vpop.f32.mrb[63].mxu0 }
 0x3c6   : > { %v4045_v46 = vld [vmem:[#allocation2 + $0x4c] sm:$0xff] }
 0x3c8   : > { %6466 = vmatmul.mubr.bf16.vlgmr.msra.gmra.mrb[0].mxu1 %v4056_v22  ;;  %v4059_v22 = vpack.c.bf16 %v4045_v46, %v4044_v8  ;;  %v4052_v46 = vld [vmem:[#allocation2 + $0x84] sm:$0xff] }
 0x3c9   : > { %6502 = vmatpush3.bf16.msra.mxu1 %v7297_v11  ;;  %6469 = vmatprep.mubr.msk.bf16.mxu1 %vm10429_vm1, %v9899_v16  ;;  %v7303_v11 = vld [vmem:[%s10171_s2 + $0x1b0] sm:$0xff]  }
 0x3ca   : > { %v9892_v30 = vpop.f32.mrb[64].mxu0  ;;  %6503 = vmatprep.subr.bf16.mxu1 %v9899_v16 }
 0x3cb   : > { %v6627_v25 = vpop.f32.mrb[65].mxu0 }
 0x3cc   : > { %v9897_v39 = vpop.f32.mrb[66].mxu0 }
 0x3cd   : > { %v6628_v28 = vpop.f32.mrb[67].mxu0  ;;  %6504 = vmatpush3.bf16.msra.mxu1 %v7298_v12  ;;  %v7304_v12 = vld [vmem:[%s10171_s2 + $0x1b8] sm:$0xff]  }
 0x3ce   : > { %6505 = vmatprep.subr.bf16.mxu1 %v9899_v16 }
 0x3d0   : > { %6470 = vmatmul.mubr.bf16.gmra.mrb[4].mxu1 %v9914_v33 }
 0x3d1   : > { %6473 = vmatprep.mubr.msk.bf16.mxu1 %vm10429_vm1, %v9899_v16  ;;  %6506 = vmatpush3.bf16.msra.mxu1 %v7299_v23  ;;  %v4046_v23 = vld [vmem:[#allocation2 + $0x54] sm:$0xff] }
 0x3d2   : > { %v9907_v62 = vpop.f32.mrb[68].mxu0  ;;  %6507 = vmatprep.subr.bf16.mxu1 %v9899_v16 }
 0x3d3   : > { %v6631_v9 = vpop.f32.mrb[69].mxu0 }
 0x3d4   : > { %v9909_v51 = vpop.f32.mrb[70].mxu0 }
 0x3d5   : > { %v6632_v31 = vpop.f32.mrb[71].mxu0  ;;  %6508 = vmatpush3.bf16.msra.mxu1 %v7300_v36  ;;  %v4060_v36 = vpack.c.bf16 %v4047_v27, %v4046_v23  ;;  %v7306_v23 = vld [vmem:[%s10171_s2 + $0x1c8] sm:$0xff]  }
 0x3d6   : > { %6509 = vmatprep.subr.bf16.mxu1 %v9899_v16 }
 0x3d8   : > { %6474 = vmatmul.mubr.bf16.gmra.mrb[8].mxu1 %v4058_v50 }
 0x3d9   : > { %6477 = vmatprep.mubr.msk.bf16.mxu1 %vm10429_vm1, %v9899_v16  ;;  %6510 = vmatpush3.bf16.msra.mxu1 %v7301_v41 }
 0x3da   : > { %v9924_v3 = vpop.f32.mrb[72].mxu0  ;;  %6511 = vmatprep.subr.bf16.mxu1 %v9899_v16 }
 0x3db   : > { %v6635_v20 = vpop.f32.mrb[73].mxu0 }
 0x3dc   : > { %v9926_v5 = vpop.f32.mrb[74].mxu0  ;;  %v4048_v20 = vld [vmem:[#allocation2 + $0x64] sm:$0xff] }
 0x3dd   : > { %v6636_v26 = vpop.f32.mrb[75].mxu0  ;;  %6512 = vmatpush3.bf16.msra.mxu1 %v7302_v35  ;;  %v4061_v41 = vpack.c.bf16 %v4049_v48, %v4048_v20  ;;  %v4050_v35 = vld [vmem:[#allocation2 + $0x74] sm:$0xff]  ;;  %v7309_v20 = vld [vmem:[%s10171_s2 + $0x1e0] sm:$0xff]  }
 0x3de   : > { %6513 = vmatprep.subr.bf16.mxu1 %v9899_v16  ;;  %v4051_v26 = vld [vmem:[#allocation2 + $0x7c] sm:$0xff]  ;;  %v7311_v48 = vld [vmem:[%s10171_s2 + $0x1f0] sm:$0xff]  }
 0x3df   : > { %v4062_v8 = vpack.c.bf16 %v4051_v26, %v4050_v35  ;;  %v4270_v26 = vld [vmem:[#allocation2 + $0xac] sm:$0xff] }
 0x3e0   : > { %6478 = vmatmul.mubr.bf16.gmra.mrb[12].mxu1 %v4059_v22 }
 0x3e1   : > { %6481 = vmatprep.mubr.msk.bf16.mxu1 %vm10429_vm1, %v9899_v16  ;;  %6514 = vmatpush3.bf16.msra.mxu1 %v7303_v11 }
 0x3e2   : > { %v9938_v58 = vpop.f32.mrb[76].mxu0  ;;  %6515 = vmatprep.subr.bf16.mxu1 %v9899_v16 }
 0x3e3   : > { %v6639_v25 = vpop.f32.mrb[77].mxu0 }
 0x3e4   : > { %v9940_v61 = vpop.f32.mrb[78].mxu0  ;;  %v4053_v25 = vld [vmem:[#allocation2 + $0x8c] sm:$0xff] }
 0x3e5   : > { %v6640_v28 = vpop.f32.mrb[79].mxu0  ;;  %6516 = vmatpush3.bf16.msra.mxu1 %v7304_v12  ;;  %v4063_v11 = vpack.c.bf16 %v4053_v25, %v4052_v46  ;;  %v4054_v12 = vld [vmem:[#allocation2 + $0x94] sm:$0xff]  ;;  %v7319_v25 = vld [vmem:[%s10171_s2 + $0x200] sm:$0xff]  }
 0x3e6   : > { %6553 = vmatprep.subr.bf16.mxu1 %v9899_v16  ;;  %v4055_v28 = vld [vmem:[#allocation2 + $0x9c] sm:$0xff] }
 0x3e7   : > { %v4064_v27 = vpack.c.bf16 %v4055_v28, %v4054_v12  ;;  %v4470_v28 = vld [vmem:[#allocation2 + $0x35] sm:$0xff]  ;;  %v7320_v12 = vld [vmem:[%s10171_s2 + $0x208] sm:$0xff]  }
 0x3e8   : > { %6482 = vmatmul.mubr.bf16.gmra.mrb[16].mxu1 %v4060_v36 }
 0x3e9   : > { %6485 = vmatprep.mubr.msk.bf16.mxu1 %vm10429_vm1, %v9899_v16 }
 0x3ea   : > { %v9952_v63 = vpop.f32.mrb[80].mxu0 }
 0x3eb   : > { %v6643_v9 = vpop.f32.mrb[81].mxu0 }
 0x3ec   : > { %v9954_v31 = vpop.f32.mrb[82].mxu0  ;;  %v7305_v9 = vld [vmem:[%s10171_s2 + $0x1c0] sm:$0xff]  }
 0x3ed   : > { %v6644_v13 = vpop.f32.mrb[83].mxu0 }
 0x3ee   : > { %v7307_v13 = vld [vmem:[%s10171_s2 + $0x1d0] sm:$0xff]  }
 0x3f0   : > { %6486 = vmatmul.mubr.bf16.gmra.mrb[20].mxu1 %v4061_v41 }
 0x3f1   : > { %6489 = vmatprep.mubr.msk.bf16.mxu1 %vm10429_vm1, %v9899_v16 }
 0x3f8   : > { %6490 = vmatmul.mubr.bf16.gmra.mrb[24].mxu1 %v4062_v8 }
 0x3f9   : > { %6493 = vmatprep.mubr.msk.bf16.mxu1 %vm10429_vm1, %v9899_v16 }
 0x400   : > { %6494 = vmatmul.mubr.bf16.gmra.mrb[28].mxu1 %v4063_v11 }
 0x401   : > { %6497 = vmatprep.mubr.msk.bf16.mxu1 %vm10429_vm1, %v9899_v16 }
 0x408   : > { %6498 = vmatmul.mubr.bf16.gmra.mrb[32].mxu1 %v4064_v27 }
 0x409   : > { %6517 = vmatprep.mubr.msk.bf16.mxu1 %vm10429_vm1, %v9899_v16 }
 0x410   : > { %6518 = vmatmul.mubr.bf16.vlgmr.msra.gmra.mrb[0].mxu1 %v9914_v33  ;;  %v7308_v33 = vld [vmem:[%s10171_s2 + $0x1d8] sm:$0xff]  }
 0x411   : > { %6554 = vmatpush3.bf16.msra.mxu1 %v7305_v9  ;;  %6521 = vmatprep.mubr.msk.bf16.mxu1 %vm10429_vm1, %v9899_v16  ;;  %v7321_v9 = vld [vmem:[%s10171_s2 + $0x210] sm:$0xff]  }
 0x412   : > { %6555 = vmatprep.subr.bf16.mxu1 %v9899_v16 }
 0x415   : > { %6556 = vmatpush3.bf16.msra.mxu1 %v7306_v23  ;;  %v4472_v23 = vld [vmem:[#allocation2 + $0x45] sm:$0xff] }
 0x416   : > { %6557 = vmatprep.subr.bf16.mxu1 %v9899_v16 }
 0x418   : > { %6522 = vmatmul.mubr.bf16.gmra.mrb[4].mxu1 %v4058_v50  ;;  %v7310_v50 = vld [vmem:[%s10171_s2 + $0x1e8] sm:$0xff]  }
 0x419   : > { %6525 = vmatprep.mubr.msk.bf16.mxu1 %vm10429_vm1, %v9899_v16  ;;  %6558 = vmatpush3.bf16.msra.mxu1 %v7307_v13  ;;  %v4473_v13 = vld [vmem:[#allocation2 + $0x4d] sm:$0xff] }
 0x41a   : > { %6559 = vmatprep.subr.bf16.mxu1 %v9899_v16 }
 0x41d   : > { %6560 = vmatpush3.bf16.msra.mxu1 %v7308_v33  ;;  %v7322_v33 = vld [vmem:[%s10171_s2 + $0x218] sm:$0xff]  }
 0x41e   : > { %6561 = vmatprep.subr.bf16.mxu1 %v9899_v16 }
 0x420   : > { %6526 = vmatmul.mubr.bf16.gmra.mrb[8].mxu1 %v4059_v22  ;;  %v7312_v22 = vld [vmem:[%s10171_s2 + $0x1f8] sm:$0xff]  }
 0x421   : > { %6529 = vmatprep.mubr.msk.bf16.mxu1 %vm10429_vm1, %v9899_v16  ;;  %6562 = vmatpush3.bf16.msra.mxu1 %v7309_v20  ;;  %v4488_v20 = vpack.c.bf16 %v4473_v13, %v4472_v23  ;;  %v4484_v23 = vld [vmem:[#allocation2 + $0xa5] sm:$0xff]  ;;  %v4485_v13 = vld [vmem:[#allocation2 + $0xad] sm:$0xff] }
 0x422   : > { %6563 = vmatprep.subr.bf16.mxu1 %v9899_v16 }
 0x425   : > { %6564 = vmatpush3.bf16.msra.mxu1 %v7310_v50  ;;  %v7323_v50 = vld [vmem:[%s10171_s2 + $0x220] sm:$0xff]  }
 0x426   : > { %6565 = vmatprep.subr.bf16.mxu1 %v9899_v16 }
 0x428   : > { %6530 = vmatmul.mubr.bf16.gmra.mrb[12].mxu1 %v4060_v36  ;;  %v4269_v36 = vld [vmem:[#allocation2 + $0xa4] sm:$0xff] }
 0x429   : > { %6533 = vmatprep.mubr.msk.bf16.mxu1 %vm10429_vm1, %v9899_v16  ;;  %6566 = vmatpush3.bf16.msra.mxu1 %v7311_v48  ;;  %v4279_v35 = vpack.c.bf16 %v4270_v26, %v4269_v36  ;;  %v4475_v48 = vld [vmem:[#allocation2 + $0x5d] sm:$0xff]  ;;  %v7324_v36 = vld [vmem:[%s10171_s2 + $0x228] sm:$0xff]  }
 0x42a   : > { %6567 = vmatprep.subr.bf16.mxu1 %v9899_v16 }
 0x42d   : > { %6568 = vmatpush3.bf16.msra.mxu1 %v7312_v22  ;;  %v4474_v22 = vld [vmem:[#allocation2 + $0x55] sm:$0xff] }
 0x42e   : > { %6657 = vmatprep.subr.bf16.mxu1 %v9899_v16  ;;  %v4489_v26 = vpack.c.bf16 %v4475_v48, %v4474_v22  ;;  %v4698_v22 = vld [vmem:[#allocation2 + $0x9e] sm:$0xff] }
 0x430   : > { %6534 = vmatmul.mubr.bf16.gmra.mrb[16].mxu1 %v4061_v41  ;;  %v4468_v41 = vld [vmem:[#allocation2 + $0x25] sm:$0xff] }
 0x431   : > { %6537 = vmatprep.mubr.msk.bf16.mxu1 %vm10429_vm1, %v9899_v16 }
 0x438   : > { %6538 = vmatmul.mubr.bf16.gmra.mrb[20].mxu1 %v4062_v8  ;;  %v4469_v8 = vld [vmem:[#allocation2 + $0x2d] sm:$0xff] }
 0x439   : > { %6541 = vmatprep.mubr.msk.bf16.mxu1 %vm10429_vm1, %v9899_v16  ;;  %v4486_v46 = vpack.c.bf16 %v4469_v8, %v4468_v41  ;;  %v4477_v41 = vld [vmem:[#allocation2 + $0x6d] sm:$0xff] }
 0x440   : > { %6542 = vmatmul.mubr.bf16.gmra.mrb[24].mxu1 %v4063_v11  ;;  %v4471_v11 = vld [vmem:[#allocation2 + $0x3d] sm:$0xff] }
 0x441   : > { %6545 = vmatprep.mubr.msk.bf16.mxu1 %vm10429_vm1, %v9899_v16 }
 0x448   : > { %6546 = vmatmul.mubr.bf16.gmra.mrb[28].mxu1 %v4064_v27  ;;  %v4487_v27 = vpack.c.bf16 %v4471_v11, %v4470_v28  ;;  %v4480_v28 = vld [vmem:[#allocation2 + $0x85] sm:$0xff] }
 0x449   : > { %6549 = vmatprep.mubr.msk.bf16.mxu1 %vm10429_vm1, %v9899_v16 }
 0x450   : > { %6550 = vmatmul.mubr.bf16.gmra.mrb[32].mxu1 %v4279_v35  ;;  %v4476_v35 = vld [vmem:[#allocation2 + $0x65] sm:$0xff] }
 0x451   : > { %6569 = vmatprep.mubr.msk.bf16.mxu1 %vm10429_vm1, %v9899_v16  ;;  %v4490_v8 = vpack.c.bf16 %v4477_v41, %v4476_v35  ;;  %v4699_v35 = vld [vmem:[#allocation2 + $0xa6] sm:$0xff]  ;;  %v4700_v41 = vld [vmem:[#allocation2 + $0xae] sm:$0xff] }
 0x458   : > { %6570 = vmatmul.mubr.bf16.vlgmr.msra.gmra.mrb[0].mxu1 %v4486_v46  ;;  %v4479_v46 = vld [vmem:[#allocation2 + $0x7d] sm:$0xff] }
 0x459   : > { %6665 = vmatpush3.bf16.msra.mxu1 %v7319_v25  ;;  %6573 = vmatprep.mubr.msk.bf16.mxu1 %vm10429_vm1, %v9899_v16  ;;  %v4478_v25 = vld [vmem:[#allocation2 + $0x75] sm:$0xff] }
 0x45a   : > { %6658 = vmatprep.subr.bf16.mxu1 %v9899_v16  ;;  %v4491_v11 = vpack.c.bf16 %v4479_v46, %v4478_v25 }
 0x45d   : > { %6666 = vmatpush3.bf16.msra.mxu1 %v7320_v12 }
 0x45e   : > { %6659 = vmatprep.subr.bf16.mxu1 %v9899_v16 }
 0x460   : > { %6574 = vmatmul.mubr.bf16.gmra.mrb[4].mxu1 %v4487_v27  ;;  %v4482_v27 = vld [vmem:[#allocation2 + $0x95] sm:$0xff] }
 0x461   : > { %6577 = vmatprep.mubr.msk.bf16.mxu1 %vm10429_vm1, %v9899_v16  ;;  %6667 = vmatpush3.bf16.msra.mxu1 %v7321_v9 }
 0x462   : > { %6660 = vmatprep.subr.bf16.mxu1 %v9899_v16 }
 0x465   : > { %6668 = vmatpush3.bf16.msra.mxu1 %v7322_v33  ;;  %v4494_v33 = vpack.c.bf16 %v4485_v13, %v4484_v23  ;;  %v10651_v23 = vld [vmem:[#allocation9_spill] sm:$0xff] }
 0x466   : > { %6661 = vmatprep.subr.bf16.mxu1 %v9899_v16  ;;  %vm10652_vm13 = vnez %v10651_v23 }
 0x468   : > { %6578 = vmatmul.mubr.bf16.gmra.mrb[8].mxu1 %v4488_v20  ;;  %v4695_v20 = vld [vmem:[#allocation2 + $0x86] sm:$0xff] }
 0x469   : > { %6581 = vmatprep.mubr.msk.bf16.mxu1 %vm10429_vm1, %v9899_v16  ;;  %6669 = vmatpush3.bf16.msra.mxu1 %v7323_v50  ;;  %v4696_v50 = vld [vmem:[#allocation2 + $0x8e] sm:$0xff] }
 0x46a   : > { %6662 = vmatprep.subr.bf16.mxu1 %v9899_v16  ;;  %v4707_v48 = vpack.c.bf16 %v4696_v50, %v4695_v20 }
 0x46d   : > { %6670 = vmatpush3.bf16.msra.mxu1 %v7324_v36  ;;  %v4697_v36 = vld [vmem:[#allocation2 + $0x96] sm:$0xff] }
 0x46e   : > { %6663 = vmatprep.subr.bf16.mxu1 %v9899_v16 }
 0x470   : > { %6582 = vmatmul.mubr.bf16.gmra.mrb[12].mxu1 %v4489_v26  ;;  %v4708_v26 = vpack.c.bf16 %v4698_v22, %v4697_v36 }
 0x471   : > { %6585 = vmatprep.mubr.msk.bf16.mxu1 %vm10429_vm1, %v9899_v16  ;;  %6671 = vmatpush3.bf16.msra.mxu1 %v9493_v45  ;;  %v4481_v45 = vld [vmem:[#allocation2 + $0x8d] sm:$0xff] }
 0x472   : > { %6664 = vmatprep.subr.bf16.mxu1 %v9899_v16  ;;  %v4492_v12 = vpack.c.bf16 %v4481_v45, %v4480_v28 }
 0x475   : > { %6672 = vmatpush3.bf16.msra.mxu1 %v9569_v15  ;;  %v4483_v15 = vld [vmem:[#allocation2 + $0x9d] sm:$0xff] }
 0x476   : > { %v4493_v9 = vpack.c.bf16 %v4483_v15, %v4482_v27  ;;  %v10649_v27 = vld [vmem:[#allocation4_spill] sm:$0xff] }
 0x478   : > { %6586 = vmatmul.mubr.bf16.gmra.mrb[16].mxu1 %v4490_v8  ;;  %v4709_v8 = vpack.c.bf16 %v4700_v41, %v4699_v35  ;;  %v10653_v41 = vld [vmem:[#allocation3_spill] sm:$0xff] }
 0x479   : > { %6589 = vmatprep.mubr.msk.bf16.mxu1 %vm10429_vm1, %v9899_v16  ;;  %vm10654_vm6 = vnez %v10653_v41 }
 0x480   : > { %6590 = vmatmul.mubr.bf16.gmra.mrb[20].mxu1 %v4491_v11 }
 0x481   : > { %6593 = vmatprep.mubr.msk.bf16.mxu1 %vm10429_vm1, %v9899_v16 }
 0x488   : > { %6594 = vmatmul.mubr.bf16.gmra.mrb[24].mxu1 %v4492_v12 }
 0x489   : > { %6597 = vmatprep.mubr.msk.bf16.mxu1 %vm10429_vm1, %v9899_v16 }
 0x490   : > { %6598 = vmatmul.mubr.bf16.gmra.mrb[28].mxu1 %v4493_v9 }
 0x491   : > { %6601 = vmatprep.mubr.msk.bf16.mxu1 %vm10429_vm1, %v9899_v16 }
 0x498   : > { %6602 = vmatmul.mubr.bf16.gmra.mrb[32].mxu1 %v4494_v33 }
 0x499   : > { %6645 = vmatprep.mubr.msk.bf16.mxu1 %vm10429_vm1, %v9899_v16 }
 0x4a0   : > { %6646 = vmatmul.mubr.bf16.vlgmr.msra.gmra.mrb[24].mxu1 %v4707_v48 }
 0x4a1   : > { %6649 = vmatprep.mubr.msk.bf16.mxu1 %vm10429_vm1, %v9899_v16 }
 0x4a8   : > { %6650 = vmatmul.mubr.bf16.gmra.mrb[28].mxu1 %v4708_v26 }
 0x4a9   : > { %6653 = vmatprep.mubr.msk.bf16.mxu1 %vm10429_vm1, %v9899_v16  ;;  %vm10650_vm1 = vnez %v10649_v27 }
 0x4b0   : > { %6654 = vmatmul.mubr.bf16.gmra.mrb[32].mxu1 %v4709_v8 }
 0x52b   : > { %v4594_v46 = vpop.f32.mrb[0].mxu1 }
 0x52c   : > { %v6673_v25 = vadd.f32 %v4594_v46, %v9800_v60  ;;  %v6571_v11 = vpop.f32.mrb[1].mxu1 }
 0x52d   : > { %v4597_v28 = vpop.f32.mrb[2].mxu1 }
 0x52e   : > { %v6674_v45 = vadd.f32 %v6673_v25, %v9886_v4  ;;  %v6675_v12 = vadd.f32 %v4597_v28, %v9802_v29  ;;  %v6572_v15 = vpop.f32.mrb[3].mxu1 }
 0x530   : > { %v5024_v16 = vsel %vm10650_vm1, %v6674_v45, 0.0  ;;  %v6676_v9 = vadd.f32 %v6675_v12, %v9888_v57  ;;  %vm10661_vm1 = vnez %v10319_v42 }
 0x531   : > { %v5066_v4 = vmul.f32 %v5024_v16, %v5024_v16 }
 0x532   : > { %v5635_v60 = vpack.c.bf16 %v6676_v9, %v6674_v45  ;;  %v5025_v13 = vsel %vm10652_vm13, %v6676_v9, 0.0  ;;  %v10655_v45 = vld [vmem:[#allocation5_spill] sm:$0xff]  ;;  %vm10662_vm13 = vnez %v10342_v0 }
 0x533   : > { %v5042_v33 = vadd.f32 %v5025_v13, %v5024_v16  ;;  %v5067_v20 = vmul.f32 %v5025_v13, %v5025_v13  ;;  %v4602_v29 = vpop.f32.mrb[4].mxu1  ;;  %vm10656_vm8 = vnez %v10655_v45 }
 0x534   : > { %5636 = vst [vmem:[%s10078_s14] sm:$0xff] %v5635_v60   ;;  %v6677_v50 = vadd.f32 %v4602_v29, %v9806_v6  ;;  %v6575_v48 = vpop.f32.mrb[5].mxu1 }
 0x535   : > { %v5084_v57 = vadd.f32 %v5067_v20, %v5066_v4  ;;  %v4605_v22 = vpop.f32.mrb[6].mxu1  ;;  %v10657_v4 = vld [vmem:[#allocation12_spill] sm:$0xff] }
 0x536   : > { %v6678_v36 = vadd.f32 %v6677_v50, %v9892_v30  ;;  %v6679_v26 = vadd.f32 %v4605_v22, %v9811_v34  ;;  %v6576_v35 = vpop.f32.mrb[7].mxu1  ;;  %vm10658_vm7 = vnez %v10657_v4 }
 0x538   : > { %v5026_v8 = vsel %vm10654_vm6, %v6678_v36, 0.0  ;;  %v6680_v46 = vadd.f32 %v6679_v26, %v9897_v39 }
 0x539   : > { %v5043_v25 = vadd.f32 %v5042_v33, %v5026_v8  ;;  %v5068_v11 = vmul.f32 %v5026_v8, %v5026_v8 }
 0x53a   : > { %v5640_v28 = vpack.c.bf16 %v6680_v46, %v6678_v36  ;;  %v5027_v6 = vsel %vm10656_vm8, %v6680_v46, 0.0 }
 0x53b   : > { %v5085_v12 = vadd.f32 %v5084_v57, %v5068_v11  ;;  %v5044_v15 = vadd.f32 %v5043_v25, %v5027_v6  ;;  %v5069_v27 = vmul.f32 %v5027_v6, %v5027_v6  ;;  %v4610_v16 = vpop.f32.mrb[8].mxu1  ;;  %v10659_v57 = vld [vmem:[#allocation14_spill] sm:$0xff] }
 0x53c   : > { %5677 = vst [vmem:[%s10078_s14 + $0x8] sm:$0xff] %v5640_v28   ;;  %v6681_v30 = vadd.f32 %v4610_v16, %v9819_v53  ;;  %v6579_v34 = vpop.f32.mrb[9].mxu1  ;;  %vm10660_vm0 = vnez %v10659_v57 }
 0x53d   : > { %v5086_v9 = vadd.f32 %v5085_v12, %v5069_v27  ;;  %v4613_v60 = vpop.f32.mrb[10].mxu1 }
 0x53e   : > { %v6682_v23 = vadd.f32 %v6681_v30, %v9907_v62  ;;  %v6683_v39 = vadd.f32 %v4613_v60, %v9821_v55  ;;  %v6580_v13 = vpop.f32.mrb[11].mxu1 }
 0x540   : > { %v5028_v33 = vsel %vm10658_vm7, %v6682_v23, 0.0  ;;  %v6684_v20 = vadd.f32 %v6683_v39, %v9909_v51 }
 0x541   : > { %v5045_v29 = vadd.f32 %v5044_v15, %v5028_v33  ;;  %v5070_v50 = vmul.f32 %v5028_v33, %v5028_v33 }
 0x542   : > { %v5645_v48 = vpack.c.bf16 %v6684_v20, %v6682_v23  ;;  %v5029_v53 = vsel %vm10660_vm0, %v6684_v20, 0.0 }
 0x543   : > { %v5087_v22 = vadd.f32 %v5086_v9, %v5070_v50  ;;  %v5046_v36 = vadd.f32 %v5045_v29, %v5029_v53  ;;  %v5071_v26 = vmul.f32 %v5029_v53, %v5029_v53  ;;  %v4618_v35 = vpop.f32.mrb[12].mxu1 }
 0x544   : > { %5678 = vst [vmem:[%s10078_s14 + $0x10] sm:$0xff] %v5645_v48   ;;  %v6685_v62 = vadd.f32 %v4618_v35, %v9833_v14  ;;  %v6583_v55 = vpop.f32.mrb[13].mxu1 }
 0x545   : > { %v5088_v41 = vadd.f32 %v5087_v22, %v5071_v26  ;;  %v4621_v8 = vpop.f32.mrb[14].mxu1 }
 0x546   : > { %v6686_v46 = vadd.f32 %v6685_v62, %v9924_v3  ;;  %v6687_v51 = vadd.f32 %v4621_v8, %v9835_v40  ;;  %v6584_v25 = vpop.f32.mrb[15].mxu1 }
 0x548   : > { %v5030_v11 = vsel %vm10661_vm1, %v6686_v46, 0.0  ;;  %v6688_v28 = vadd.f32 %v6687_v51, %v9926_v5 }
 0x549   : > { %v5047_v45 = vadd.f32 %v5046_v36, %v5030_v11  ;;  %v5072_v6 = vmul.f32 %v5030_v11, %v5030_v11 }
 0x54a   : > { %v5650_v12 = vpack.c.bf16 %v6688_v28, %v6686_v46  ;;  %v5031_v14 = vsel %vm10662_vm13, %v6688_v28, 0.0 }
 0x54b   : > { %v5089_v15 = vadd.f32 %v5088_v41, %v5072_v6  ;;  %v5048_v27 = vadd.f32 %v5047_v45, %v5031_v14  ;;  %v5073_v16 = vmul.f32 %v5031_v14, %v5031_v14  ;;  %v4626_v30 = vpop.f32.mrb[16].mxu1 }
 0x54c   : > { %5679 = vst [vmem:[%s10078_s14 + $0x18] sm:$0xff] %v5650_v12   ;;  %v6689_v3 = vadd.f32 %v4626_v30, %v9847_v47  ;;  %v6587_v40 = vpop.f32.mrb[17].mxu1 }
 0x54d   : > { %v5090_v34 = vadd.f32 %v5089_v15, %v5073_v16  ;;  %v4629_v42 = vpop.f32.mrb[18].mxu1 }
 0x54e   : > { %v6690_v9 = vadd.f32 %v6689_v3, %v9938_v58  ;;  %v6691_v5 = vadd.f32 %v4629_v42, %v9849_v19  ;;  %v6588_v60 = vpop.f32.mrb[19].mxu1 }
 0x550   : > { %v5032_v0 = vsel %vm10611_vm11, %v6690_v9, 0.0  ;;  %v6692_v23 = vadd.f32 %v6691_v5, %v9940_v61 }
 0x551   : > { %v5049_v39 = vadd.f32 %v5048_v27, %v5032_v0  ;;  %v5074_v13 = vmul.f32 %v5032_v0, %v5032_v0 }
 0x552   : > { %v5655_v4 = vpack.c.bf16 %v6692_v23, %v6690_v9  ;;  %v5033_v47 = vsel %vm10614_vm9, %v6692_v23, 0.0 }
 0x553   : > { %v5091_v33 = vadd.f32 %v5090_v34, %v5074_v13  ;;  %v5050_v20 = vadd.f32 %v5049_v39, %v5033_v47  ;;  %v5075_v29 = vmul.f32 %v5033_v47, %v5033_v47  ;;  %v4634_v50 = vpop.f32.mrb[20].mxu1 }
 0x554   : > { %5680 = vst [vmem:[%s10078_s14 + $0x20] sm:$0xff] %v5655_v4   ;;  %v6693_v58 = vadd.f32 %v4634_v50, %v9861_v21  ;;  %v6591_v19 = vpop.f32.mrb[21].mxu1 }
 0x555   : > { %v5092_v48 = vadd.f32 %v5091_v33, %v5075_v29  ;;  %v4637_v54 = vpop.f32.mrb[22].mxu1 }
 0x556   : > { %v6694_v57 = vadd.f32 %v6693_v58, %v9952_v63  ;;  %v6695_v61 = vadd.f32 %v4637_v54, %v9863_v44  ;;  %v6592_v53 = vpop.f32.mrb[23].mxu1 }
 0x558   : > { %v5034_v56 = vsel %vm10620_vm2, %v6694_v57, 0.0  ;;  %v6696_v22 = vadd.f32 %v6695_v61, %v9954_v31 }
 0x559   : > { %v5051_v36 = vadd.f32 %v5050_v20, %v5034_v56  ;;  %v5076_v26 = vmul.f32 %v5034_v56, %v5034_v56 }
 0x55a   : > { %v5660_v35 = vpack.c.bf16 %v6696_v22, %v6694_v57  ;;  %v5035_v21 = vsel %vm10623_vm15, %v6696_v22, 0.0 }
 0x55b   : > { %v5093_v62 = vadd.f32 %v5092_v48, %v5076_v26  ;;  %v5077_v55 = vmul.f32 %v5035_v21, %v5035_v21  ;;  %v5052_v41 = vadd.f32 %v5051_v36, %v5035_v21 }
 0x55c   : > { %5681 = vst [vmem:[%s10078_s14 + $0x28] sm:$0xff] %v5660_v35  }
 0x55d   : > { %v5094_v63 = vadd.f32 %v5093_v62, %v5077_v55 }
 0x573   : > { %v4857_v8 = vpop.f32.mrb[24].mxu1 }
 0x574   : > { %v6697_v44 = vadd.f32 %v4857_v8, %v9868_v49  ;;  %v6647_v46 = vpop.f32.mrb[25].mxu1 }
 0x575   : > { %v4860_v38 = vpop.f32.mrb[26].mxu1 }
 0x576   : > { %v5036_v31 = vsel %vm10628_vm5, %v6697_v44, 0.0  ;;  %v6698_v51 = vadd.f32 %v4860_v38, %v9870_v32  ;;  %v6648_v25 = vpop.f32.mrb[27].mxu1 }
 0x577   : > { %v5053_v11 = vadd.f32 %v5052_v41, %v5036_v31  ;;  %v5078_v59 = vmul.f32 %v5036_v31, %v5036_v31 }
 0x578   : > { %v5665_v28 = vpack.c.bf16 %v6698_v51, %v6697_v44  ;;  %v5037_v45 = vsel %vm10631_vm10, %v6698_v51, 0.0 }
 0x579   : > { %v5095_v6 = vadd.f32 %v5094_v63, %v5078_v59  ;;  %v5054_v12 = vadd.f32 %v5053_v11, %v5037_v45  ;;  %v5079_v14 = vmul.f32 %v5037_v45, %v5037_v45 }
 0x57a   : > { %5682 = vst [vmem:[%s10078_s14 + $0x30] sm:$0xff] %v5665_v28  }
 0x57b   : > { %v5096_v49 = vadd.f32 %v5095_v6, %v5079_v14  ;;  %v4865_v15 = vpop.f32.mrb[28].mxu1 }
 0x57c   : > { %v6699_v27 = vadd.f32 %v4865_v15, %v9874_v2  ;;  %v6651_v1 = vpop.f32.mrb[29].mxu1 }
 0x57d   : > { %v4868_v16 = vpop.f32.mrb[30].mxu1 }
 0x57e   : > { %v5038_v32 = vsel %vm10636_vm14, %v6699_v27, 0.0  ;;  %v6700_v30 = vadd.f32 %v4868_v16, %v9876_v52  ;;  %v6652_v3 = vpop.f32.mrb[31].mxu1 }
 0x57f   : > { %v5055_v40 = vadd.f32 %v5054_v12, %v5038_v32  ;;  %v5080_v17 = vmul.f32 %v5038_v32, %v5038_v32 }
 0x580   : > { %v5670_v34 = vpack.c.bf16 %v6700_v30, %v6699_v27  ;;  %v5039_v42 = vsel %vm10639_vm12, %v6700_v30, 0.0 }
 0x581   : > { %v5097_v9 = vadd.f32 %v5096_v49, %v5080_v17  ;;  %v5056_v5 = vadd.f32 %v5055_v40, %v5039_v42  ;;  %v5081_v60 = vmul.f32 %v5039_v42, %v5039_v42 }
 0x582   : > { %5683 = vst [vmem:[%s10078_s14 + $0x38] sm:$0xff] %v5670_v34  }
 0x583   : > { %v5098_v2 = vadd.f32 %v5097_v9, %v5081_v60  ;;  %v4873_v0 = vpop.f32.mrb[32].mxu1 }
 0x584   : > { %v6701_v10 = vadd.f32 %v4873_v0, %v9880_v7  ;;  %v6655_v23 = vpop.f32.mrb[33].mxu1 }
 0x585   : > { %v4876_v39 = vpop.f32.mrb[34].mxu1 }
 0x586   : > { %v5040_v52 = vsel %vm10644_vm3, %v6701_v10, 0.0  ;;  %v6702_v13 = vadd.f32 %v4876_v39, %v9882_v43  ;;  %v6656_v24 = vpop.f32.mrb[35].mxu1 }
 0x587   : > { %v5057_v4 = vadd.f32 %v5056_v5, %v5040_v52  ;;  %v5082_v47 = vmul.f32 %v5040_v52, %v5040_v52 }
 0x588   : > { %v5675_v33 = vpack.c.bf16 %v6702_v13, %v6701_v10  ;;  %v5041_v20 = vsel %vm10647_vm4, %v6702_v13, 0.0 }
 0x589   : > { %v5099_v29 = vadd.f32 %v5098_v2, %v5082_v47  ;;  %v5058_v50 = vadd.f32 %v5057_v4, %v5041_v20  ;;  %v5083_v58 = vmul.f32 %v5041_v20, %v5041_v20 }
 0x58a   : > { %5684 = vst [vmem:[%s10078_s14 + $0x40] sm:$0xff] %v5675_v33  }
 0x58b   : > { %v5059_v7 = vrot.slane %v5058_v50, 4  ;;  %v5100_v19 = vadd.f32 %v5099_v29, %v5083_v58 }
 0x58d   : > { %v5060_v48 = vadd.f32 %v5059_v7, %v5058_v50  ;;  %v5101_v18 = vrot.slane %v5100_v19, 4 }
 0x58f   : > { %v5061_v54 = vrot.slane %v5060_v48, 2  ;;  %v5102_v57 = vadd.f32 %v5101_v18, %v5100_v19 }
 0x591   : > { %v5062_v43 = vadd.f32 %v5061_v54, %v5060_v48  ;;  %v5103_v61 = vrot.slane %v5102_v57, 2 }
 0x593   : > { %v5063_v53 = vrot.slane %v5062_v43, 1  ;;  %v5104_v56 = vadd.f32 %v5103_v61, %v5102_v57 }
 0x595   : > { %v5064_v37 = vadd.f32 %v5063_v53, %v5062_v43  ;;  %v5105_v22 = vrot.slane %v5104_v56, 1 }
 0x597   : > { %5065 = vst [vmem:[%s308_s20] sm:$0x1] %v5064_v37  ;;  %v5106_v36 = vadd.f32 %v5105_v22, %v5104_v56 }
 0x599   : > { %5107 = vst [vmem:[%s308_s20 + $0x1] sm:$0x1] %v5106_v36 }
 0x59a PF: > { %s17_s25 = sadd.s32 1, %s7390_s25   ;;  %s10663_s21 = smov %s7382_s23 }
 0x59b   : > { %p14_p9 = scmp.ge.s32.totalorder %s17_s25, 6   ;;  %s10664_s22 = smov %s7386_s24 }
 0x59c   : > { %s10665_s23 = smov %s10668_s26  ;;  %s10666_s24 = smov %s10672_s27 }
 0x59d   :  { %16 = sbr.rel (!%p14_p9) target bundleno = 3 (0x3), region = 98 }

</bundles_post_ra>
